<compile_context>
chip_gen: v7x
topology: tpu7x:2x2x1
jax: 0.10.0
libtpu: 0.0.40
codegen_flags: <defaults>
</compile_context>

<pallas_src>
import functools

import jax
import jax.numpy as jnp
from jax.experimental import pallas as pl
from jax.experimental.pallas import tpu as pltpu

BN_EPS = 1e-5


# ---------------------------------------------------------------------------
# Fused kernel: one grid step = one image, everything stays in VMEM/vregs.
#   a1   = relu(bn1(x))
#   a2   = relu(a1 @ w1_folded + t2_folded)          (1x1 conv, BN2/bias folded)
#   conv = taps(a2, halo=1) @ w3_mat + b3            (ONE K=9*Cmid MXU matmul)
#   out  = [x | conv]   stored channel-major (NCHW-flattened), lane-dense
# ---------------------------------------------------------------------------
def _fused_block_kernel(x_ref, s1_ref, t1_ref, w1_ref, t2_ref, w3_ref, b3_ref,
                        o_ref, a2p_ref, taps_ref, *, H, W):
    cin = x_ref.shape[1]
    cmid = w1_ref.shape[1]
    cout = w3_ref.shape[1]
    HW = H * W

    x = x_ref[0]                                      # (Cin, H*W) f32, channel-major

    # Pass-through half of the concat: dense (Cin, H*W) store, already NCHW-flat.
    o_ref[0, pl.ds(0, cin), :] = x

    # ---- BN1 + ReLU (spatial-major: channels -> lanes) ----------------------
    xT = x.T                                          # (H*W, Cin) tiny XLU transpose
    a1 = jnp.maximum(xT * s1_ref[...] + t1_ref[...], 0.0)

    # ---- 1x1 conv (BN2 scale + conv1 bias folded into w1 / t2 host-side) ----
    w1 = w1_ref[...]                                  # (Cin, Cmid) f32
    if cin >= 16:
        z = jnp.dot(a1.astype(jnp.bfloat16), w1.astype(jnp.bfloat16),
                    preferred_element_type=jnp.float32)
    else:
        # Tiny Cin: a K=Cin MXU matmul fills ~3% of the array -> VPU MACs.
        z = a1[:, 0:1] * w1[0:1, :]
        for c in range(1, cin):
            z = z + a1[:, c:c + 1] * w1[c:c + 1, :]
    a2 = jnp.maximum(z + t2_ref[...], 0.0)            # (H*W, Cmid) f32

    # ---- zero-padded (halo = 1) copy of a2 ----------------------------------
    # Zero only the 1-wide border strips (~2K elems); interior is fully
    # overwritten each step.  Done per step => correct under megacore sharding.
    zrow = jnp.zeros((1, W + 2, cmid), a2p_ref.dtype)
    zcol = jnp.zeros((H, 1, cmid), a2p_ref.dtype)
    a2p_ref[pl.ds(0, 1), :, :] = zrow
    a2p_ref[pl.ds(H + 1, 1), :, :] = zrow
    a2p_ref[pl.ds(1, H), pl.ds(0, 1), :] = zcol
    a2p_ref[pl.ds(1, H), pl.ds(W + 1, 1), :] = zcol
    a2p_ref[pl.ds(1, H), pl.ds(1, W), :] = a2.reshape(H, W, cmid)

    # ---- fused im2col: build (H*W, 9*Cmid) bf16 tap matrix in VMEM ----------
    for dh in range(3):                # static, unrolled; 1 slab load per dh
        slab = a2p_ref[pl.ds(dh, H), :, :]            # (H, W+2, Cmid) f32
        for dw in range(3):
            k = dh * 3 + dw
            tap = slab[:, dw:dw + W, :].reshape(HW, cmid)
            taps_ref[:, pl.ds(k * cmid, cmid)] = tap.astype(jnp.bfloat16)

    # ---- single K = 9*Cmid MXU matmul + bias ---------------------------------
    conv = jnp.dot(taps_ref[...], w3_ref[...],
                   preferred_element_type=jnp.float32) + b3_ref[...]  # (H*W, Cout)

    # Conv half of the concat: small XLU transpose back to channel-major.
    o_ref[0, pl.ds(cin, cout), :] = conv.T.astype(o_ref.dtype)


# ---------------------------------------------------------------------------
# VMEM budget helper: accounts for (sublane, lane) tile padding.
# ---------------------------------------------------------------------------
def _padded_vmem_bytes(shape, dtype):
    item = jnp.dtype(dtype).itemsize
    sub = max(8, 32 // item)                 # 8 rows f32, 16 bf16, 32 int8
    shape = tuple(shape)
    if len(shape) == 1:
        lead, rows, cols = 1, 1, shape[0]
    else:
        lead = 1
        for d in shape[:-2]:
            lead *= d
        rows, cols = shape[-2], shape[-1]
    rows = -(-rows // sub) * sub
    cols = -(-cols // 128) * 128
    return lead * rows * cols * item


# ---------------------------------------------------------------------------
# Wrapper: full `block.forward` (NCHW in / NCHW out, like PyTorch).
# No transposes in the wrapper — only free reshapes.
# ---------------------------------------------------------------------------
@jax.jit
def block_forward(x_nchw, params):
    x = x_nchw.astype(jnp.float32)
    n, cin, h, w = x.shape
    hw = h * w
    cmid = params["w1"].shape[1]
    cout = params["w3"].shape[-1]
    ccat = cin + cout

    # Fold BatchNorm (inference / running stats) into per-channel scale+shift.
    s1 = params["gamma1"] / jnp.sqrt(params["var1"] + BN_EPS)
    t1 = params["beta1"] - params["mean1"] * s1
    s2 = params["gamma2"] / jnp.sqrt(params["var2"] + BN_EPS)
    t2 = params["beta2"] - params["mean2"] * s2
    # Fold BN2 scale and the 1x1-conv bias into the 1x1 weights / one shift:
    #   relu((a1 @ w1 + b1) * s2 + t2) == relu(a1 @ (w1 * s2) + (b1 * s2 + t2))
    w1f = params["w1"] * s2[None, :]                       # (Cin, Cmid) f32
    t2f = (t2 + params["b1"] * s2)[None, :]                # (1, Cmid)   f32

    # 3x3 weights for the fused-K matmul: K index = (dh*3+dw)*Cmid + c.
    w3_mat = params["w3"].reshape(9 * cmid, cout).astype(jnp.bfloat16)

    # NCHW-flattened input/output: (n, C, H*W) — lane-dense HBM tiles.
    x_flat = x.reshape(n, cin, hw)

    # ---- padded VMEM budget + explicit limit ---------------------------------
    est = (2 * _padded_vmem_bytes((cin, hw), jnp.float32)          # x (dbl-buf)
           + 2 * _padded_vmem_bytes((ccat, hw), jnp.float32)       # out (dbl-buf)
           + 2 * (2 * _padded_vmem_bytes((1, cin), jnp.float32)
                  + _padded_vmem_bytes((cin, cmid), jnp.float32)
                  + _padded_vmem_bytes((1, cmid), jnp.float32)
                  + _padded_vmem_bytes((9 * cmid, cout), jnp.bfloat16)
                  + _padded_vmem_bytes((1, cout), jnp.float32))
           + _padded_vmem_bytes((h + 2, w + 2, cmid), jnp.float32)  # halo scratch
           + _padded_vmem_bytes((hw, 9 * cmid), jnp.bfloat16))      # tap scratch
    # 12 MiB keeps headroom under v5e's 16 MiB scoped default and v7x's 32/64 MiB.
    assert est < 12 * 1024 * 1024, (
        f"per-image VMEM footprint {est} B too large; add H-row tiling (TODO)")
    vmem_limit = int(min(max(2 * est, 8 * 1024 * 1024), 24 * 1024 * 1024))

    kernel = functools.partial(_fused_block_kernel, H=h, W=w)

    out_flat = pl.pallas_call(
        kernel,
        out_shape=jax.ShapeDtypeStruct((n, ccat, hw), jnp.float32),
        grid_spec=pltpu.PrefetchScalarGridSpec(
            num_scalar_prefetch=0,
            grid=(n,),
            in_specs=[
                pl.BlockSpec((1, cin, hw), lambda i: (i, 0, 0)),      # x (NCHW-flat)
                pl.BlockSpec((1, cin), lambda i: (0, 0)),             # s1
                pl.BlockSpec((1, cin), lambda i: (0, 0)),             # t1
                pl.BlockSpec((cin, cmid), lambda i: (0, 0)),          # w1 (BN2-folded)
                pl.BlockSpec((1, cmid), lambda i: (0, 0)),            # t2 (folded shift)
                pl.BlockSpec((9 * cmid, cout), lambda i: (0, 0)),     # w3 (9*Cmid, Cout)
                pl.BlockSpec((1, cout), lambda i: (0, 0)),            # b3
            ],
            out_specs=pl.BlockSpec((1, ccat, hw), lambda i: (i, 0, 0)),
            scratch_shapes=[
                pltpu.VMEM((h + 2, w + 2, cmid), jnp.float32),   # halo copy of a2
                pltpu.VMEM((hw, 9 * cmid), jnp.bfloat16),        # fused-K tap matrix
            ]),
        compiler_params=pltpu.CompilerParams(
            dimension_semantics=("parallel",),
            vmem_limit_bytes=vmem_limit),
    )(x_flat, s1[None, :], t1[None, :], w1f, t2f, w3_mat, params["b3"][None, :])

    return out_flat.reshape(n, ccat, h, w)                        # NCHW, no transpose


# ---------------------------------------------------------------------------
# Pure-JAX f32 reference (same math) for a correctness check
# ---------------------------------------------------------------------------
def block_reference(x_nchw, params):
    x = jnp.transpose(x_nchw, (0, 2, 3, 1)).astype(jnp.float32)
    a1 = jnp.maximum(
        (x - params["mean1"]) / jnp.sqrt(params["var1"] + BN_EPS)
        * params["gamma1"] + params["beta1"], 0.0)
    y = jnp.einsum("nhwc,cd->nhwd", a1, params["w1"]) + params["b1"]
    a2 = jnp.maximum(
        (y - params["mean2"]) / jnp.sqrt(params["var2"] + BN_EPS)
        * params["gamma2"] + params["beta2"], 0.0)
    out = jax.lax.conv_general_dilated(
        a2, params["w3"], window_strides=(1, 1), padding="SAME",
        dimension_numbers=("NHWC", "HWIO", "NHWC")) + params["b3"]
    cat = jnp.concatenate([x, out], axis=-1)
    return jnp.transpose(cat, (0, 3, 1, 2))


def init_params(key, in_channels, growth_rate, bottleneck_width):
    cmid = bottleneck_width * growth_rate
    cout = growth_rate
    ks = jax.random.split(key, 8)
    return {
        # BatchNorm2d(in_channels)
        "gamma1": 1.0 + 0.1 * jax.random.normal(ks[0], (in_channels,), jnp.float32),
        "beta1": 0.1 * jax.random.normal(ks[1], (in_channels,), jnp.float32),
        "mean1": 0.1 * jax.random.normal(ks[2], (in_channels,), jnp.float32),
        "var1": jax.random.uniform(ks[3], (in_channels,), jnp.float32, 0.5, 1.5),
        # Conv2d(in_channels, cmid, 1) -> stored as (Cin, Cmid)
        "w1": 0.1 * jax.random.normal(ks[4], (in_channels, cmid), jnp.float32),
        "b1": 0.01 * jnp.arange(cmid, dtype=jnp.float32),
        # BatchNorm2d(cmid)
        "gamma2": 1.0 + 0.1 * jax.random.normal(ks[5], (cmid,), jnp.float32),
        "beta2": 0.1 * jax.random.normal(ks[6], (cmid,), jnp.float32),
        "mean2": jnp.zeros((cmid,), jnp.float32),
        "var2": jnp.ones((cmid,), jnp.float32),
        # Conv2d(cmid, growth_rate, 3, padding=1) -> stored HWIO (3,3,Cmid,Cout)
        "w3": 0.1 * jax.random.normal(ks[7], (3, 3, cmid, cout), jnp.float32),
        "b3": 0.01 * jnp.arange(cout, dtype=jnp.float32),
    }


if __name__ == "__main__":
    in_channels, growth_rate, bottleneck_width = 4, 8, 4
    key = jax.random.PRNGKey(0)
    k_x, k_p = jax.random.split(key)

    x = jax.random.normal(k_x, (2, in_channels, 16, 16), jnp.float32)  # NCHW
    params = init_params(k_p, in_channels, growth_rate, bottleneck_width)

    out = jax.block_until_ready(block_forward(x, params))
    ref = jax.block_until_ready(block_reference(x, params))

    assert out.shape == (2, in_channels + growth_rate, 16, 16), out.shape
    # Pass-through (concat) channels must match the input exactly.
    assert jnp.allclose(out[:, :in_channels], x, atol=1e-6)
    # Conv path uses bf16 MXU operands (f32 accumulate) -> relaxed tolerance
    # versus the all-f32 reference.
    max_err = float(jnp.max(jnp.abs(out - ref)))
    assert jnp.allclose(out, ref, atol=5e-2, rtol=5e-2), max_err

    print("KERNEL_OK")
</pallas_src>

<mosaic_0001>
module attributes {stable_mosaic.version = 11 : i64} {
  func.func @_fused_block_kernel(%arg0: i32, %arg1: memref<1x4x256xf32, #tpu.memory_space<vmem>>, %arg2: memref<1x4xf32, #tpu.memory_space<vmem>>, %arg3: memref<1x4xf32, #tpu.memory_space<vmem>>, %arg4: memref<4x32xf32, #tpu.memory_space<vmem>>, %arg5: memref<1x32xf32, #tpu.memory_space<vmem>>, %arg6: memref<288x8xbf16, #tpu.memory_space<vmem>>, %arg7: memref<1x8xf32, #tpu.memory_space<vmem>>, %arg8: memref<1x12x256xf32, #tpu.memory_space<vmem>>, %arg9: memref<18x18x32xf32, #tpu.memory_space<vmem>>, %arg10: memref<256x288xbf16, #tpu.memory_space<vmem>>) attributes {dimension_semantics = [#tpu.dimension_semantics<parallel>], iteration_bounds = array<i64: 2>, scalar_prefetch = 0 : i64, scratch_operands = 2 : i64, tpu.core_type = #tpu.core_type<tc>, window_params = [{transform_indices = @transform_0, window_bounds = array<i64: 1, 4, 256>}, {pipeline_mode = #tpu.pipeline_mode<synchronous>, transform_indices = @transform_1, window_bounds = array<i64: 1, 4>}, {pipeline_mode = #tpu.pipeline_mode<synchronous>, transform_indices = @transform_2, window_bounds = array<i64: 1, 4>}, {pipeline_mode = #tpu.pipeline_mode<synchronous>, transform_indices = @transform_3, window_bounds = array<i64: 4, 32>}, {pipeline_mode = #tpu.pipeline_mode<synchronous>, transform_indices = @transform_4, window_bounds = array<i64: 1, 32>}, {pipeline_mode = #tpu.pipeline_mode<synchronous>, transform_indices = @transform_5, window_bounds = array<i64: 288, 8>}, {pipeline_mode = #tpu.pipeline_mode<synchronous>, transform_indices = @transform_6, window_bounds = array<i64: 1, 8>}, {transform_indices = @transform_7, window_bounds = array<i64: 1, 12, 256>}]} {
    %c0 = arith.constant 0 : index
    %c0_0 = arith.constant 0 : index
    %c0_1 = arith.constant 0 : index
    %0 = vector.load %arg1[%c0, %c0_0, %c0_1] : memref<1x4x256xf32, #tpu.memory_space<vmem>>, vector<1x4x256xf32>
    %1 = vector.shape_cast %0 : vector<1x4x256xf32> to vector<4x256xf32>
    %c0_2 = arith.constant 0 : index
    %c0_3 = arith.constant 0 : index
    %c0_4 = arith.constant 0 : index
    %2 = vector.load %arg8[%c0_2, %c0_3, %c0_4] : memref<1x12x256xf32, #tpu.memory_space<vmem>>, vector<1x4x256xf32>
    %3 = vector.shape_cast %2 : vector<1x4x256xf32> to vector<4x256xf32>
    %4 = vector.shape_cast %1 : vector<4x256xf32> to vector<1x4x256xf32>
    tpu.vector_store %arg8[%c0_2, %c0_3, %c0_4], %4 {strides = array<i32>} : memref<1x12x256xf32, #tpu.memory_space<vmem>>, vector<1x4x256xf32>,
    %5 = tpu.transpose %1, [1, 0] : vector<4x256xf32> -> vector<256x4xf32>
    %c0_5 = arith.constant 0 : index
    %c0_6 = arith.constant 0 : index
    %6 = vector.load %arg2[%c0_5, %c0_6] : memref<1x4xf32, #tpu.memory_space<vmem>>, vector<1x4xf32>
    %7 = vector.broadcast %6 : vector<1x4xf32> to vector<256x4xf32>
    %8 = arith.mulf %5, %7 : vector<256x4xf32>
    %c0_7 = arith.constant 0 : index
    %c0_8 = arith.constant 0 : index
    %9 = vector.load %arg3[%c0_7, %c0_8] : memref<1x4xf32, #tpu.memory_space<vmem>>, vector<1x4xf32>
    %10 = vector.broadcast %9 : vector<1x4xf32> to vector<256x4xf32>
    %11 = arith.addf %8, %10 : vector<256x4xf32>
    %cst = arith.constant 0.000000e+00 : f32
    %12 = vector.broadcast %cst : f32 to vector<256x4xf32>
    %13 = arith.maximumf %11, %12 : vector<256x4xf32>
    %c0_9 = arith.constant 0 : index
    %c0_10 = arith.constant 0 : index
    %14 = vector.load %arg4[%c0_9, %c0_10] : memref<4x32xf32, #tpu.memory_space<vmem>>, vector<4x32xf32>
    %15 = vector.extract_strided_slice %13 {offsets = [0, 0], sizes = [256, 1], strides = [1, 1]} : vector<256x4xf32> to vector<256x1xf32>
    %16 = vector.extract_strided_slice %14 {offsets = [0, 0], sizes = [1, 32], strides = [1, 1]} : vector<4x32xf32> to vector<1x32xf32>
    %17 = vector.broadcast %15 : vector<256x1xf32> to vector<256x32xf32>
    %18 = vector.broadcast %16 : vector<1x32xf32> to vector<256x32xf32>
    %19 = arith.mulf %17, %18 : vector<256x32xf32>
    %20 = vector.extract_strided_slice %13 {offsets = [0, 1], sizes = [256, 1], strides = [1, 1]} : vector<256x4xf32> to vector<256x1xf32>
    %21 = vector.extract_strided_slice %14 {offsets = [1, 0], sizes = [1, 32], strides = [1, 1]} : vector<4x32xf32> to vector<1x32xf32>
    %22 = vector.broadcast %20 : vector<256x1xf32> to vector<256x32xf32>
    %23 = vector.broadcast %21 : vector<1x32xf32> to vector<256x32xf32>
    %24 = arith.mulf %22, %23 : vector<256x32xf32>
    %25 = arith.addf %19, %24 : vector<256x32xf32>
    %26 = vector.extract_strided_slice %13 {offsets = [0, 2], sizes = [256, 1], strides = [1, 1]} : vector<256x4xf32> to vector<256x1xf32>
    %27 = vector.extract_strided_slice %14 {offsets = [2, 0], sizes = [1, 32], strides = [1, 1]} : vector<4x32xf32> to vector<1x32xf32>
    %28 = vector.broadcast %26 : vector<256x1xf32> to vector<256x32xf32>
    %29 = vector.broadcast %27 : vector<1x32xf32> to vector<256x32xf32>
    %30 = arith.mulf %28, %29 : vector<256x32xf32>
    %31 = arith.addf %25, %30 : vector<256x32xf32>
    %32 = vector.extract_strided_slice %13 {offsets = [0, 3], sizes = [256, 1], strides = [1, 1]} : vector<256x4xf32> to vector<256x1xf32>
    %33 = vector.extract_strided_slice %14 {offsets = [3, 0], sizes = [1, 32], strides = [1, 1]} : vector<4x32xf32> to vector<1x32xf32>
    %34 = vector.broadcast %32 : vector<256x1xf32> to vector<256x32xf32>
    %35 = vector.broadcast %33 : vector<1x32xf32> to vector<256x32xf32>
    %36 = arith.mulf %34, %35 : vector<256x32xf32>
    %37 = arith.addf %31, %36 : vector<256x32xf32>
    %c0_11 = arith.constant 0 : index
    %c0_12 = arith.constant 0 : index
    %38 = vector.load %arg5[%c0_11, %c0_12] : memref<1x32xf32, #tpu.memory_space<vmem>>, vector<1x32xf32>
    %39 = vector.broadcast %38 : vector<1x32xf32> to vector<256x32xf32>
    %40 = arith.addf %37, %39 : vector<256x32xf32>
    %cst_13 = arith.constant 0.000000e+00 : f32
    %41 = vector.broadcast %cst_13 : f32 to vector<256x32xf32>
    %42 = arith.maximumf %40, %41 : vector<256x32xf32>
    %cst_14 = arith.constant 0.000000e+00 : f32
    %43 = vector.broadcast %cst_14 : f32 to vector<1x18x32xf32>
    %cst_15 = arith.constant 0.000000e+00 : f32
    %44 = vector.broadcast %cst_15 : f32 to vector<16x1x32xf32>
    %c0_16 = arith.constant 0 : index
    %c0_17 = arith.constant 0 : index
    %c0_18 = arith.constant 0 : index
    %45 = vector.load %arg9[%c0_16, %c0_17, %c0_18] : memref<18x18x32xf32, #tpu.memory_space<vmem>>, vector<1x18x32xf32>
    tpu.vector_store %arg9[%c0_16, %c0_17, %c0_18], %43 {strides = array<i32>} : memref<18x18x32xf32, #tpu.memory_space<vmem>>, vector<1x18x32xf32>,
    %c17 = arith.constant 17 : index
    %c0_19 = arith.constant 0 : index
    %c0_20 = arith.constant 0 : index
    %46 = vector.load %arg9[%c17, %c0_19, %c0_20] : memref<18x18x32xf32, #tpu.memory_space<vmem>>, vector<1x18x32xf32>
    tpu.vector_store %arg9[%c17, %c0_19, %c0_20], %43 {strides = array<i32>} : memref<18x18x32xf32, #tpu.memory_space<vmem>>, vector<1x18x32xf32>,
    %c1 = arith.constant 1 : index
    %c0_21 = arith.constant 0 : index
    %c0_22 = arith.constant 0 : index
    %47 = vector.load %arg9[%c1, %c0_21, %c0_22] : memref<18x18x32xf32, #tpu.memory_space<vmem>>, vector<16x1x32xf32>
    tpu.vector_store %arg9[%c1, %c0_21, %c0_22], %44 {strides = array<i32>} : memref<18x18x32xf32, #tpu.memory_space<vmem>>, vector<16x1x32xf32>,
    %c1_23 = arith.constant 1 : index
    %c17_24 = arith.constant 17 : index
    %c0_25 = arith.constant 0 : index
    %48 = vector.load %arg9[%c1_23, %c17_24, %c0_25] : memref<18x18x32xf32, #tpu.memory_space<vmem>>, vector<16x1x32xf32>
    tpu.vector_store %arg9[%c1_23, %c17_24, %c0_25], %44 {strides = array<i32>} : memref<18x18x32xf32, #tpu.memory_space<vmem>>, vector<16x1x32xf32>,
    %49 = vector.shape_cast %42 : vector<256x32xf32> to vector<16x16x32xf32>
    %c1_26 = arith.constant 1 : index
    %c1_27 = arith.constant 1 : index
    %c0_28 = arith.constant 0 : index
    %50 = vector.load %arg9[%c1_26, %c1_27, %c0_28] : memref<18x18x32xf32, #tpu.memory_space<vmem>>, vector<16x16x32xf32>
    tpu.vector_store %arg9[%c1_26, %c1_27, %c0_28], %49 {strides = array<i32>} : memref<18x18x32xf32, #tpu.memory_space<vmem>>, vector<16x16x32xf32>,
    %c0_29 = arith.constant 0 : index
    %c0_30 = arith.constant 0 : index
    %c0_31 = arith.constant 0 : index
    %51 = vector.load %arg9[%c0_29, %c0_30, %c0_31] : memref<18x18x32xf32, #tpu.memory_space<vmem>>, vector<16x18x32xf32>
    %52 = vector.extract_strided_slice %51 {offsets = [0, 0, 0], sizes = [16, 16, 32], strides = [1, 1, 1]} : vector<16x18x32xf32> to vector<16x16x32xf32>
    %53 = vector.shape_cast %52 : vector<16x16x32xf32> to vector<256x32xf32>
    %54 = arith.truncf %53 : vector<256x32xf32> to vector<256x32xbf16>
    %c0_32 = arith.constant 0 : index
    %c0_33 = arith.constant 0 : index
    %55 = vector.load %arg10[%c0_32, %c0_33] : memref<256x288xbf16, #tpu.memory_space<vmem>>, vector<256x32xbf16>
    tpu.vector_store %arg10[%c0_32, %c0_33], %54 {strides = array<i32>} : memref<256x288xbf16, #tpu.memory_space<vmem>>, vector<256x32xbf16>,
    %56 = vector.extract_strided_slice %51 {offsets = [0, 1, 0], sizes = [16, 16, 32], strides = [1, 1, 1]} : vector<16x18x32xf32> to vector<16x16x32xf32>
    %57 = vector.shape_cast %56 : vector<16x16x32xf32> to vector<256x32xf32>
    %58 = arith.truncf %57 : vector<256x32xf32> to vector<256x32xbf16>
    %c0_34 = arith.constant 0 : index
    %c32 = arith.constant 32 : index
    %59 = vector.load %arg10[%c0_34, %c32] : memref<256x288xbf16, #tpu.memory_space<vmem>>, vector<256x32xbf16>
    tpu.vector_store %arg10[%c0_34, %c32], %58 {strides = array<i32>} : memref<256x288xbf16, #tpu.memory_space<vmem>>, vector<256x32xbf16>,
    %60 = vector.extract_strided_slice %51 {offsets = [0, 2, 0], sizes = [16, 16, 32], strides = [1, 1, 1]} : vector<16x18x32xf32> to vector<16x16x32xf32>
    %61 = vector.shape_cast %60 : vector<16x16x32xf32> to vector<256x32xf32>
    %62 = arith.truncf %61 : vector<256x32xf32> to vector<256x32xbf16>
    %c0_35 = arith.constant 0 : index
    %c64 = arith.constant 64 : index
    %63 = vector.load %arg10[%c0_35, %c64] : memref<256x288xbf16, #tpu.memory_space<vmem>>, vector<256x32xbf16>
    tpu.vector_store %arg10[%c0_35, %c64], %62 {strides = array<i32>} : memref<256x288xbf16, #tpu.memory_space<vmem>>, vector<256x32xbf16>,
    %c1_36 = arith.constant 1 : index
    %c0_37 = arith.constant 0 : index
    %c0_38 = arith.constant 0 : index
    %64 = vector.load %arg9[%c1_36, %c0_37, %c0_38] : memref<18x18x32xf32, #tpu.memory_space<vmem>>, vector<16x18x32xf32>
    %65 = vector.extract_strided_slice %64 {offsets = [0, 0, 0], sizes = [16, 16, 32], strides = [1, 1, 1]} : vector<16x18x32xf32> to vector<16x16x32xf32>
    %66 = vector.shape_cast %65 : vector<16x16x32xf32> to vector<256x32xf32>
    %67 = arith.truncf %66 : vector<256x32xf32> to vector<256x32xbf16>
    %c0_39 = arith.constant 0 : index
    %c96 = arith.constant 96 : index
    %68 = vector.load %arg10[%c0_39, %c96] : memref<256x288xbf16, #tpu.memory_space<vmem>>, vector<256x32xbf16>
    tpu.vector_store %arg10[%c0_39, %c96], %67 {strides = array<i32>} : memref<256x288xbf16, #tpu.memory_space<vmem>>, vector<256x32xbf16>,
    %69 = vector.extract_strided_slice %64 {offsets = [0, 1, 0], sizes = [16, 16, 32], strides = [1, 1, 1]} : vector<16x18x32xf32> to vector<16x16x32xf32>
    %70 = vector.shape_cast %69 : vector<16x16x32xf32> to vector<256x32xf32>
    %71 = arith.truncf %70 : vector<256x32xf32> to vector<256x32xbf16>
    %c0_40 = arith.constant 0 : index
    %c128 = arith.constant 128 : index
    %72 = vector.load %arg10[%c0_40, %c128] : memref<256x288xbf16, #tpu.memory_space<vmem>>, vector<256x32xbf16>
    tpu.vector_store %arg10[%c0_40, %c128], %71 {strides = array<i32>} : memref<256x288xbf16, #tpu.memory_space<vmem>>, vector<256x32xbf16>,
    %73 = vector.extract_strided_slice %64 {offsets = [0, 2, 0], sizes = [16, 16, 32], strides = [1, 1, 1]} : vector<16x18x32xf32> to vector<16x16x32xf32>
    %74 = vector.shape_cast %73 : vector<16x16x32xf32> to vector<256x32xf32>
    %75 = arith.truncf %74 : vector<256x32xf32> to vector<256x32xbf16>
    %c0_41 = arith.constant 0 : index
    %c160 = arith.constant 160 : index
    %76 = vector.load %arg10[%c0_41, %c160] : memref<256x288xbf16, #tpu.memory_space<vmem>>, vector<256x32xbf16>
    tpu.vector_store %arg10[%c0_41, %c160], %75 {strides = array<i32>} : memref<256x288xbf16, #tpu.memory_space<vmem>>, vector<256x32xbf16>,
    %c2 = arith.constant 2 : index
    %c0_42 = arith.constant 0 : index
    %c0_43 = arith.constant 0 : index
    %77 = vector.load %arg9[%c2, %c0_42, %c0_43] : memref<18x18x32xf32, #tpu.memory_space<vmem>>, vector<16x18x32xf32>
    %78 = vector.extract_strided_slice %77 {offsets = [0, 0, 0], sizes = [16, 16, 32], strides = [1, 1, 1]} : vector<16x18x32xf32> to vector<16x16x32xf32>
    %79 = vector.shape_cast %78 : vector<16x16x32xf32> to vector<256x32xf32>
    %80 = arith.truncf %79 : vector<256x32xf32> to vector<256x32xbf16>
    %c0_44 = arith.constant 0 : index
    %c192 = arith.constant 192 : index
    %81 = vector.load %arg10[%c0_44, %c192] : memref<256x288xbf16, #tpu.memory_space<vmem>>, vector<256x32xbf16>
    tpu.vector_store %arg10[%c0_44, %c192], %80 {strides = array<i32>} : memref<256x288xbf16, #tpu.memory_space<vmem>>, vector<256x32xbf16>,
    %82 = vector.extract_strided_slice %77 {offsets = [0, 1, 0], sizes = [16, 16, 32], strides = [1, 1, 1]} : vector<16x18x32xf32> to vector<16x16x32xf32>
    %83 = vector.shape_cast %82 : vector<16x16x32xf32> to vector<256x32xf32>
    %84 = arith.truncf %83 : vector<256x32xf32> to vector<256x32xbf16>
    %c0_45 = arith.constant 0 : index
    %c224 = arith.constant 224 : index
    %85 = vector.load %arg10[%c0_45, %c224] : memref<256x288xbf16, #tpu.memory_space<vmem>>, vector<256x32xbf16>
    tpu.vector_store %arg10[%c0_45, %c224], %84 {strides = array<i32>} : memref<256x288xbf16, #tpu.memory_space<vmem>>, vector<256x32xbf16>,
    %86 = vector.extract_strided_slice %77 {offsets = [0, 2, 0], sizes = [16, 16, 32], strides = [1, 1, 1]} : vector<16x18x32xf32> to vector<16x16x32xf32>
    %87 = vector.shape_cast %86 : vector<16x16x32xf32> to vector<256x32xf32>
    %88 = arith.truncf %87 : vector<256x32xf32> to vector<256x32xbf16>
    %c0_46 = arith.constant 0 : index
    %c256 = arith.constant 256 : index
    %89 = vector.load %arg10[%c0_46, %c256] : memref<256x288xbf16, #tpu.memory_space<vmem>>, vector<256x32xbf16>
    tpu.vector_store %arg10[%c0_46, %c256], %88 {strides = array<i32>} : memref<256x288xbf16, #tpu.memory_space<vmem>>, vector<256x32xbf16>,
    %c0_47 = arith.constant 0 : index
    %c0_48 = arith.constant 0 : index
    %90 = vector.load %arg10[%c0_47, %c0_48] : memref<256x288xbf16, #tpu.memory_space<vmem>>, vector<256x288xbf16>
    %c0_49 = arith.constant 0 : index
    %c0_50 = arith.constant 0 : index
    %91 = vector.load %arg6[%c0_49, %c0_50] : memref<288x8xbf16, #tpu.memory_space<vmem>>, vector<288x8xbf16>
    %cst_51 = arith.constant dense<0.000000e+00> : vector<256x8xf32>
    %92 = tpu.matmul %90, %91, %cst_51 {dimension_numbers = #tpu.dot_dimension_numbers<[1], [0], [0], [1], [0, 0, 1, 1], [], []>} : vector<256x288xbf16>, vector<288x8xbf16>, vector<256x8xf32> -> vector<256x8xf32>
    %c0_52 = arith.constant 0 : index
    %c0_53 = arith.constant 0 : index
    %93 = vector.load %arg7[%c0_52, %c0_53] : memref<1x8xf32, #tpu.memory_space<vmem>>, vector<1x8xf32>
    %94 = vector.broadcast %93 : vector<1x8xf32> to vector<256x8xf32>
    %95 = arith.addf %92, %94 : vector<256x8xf32>
    %96 = tpu.transpose %95, [1, 0] : vector<256x8xf32> -> vector<8x256xf32>
    %c0_54 = arith.constant 0 : index
    %c4 = arith.constant 4 : index
    %c0_55 = arith.constant 0 : index
    %97 = vector.load %arg8[%c0_54, %c4, %c0_55] : memref<1x12x256xf32, #tpu.memory_space<vmem>>, vector<1x8x256xf32>
    %98 = vector.shape_cast %97 : vector<1x8x256xf32> to vector<8x256xf32>
    %99 = vector.shape_cast %96 : vector<8x256xf32> to vector<1x8x256xf32>
    tpu.vector_store %arg8[%c0_54, %c4, %c0_55], %99 {strides = array<i32>} : memref<1x12x256xf32, #tpu.memory_space<vmem>>, vector<1x8x256xf32>,
    return
  }
  func.func @transform_0(%arg0: i32) -> (i32, i32, i32) {
    %c0_i32 = arith.constant 0 : i32
    %c0_i32_0 = arith.constant 0 : i32
    %c0_i32_1 = arith.constant 0 : i32
    return %arg0, %c0_i32, %c0_i32_0 : i32, i32, i32
  }
  func.func @transform_1(%arg0: i32) -> (i32, i32) {
    %c0_i32 = arith.constant 0 : i32
    %c0_i32_0 = arith.constant 0 : i32
    %c0_i32_1 = arith.constant 0 : i32
    return %c0_i32, %c0_i32_0 : i32, i32
  }
  func.func @transform_2(%arg0: i32) -> (i32, i32) {
    %c0_i32 = arith.constant 0 : i32
    %c0_i32_0 = arith.constant 0 : i32
    %c0_i32_1 = arith.constant 0 : i32
    return %c0_i32, %c0_i32_0 : i32, i32
  }
  func.func @transform_3(%arg0: i32) -> (i32, i32) {
    %c0_i32 = arith.constant 0 : i32
    %c0_i32_0 = arith.constant 0 : i32
    %c0_i32_1 = arith.constant 0 : i32
    return %c0_i32, %c0_i32_0 : i32, i32
  }
  func.func @transform_4(%arg0: i32) -> (i32, i32) {
    %c0_i32 = arith.constant 0 : i32
    %c0_i32_0 = arith.constant 0 : i32
    %c0_i32_1 = arith.constant 0 : i32
    return %c0_i32, %c0_i32_0 : i32, i32
  }
  func.func @transform_5(%arg0: i32) -> (i32, i32) {
    %c0_i32 = arith.constant 0 : i32
    %c0_i32_0 = arith.constant 0 : i32
    %c0_i32_1 = arith.constant 0 : i32
    return %c0_i32, %c0_i32_0 : i32, i32
  }
  func.func @transform_6(%arg0: i32) -> (i32, i32) {
    %c0_i32 = arith.constant 0 : i32
    %c0_i32_0 = arith.constant 0 : i32
    %c0_i32_1 = arith.constant 0 : i32
    return %c0_i32, %c0_i32_0 : i32, i32
  }
  func.func @transform_7(%arg0: i32) -> (i32, i32, i32) {
    %c0_i32 = arith.constant 0 : i32
    %c0_i32_0 = arith.constant 0 : i32
    %c0_i32_1 = arith.constant 0 : i32
    return %arg0, %c0_i32, %c0_i32_0 : i32, i32, i32
  }
}

</mosaic_0001>

<bundles_post_ra>
// kernel: block_forward.1
= control target key start
LH: loop header
LB: loop body
LE: loop exit
PB: predicated region body
PF: predicated region fallthrough
CT: control target
= control target key end

     0   :  { %s4088_s24 = smov 0   ;;  %s6328_s0 = inlined_call_operand.vmem [shape: f32[2,4,256], index: 0, kind: input, shape index: {}]   ;;  %s6329_s1 = inlined_call_operand.vmem [shape: f32[1,4], index: 1, kind: input, shape index: {}]   ;;  %s6330_s2 = inlined_call_operand.vmem [shape: f32[1,4], index: 2, kind: input, shape index: {}]   ;;  %s6331_s3 = inlined_call_operand.vmem [shape: f32[4,32], index: 3, kind: input, shape index: {}]   ;;  %s6332_s4 = inlined_call_operand.vmem [shape: f32[1,32], index: 4, kind: input, shape index: {}]   ;;  %s6333_s5 = inlined_call_operand.vmem [shape: bf16[288,8], index: 5, kind: input, shape index: {}]   ;;  %s6334_s6 = inlined_call_operand.vmem [shape: f32[1,8], index: 6, kind: input, shape index: {}]   ;;  %s6335_s7 = inlined_call_operand.vmem [shape: f32[2,12,256], index: 7, kind: output, shape index: {}]  }
   0x1 LB: > { %s3727_s25 = sadd.s32 4294967295, %s4038_s24   ;;  %p3731_p0 = scmp.ge.s32.totalorder %s4038_s24, 1  ;;  %s4038_s24 = sphi %s4088_s24, %s17_s24  }
   0x2   : > { %p237_p1 = scmp.lt.s32.totalorder %s4038_s24, 3 }
   0x4   : > { %p238_p2 = pnand %p3731_p0, %p237_p1 }
   0x6   : > { %241 = sbr.rel (%p238_p2) target bundleno = 1268 (0x4f4), region = 48 }
   0xd   : > { %p269_p3 = scmp.lt.s32.totalorder %s3727_s25, 1  ;;  %v4040_v2 = vmov 0   ;;  %v4111_v3 = vld [vmem:[%s6329_s1] ss:$0 sm:$0xff]  ;;  %v4041_v43 = vmov 1   ;;  %vm1316_vm0 = vcmask 261120  }
   0xe   : > { %3976 = vset.pattern.permute.xlu1 %v4040_v2  ;;  %v4116_v4 = vld [vmem:[%s6330_s2] ss:$0 sm:$0xff]  ;;  %vm1326_vm1 = vcmask 253952   ;;  %vm1319_vm2 = vcmask 254976   ;;  %vm1729_vm3 = vcmask 1045504   ;;  %vm1519_vm4 = vcmask 1046528  }
   0xf   : > { %s6500_s25 = smov (!%p269_p3, %s3727_s25), 1  ;;  %s4045_s19 = smov 64   ;;  %vm1712_vm5 = vcmask 523520   ;;  %vm1922_vm6 = vcmask 785920   ;;  %vm2067_vm7 = vcmask 1048320  }
  0x10   : > { %s3776_s26 = sshll.u32 %s6500_s25, 3  ;;  %s3777_s27 = sshll.u32 %s6500_s25, 5 }
  0x11   : > { %s273_s30 = scalar_lea.vmem %s6328_s0, %s3776_s26  ;;  %s4102_s10 = scalar_lea.vmem %s6335_s7, %s3777_s27 }
  0x12   : > { %v280_v0 = vld [vmem:[%s273_s30] sm:$0xff]  ;;  %s4046_s20 = smov 96   ;;  %s4047_s26 = smov 32  }
  0x13   : > { %286 = vxpose.xlu0.b32.start.end [1/1] (short) %v280_v0, 128  ;;  %284 = vst [vmem:[%s4102_s10] sm:$0xf] %v280_v0  ;;  %v282_v1 = vcombine.high %v280_v0, %v280_v0 }
  0x15   : > { %285 = vst [vmem:[%s4102_s10 + $0x8] sm:$0xf] %v282_v1 }
  0x50   : > { %318 = vxpose.xlu0.b32.start.end [1/1] (short) %v282_v1, 128 }
  0x79   : > { %3977 = vset.pattern.permute.xlu0 %v4040_v2 }
  0x93   : > { %v302_v5 = vpop.trf.xlu0 }
  0x94   : > { %v357_v6 = vmul.f32 %v4111_v3, %v302_v5 }
  0x96   : > { %v396_v7 = vadd.f32 %v4116_v4, %v357_v6 }
  0x97   : > { %v303_v8 = vpop.trf.xlu0 }
  0x98   : > { %v4120_v9 = vmax.f32 %v396_v7, 0.0  ;;  %v358_v25 = vmul.f32 %v4111_v3, %v303_v8 }
  0x9a   : > { %463 = vperm.xlu1 %3976, %v4120_v9   ;;  %v397_v29 = vadd.f32 %v4116_v4, %v358_v25 }
  0x9b   : > { %v304_v10 = vpop.trf.xlu0 }
  0x9c   : > { %v4153_v35 = vmax.f32 %v397_v29, 0.0  ;;  %v359_v42 = vmul.f32 %v4111_v3, %v304_v10 }
  0x9e   : > { %v398_v47 = vadd.f32 %v4116_v4, %v359_v42 }
  0x9f   : > { %v305_v11 = vpop.trf.xlu0 }
  0xa0   : > { %v4179_v51 = vmax.f32 %v398_v47, 0.0  ;;  %v360_v59 = vmul.f32 %v4111_v3, %v305_v11 }
  0xa2   : > { %v399_v62 = vadd.f32 %v4116_v4, %v360_v59 }
  0xa3   : > { %v4123_v12 = vpop.trf.xlu0 }
  0xa4   : > { %v4208_v5 = vmax.f32 %v399_v62, 0.0 }
  0xa7   : > { %v4125_v13 = vpop.trf.xlu0 }
  0xab   : > { %v4127_v14 = vpop.trf.xlu0 }
  0xaf   : > { %v4129_v15 = vpop.trf.xlu0 }
  0xb3   : > { %v4131_v16 = vpop.trf.xlu0 }
  0xb7   : > { %v4133_v17 = vpop.trf.xlu0 }
  0xbb   : > { %v4135_v18 = vpop.trf.xlu0 }
  0xbf   : > { %v313_v19 = vpop.trf.xlu0 }
  0xc0   : > { %v368_v32 = vmul.f32 %v4111_v3, %v313_v19  ;;  %v361_v19 = vmul.f32 %v4111_v3, %v4123_v12 }
  0xc2   : > { %v407_v37 = vadd.f32 %v4116_v4, %v368_v32 }
  0xc3   : > { %v4137_v20 = vpop.trf.xlu0 }
  0xc4   : > { %v4161_v40 = vmax.f32 %v407_v37, 0.0  ;;  %v362_v37 = vmul.f32 %v4111_v3, %v4125_v13 }
  0xc7   : > { %v4139_v21 = vpop.trf.xlu0 }
  0xcb   : > { %v316_v22 = vpop.trf.xlu0 }
  0xcc   : > { %v371_v38 = vmul.f32 %v4111_v3, %v316_v22 }
  0xce   : > { %v410_v41 = vadd.f32 %v4116_v4, %v371_v38 }
  0xcf   : > { %v4141_v23 = vpop.trf.xlu0 }
  0xd0   : > { %v4170_v46 = vmax.f32 %v410_v41, 0.0  ;;  %v401_v41 = vadd.f32 %v4116_v4, %v362_v37 }
  0xd3   : > { %v334_v24 = vpop.trf.xlu0 }
  0xd4   : > { %v373_v26 = vmul.f32 %v4111_v3, %v334_v24 }
  0xd6   : > { %v412_v27 = vadd.f32 %v4116_v4, %v373_v26 }
  0xd7   : > { %v335_v28 = vpop.trf.xlu0 }
  0xd8   : > { %v4147_v30 = vmax.f32 %v412_v27, 0.0  ;;  %v374_v31 = vmul.f32 %v4111_v3, %v335_v28  ;;  %v400_v27 = vadd.f32 %v4116_v4, %v361_v19 }
  0xda   : > { %6354 = vst [vmem:[#allocation4_spill] sm:$0xff] %v4147_v30  ;;  %v413_v33 = vadd.f32 %v4116_v4, %v374_v31  ;;  %543 = vperm.xlu1 %3976, %v4147_v30   ;;  %v4231_v29 = vmax.f32 %v400_v27, 0.0 }
  0xdb   : > { %v336_v34 = vpop.trf.xlu0 }
  0xdc   : > { %v4155_v36 = vmax.f32 %v413_v33, 0.0  ;;  %v375_v44 = vmul.f32 %v4111_v3, %v336_v34 }
  0xde   : > { %468 = vperm.xlu1 %3976, %v4153_v35   ;;  %548 = vperm.xlu0 %3977, %v4155_v36   ;;  %v414_v48 = vadd.f32 %v4116_v4, %v375_v44  ;;  %v4250_v44 = vmax.f32 %v401_v41, 0.0 }
  0xdf   : > { %v337_v39 = vpop.trf.xlu0 }
  0xe0   : > { %v4181_v52 = vmax.f32 %v414_v48, 0.0  ;;  %v376_v6 = vmul.f32 %v4111_v3, %v337_v39  ;;  %v363_v48 = vmul.f32 %v4111_v3, %v4127_v14 }
  0xe2   : > { %3978 = vset.pattern.permute.xlu1 %v4041_v43  ;;  %3989 = vset.pattern.permute.xlu0 %v4041_v43  ;;  %6355 = vst [vmem:[#allocation5_spill] sm:$0xff] %v4181_v52  ;;  %v415_v10 = vadd.f32 %v4116_v4, %v376_v6 }
  0xe3   : > { %658 = vperm.xlu1 %3978, %v4120_v9   ;;  %702 = vperm.xlu0 %3989, %v4161_v40   ;;  %v338_v45 = vpop.trf.xlu0 }
  0xe4   : > { %v377_v49 = vmul.f32 %v4111_v3, %v338_v45  ;;  %v4222_v25 = vmax.f32 %v415_v10, 0.0  ;;  %v6338_v45 = vmov 2   ;;  %v367_v10 = vmul.f32 %v4111_v3, %v4135_v18 }
  0xe6   : > { %v416_v53 = vadd.f32 %v4116_v4, %v377_v49  ;;  %6357 = vst [vmem:[#allocation7_spill] sm:$0xff] %v4222_v25 }
  0xe7   : > { %662 = vperm.xlu1 %3978, %v4153_v35   ;;  %714 = vperm.xlu0 %3989, %v4170_v46   ;;  %v4177_v50 = vpop.trf.xlu0 }
  0xe8   : > { %v4188_v56 = vmax.f32 %v416_v53, 0.0  ;;  %v378_v13 = vmul.f32 %v4111_v3, %v4177_v50  ;;  %v364_v50 = vmul.f32 %v4111_v3, %v4129_v15  ;;  %v402_v53 = vadd.f32 %v4116_v4, %v363_v48 }
  0xea   : > { %6356 = vst [vmem:[#allocation6_spill] sm:$0xff] %v4188_v56  ;;  %v417_v47 = vadd.f32 %v4116_v4, %v378_v13  ;;  %v403_v14 = vadd.f32 %v4116_v4, %v364_v50  ;;  %v372_v50 = vmul.f32 %v4111_v3, %v4141_v23 }
  0xeb   : > { %3979 = vset.pattern.permute.xlu1 %v4040_v2  ;;  %722 = vperm.xlu0 %3989, %v4147_v30   ;;  %v340_v54 = vpop.trf.xlu0 }
  0xec   : > { %v379_v55 = vmul.f32 %v4111_v3, %v340_v54  ;;  %473 = vperm.xlu1 %3979, %v4179_v51   ;;  %v4263_v49 = vmax.f32 %v417_v47, 0.0  ;;  %v4280_v59 = vmax.f32 %v403_v14, 0.0 }
  0xee   : > { %v418_v57 = vadd.f32 %v4116_v4, %v379_v55  ;;  %6358 = vst [vmem:[#allocation8_spill] sm:$0xff] %v4263_v49  ;;  %v4273_v55 = vmax.f32 %v402_v53, 0.0 }
  0xef   : > { %v4191_v58 = vpop.trf.xlu0  ;;  %730 = vperm.xlu0 %3989, %v4181_v52  }
  0xf0   : > { %3980 = vset.pattern.permute.xlu1 %v4041_v43  ;;  %v4197_v60 = vmax.f32 %v418_v57, 0.0  ;;  %v380_v15 = vmul.f32 %v4111_v3, %v4191_v58 }
  0xf1   : > { %666 = vperm.xlu1 %3980, %v4179_v51  }
  0xf3   : > { %v342_v61 = vpop.trf.xlu0  ;;  %738 = vperm.xlu0 %3989, %v4188_v56  }
  0xf4   : > { %v381_v63 = vmul.f32 %v4111_v3, %v342_v61 }
  0xf5   : > { %3981 = vset.pattern.permute.xlu1 %v4040_v2 }
  0xf6   : > { %v420_v0 = vadd.f32 %v4116_v4, %v381_v63  ;;  %553 = vperm.xlu1 %3981, %v4181_v52   ;;  %v419_v63 = vadd.f32 %v4116_v4, %v380_v15 }
  0xf7   : > { %v4205_v1 = vpop.trf.xlu0  ;;  %746 = vperm.xlu0 %3989, %v4197_v60  }
  0xf8   : > { %v4211_v7 = vmax.f32 %v420_v0, 0.0  ;;  %v4293_v6 = vmax.f32 %v419_v63, 0.0  ;;  %v382_v18 = vmul.f32 %v4111_v3, %v4205_v1 }
  0xfa   : > { %478 = vperm.xlu1 %3981, %v4208_v5  }
  0xfb   : > { %v344_v8 = vpop.trf.xlu0  ;;  %754 = vperm.xlu0 %3989, %v4211_v7  }
  0xfc   : > { %v383_v11 = vmul.f32 %v4111_v3, %v344_v8 }
  0xfe   : > { %v422_v22 = vadd.f32 %v4116_v4, %v383_v11  ;;  %3982 = vset.pattern.permute.xlu1 %v4041_v43 }
  0xff   : > { %670 = vperm.xlu1 %3982, %v4208_v5   ;;  %v345_v24 = vpop.trf.xlu0 }
 0x100   : > { %v4224_v26 = vmax.f32 %v422_v22, 0.0  ;;  %v384_v54 = vmul.f32 %v4111_v3, %v345_v24  ;;  %v406_v22 = vadd.f32 %v4116_v4, %v367_v10  ;;  %v366_v24 = vmul.f32 %v4111_v3, %v4133_v17 }
 0x101   : > { %v421_v17 = vadd.f32 %v4116_v4, %v382_v18 }
 0x102   : > { %762 = vperm.xlu0 %3989, %v4224_v26   ;;  %v423_v57 = vadd.f32 %v4116_v4, %v384_v54  ;;  %v411_v54 = vadd.f32 %v4116_v4, %v372_v50 }
 0x103   : > { %3983 = vset.pattern.permute.xlu1 %v4040_v2  ;;  %v346_v28 = vpop.trf.xlu0  ;;  %v4327_v37 = vmax.f32 %v421_v17, 0.0 }
 0x104   : > { %v385_v12 = vmul.f32 %v4111_v3, %v346_v28  ;;  %558 = vperm.xlu1 %3983, %v4222_v25   ;;  %v4284_v61 = vmax.f32 %v423_v57, 0.0  ;;  %v4313_v28 = vmax.f32 %v406_v22, 0.0  ;;  %v4373_v57 = vmax.f32 %v411_v54, 0.0 }
 0x106   : > { %v424_v31 = vadd.f32 %v4116_v4, %v385_v12  ;;  %v369_v12 = vmul.f32 %v4111_v3, %v4137_v20 }
 0x107   : > { %v347_v32 = vpop.trf.xlu0 }
 0x108   : > { %v4234_v33 = vmax.f32 %v424_v31, 0.0  ;;  %483 = vperm.xlu1 %3983, %v4231_v29   ;;  %v386_v62 = vmul.f32 %v4111_v3, %v347_v32  ;;  %v405_v31 = vadd.f32 %v4116_v4, %v366_v24 }
 0x10a   : > { %770 = vperm.xlu0 %3989, %v4234_v33   ;;  %v425_v58 = vadd.f32 %v4116_v4, %v386_v62  ;;  %v4324_v1 = vmax.f32 %v405_v31, 0.0 }
 0x10b   : > { %v348_v34 = vpop.trf.xlu0 }
 0x10c   : > { %v387_v38 = vmul.f32 %v4111_v3, %v348_v34  ;;  %3984 = vset.pattern.permute.xlu1 %v4041_v43  ;;  %v4300_v11 = vmax.f32 %v425_v58, 0.0  ;;  %v408_v34 = vadd.f32 %v4116_v4, %v369_v12 }
 0x10d   : > { %674 = vperm.xlu1 %3984, %v4231_v29  }
 0x10e   : > { %v426_v39 = vadd.f32 %v4116_v4, %v387_v38  ;;  %v4330_v20 = vmax.f32 %v408_v34, 0.0  ;;  %v6336_v38 = vmov 3  }
 0x110   : > { %v4245_v42 = vmax.f32 %v426_v39, 0.0  ;;  %v370_v39 = vmul.f32 %v4111_v3, %v4139_v21 }
 0x111   : > { %3985 = vset.pattern.permute.xlu1 %v4040_v2 }
 0x112   : > { %563 = vperm.xlu1 %3985, %v4188_v56   ;;  %778 = vperm.xlu0 %3989, %v4245_v42   ;;  %v409_v13 = vadd.f32 %v4116_v4, %v370_v39 }
 0x114   : > { %v4354_v48 = vmax.f32 %v409_v13, 0.0 }
 0x116   : > { %488 = vperm.xlu1 %3985, %v4250_v44   ;;  %3990 = vset.pattern.permute.xlu0 %v6338_v45 }
 0x117   : > { %854 = vperm.xlu0 %3990, %v4120_v9  }
 0x119   : > { %v4347_v41 = vpop.permute.xlu1 %463 }
 0x11a   : > { %3986 = vset.pattern.permute.xlu1 %v4041_v43 }
 0x11b   : > { %678 = vperm.xlu1 %3986, %v4250_v44   ;;  %866 = vperm.xlu0 %3990, %v4208_v5  }
 0x11f   : > { %3987 = vset.pattern.permute.xlu1 %v4040_v2  ;;  %870 = vperm.xlu0 %3990, %v4231_v29   ;;  %v365_v2 = vmul.f32 %v4111_v3, %v4131_v16  ;;  %v349_v16 = vpop.trf.xlu0 }
 0x120   : > { %568 = vperm.xlu1 %3987, %v4263_v49   ;;  %v388_v19 = vmul.f32 %v4111_v3, %v349_v16 }
 0x121   : > { %v404_v0 = vadd.f32 %v4116_v4, %v365_v2 }
 0x122   : > { %v427_v27 = vadd.f32 %v4116_v4, %v388_v19 }
 0x123   : > { %942 = vperm.xlu0 %3990, %v4197_v60   ;;  %v4296_v8 = vmax.f32 %v404_v0, 0.0 }
 0x124   : > { %493 = vperm.xlu1 %3987, %v4273_v55   ;;  %v4318_v32 = vmax.f32 %v427_v27, 0.0 }
 0x127   : > { %882 = vperm.xlu0 %3990, %v4280_v59  }
 0x128   : > { %573 = vperm.xlu1 %3987, %v4197_v60  }
 0x12b   : > { %962 = vperm.xlu0 %3990, %v4284_v61  }
 0x12c   : > { %498 = vperm.xlu1 %3987, %v4280_v59  }
 0x12f   : > { %886 = vperm.xlu0 %3990, %v4296_v8  }
 0x130   : > { %578 = vperm.xlu1 %3987, %v4293_v6  }
 0x133   : > { %970 = vperm.xlu0 %3990, %v4300_v11  }
 0x134   : > { %503 = vperm.xlu1 %3987, %v4296_v8  }
 0x137   : > { %894 = vperm.xlu0 %3990, %v4313_v28  }
 0x138   : > { %583 = vperm.xlu1 %3987, %v4211_v7  }
 0x13b   : > { %978 = vperm.xlu0 %3990, %v4318_v32  }
 0x13c   : > { %508 = vperm.xlu1 %3987, %v4324_v1  }
 0x13f   : > { %902 = vperm.xlu0 %3990, %v4330_v20  }
 0x140   : > { %588 = vperm.xlu1 %3987, %v4327_v37  }
 0x143   : > { %918 = vperm.xlu0 %3990, %v4147_v30  }
 0x144   : > { %513 = vperm.xlu1 %3987, %v4313_v28  }
 0x147   : > { %934 = vperm.xlu0 %3990, %v4188_v56  }
 0x148   : > { %593 = vperm.xlu1 %3987, %v4224_v26  }
 0x14b   : > { %4009 = vset.pattern.permute.xlu0 %v6336_v38 }
 0x14c   : > { %518 = vperm.xlu1 %3987, %v4161_v40   ;;  %1054 = vperm.xlu0 %4009, %v4153_v35  }
 0x150   : > { %598 = vperm.xlu1 %3987, %v4284_v61   ;;  %1070 = vperm.xlu0 %4009, %v4250_v44  }
 0x154   : > { %523 = vperm.xlu1 %3987, %v4330_v20   ;;  %1150 = vperm.xlu0 %4009, %v4327_v37  }
 0x158   : > { %603 = vperm.xlu1 %3987, %v4234_v33   ;;  %1074 = vperm.xlu0 %4009, %v4273_v55  }
 0x159   : > { %v4352_v47 = vpop.permute.xlu1 %543 }
 0x15c   : > { %528 = vperm.xlu1 %3987, %v4354_v48   ;;  %1154 = vperm.xlu0 %4009, %v4224_v26  }
 0x15d   : > { %v4358_v21 = vpop.permute.xlu1 %468  ;;  %v4411_v16 = vpop.permute.xlu0 %548 }
 0x160   : > { %608 = vperm.xlu1 %3987, %v4300_v11   ;;  %1086 = vperm.xlu0 %4009, %v4324_v1  }
 0x162   : > { %v4364_v53 = vpop.permute.xlu1 %658  ;;  %v4417_v19 = vpop.permute.xlu0 %702 }
 0x164   : > { %533 = vperm.xlu1 %3987, %v4170_v46   ;;  %1094 = vperm.xlu0 %4009, %v4161_v40  }
 0x166   : > { %v4369_v14 = vpop.permute.xlu1 %662  ;;  %v4424_v27 = vpop.permute.xlu0 %714 }
 0x168   : > { %613 = vperm.xlu1 %3987, %v4245_v42   ;;  %1102 = vperm.xlu0 %4009, %v4354_v48  }
 0x16a   : > { %v4430_v12 = vpop.permute.xlu0 %722 }
 0x16b   : > { %v4375_v15 = vpop.permute.xlu1 %473 }
 0x16c   : > { %538 = vperm.xlu1 %3987, %v4373_v57   ;;  %1106 = vperm.xlu0 %4009, %v4170_v46  }
 0x16e   : > { %v4435_v17 = vpop.permute.xlu0 %730 }
 0x170   : > { %v4379_v3 = vpop.permute.xlu1 %666  ;;  %1118 = vperm.xlu0 %4009, %v4155_v36   ;;  %618 = vperm.xlu1 %3987, %v4318_v32  }
 0x172   : > { %v4440_v39 = vpop.permute.xlu0 %738 }
 0x174   : > { %1122 = vperm.xlu0 %4009, %v4181_v52   ;;  %3988 = vset.pattern.permute.xlu1 %v4041_v43  ;;  %v6366_v52 = vmov 2  }
 0x175   : > { %v4385_v4 = vpop.permute.xlu1 %553  ;;  %682 = vperm.xlu1 %3988, %v4273_v55  }
 0x176   : > { %v4448_v54 = vpop.permute.xlu0 %746 }
 0x178   : > { %1134 = vperm.xlu0 %4009, %v4263_v49  }
 0x179   : > { %v4389_v23 = vpop.permute.xlu1 %478  ;;  %686 = vperm.xlu1 %3988, %v4280_v59  }
 0x17d   : > { %690 = vperm.xlu1 %3988, %v4296_v8  }
 0x17e   : > { %v4393_v2 = vpop.permute.xlu1 %670 }
 0x181   : > { %694 = vperm.xlu1 %3988, %v4324_v1  }
 0x183   : > { %v4396_v62 = vpop.permute.xlu1 %558 }
 0x184   : > { %6359 = vst [vmem:[#allocation9_spill] sm:$0xff] %v4396_v62  ;;  %v6363_v62 = vmov 3  }
 0x185   : > { %698 = vperm.xlu1 %3988, %v4313_v28  }
 0x187   : > { %v4399_v43 = vpop.permute.xlu1 %483 }
 0x189   : > { %706 = vperm.xlu1 %3988, %v4330_v20  }
 0x18c   : > { %v4402_v63 = vpop.permute.xlu1 %674 }
 0x18d   : > { %710 = vperm.xlu1 %3988, %v4354_v48  }
 0x191   : > { %v4405_v0 = vpop.permute.xlu1 %563  ;;  %718 = vperm.xlu1 %3988, %v4373_v57  }
 0x192   : > { %6360 = vst [vmem:[#allocation10_spill] sm:$0xff] %v4405_v0 }
 0x195   : > { %v4408_v58 = vpop.permute.xlu1 %488  ;;  %726 = vperm.xlu1 %3988, %v4155_v36  }
 0x199   : > { %734 = vperm.xlu1 %3988, %v4222_v25  }
 0x19a   : > { %v4414_v10 = vpop.permute.xlu1 %678 }
 0x19d   : > { %742 = vperm.xlu1 %3988, %v4263_v49  }
 0x19f   : > { %v4419_v22 = vpop.permute.xlu1 %568 }
 0x1a0   : > { %6361 = vst [vmem:[#allocation11_spill] sm:$0xff] %v4419_v22  ;;  %v4453_v22 = vpop.permute.xlu0 %754 }
 0x1a1   : > { %750 = vperm.xlu1 %3988, %v4293_v6  }
 0x1a3   : > { %v4422_v24 = vpop.permute.xlu1 %493 }
 0x1a5   : > { %758 = vperm.xlu1 %3988, %v4327_v37  }
 0x1a7   : > { %v4427_v18 = vpop.permute.xlu1 %573 }
 0x1a9   : > { %766 = vperm.xlu1 %3988, %v4284_v61  }
 0x1ab   : > { %v4432_v31 = vpop.permute.xlu1 %498 }
 0x1ad   : > { %774 = vperm.xlu1 %3988, %v4300_v11  }
 0x1af   : > { %v4437_v34 = vpop.permute.xlu1 %578 }
 0x1b1   : > { %782 = vperm.xlu1 %3988, %v4318_v32  }
 0x1b3   : > { %v4442_v13 = vpop.permute.xlu1 %503 }
 0x1b5   : > { %3991 = vset.pattern.permute.xlu1 %v6338_v45  ;;  %v4044_v45 = vmov 0.0  }
 0x1b6   : > { %858 = vperm.xlu1 %3991, %v4153_v35   ;;  %1328 = vst.msk [vmem:[#allocation2 + $0x30] sm:$0x1] %vm1326_vm1, %v4044_v45  ;;  %1327 = vst.msk [vmem:[#allocation2 + $0x18] sm:$0x1] %vm1326_vm1, %v4044_v45  ;;  %v4498_v35 = vpop.permute.xlu0 %762 }
 0x1b7   : > { %v4446_v50 = vpop.permute.xlu1 %583  ;;  %1317 = vst.msk [vmem:[#allocation2] sm:$0xff] %vm1316_vm0, %v4044_v45  ;;  %1318 = vst.msk [vmem:[#allocation2 + $0x8] sm:$0xff] %vm1316_vm0, %v4044_v45 }
 0x1b8   : > { %1322 = vst.msk [vmem:[#allocation2 + $0x198] sm:$0xff] %vm1316_vm0, %v4044_v45  ;;  %1323 = vst.msk [vmem:[#allocation2 + $0x1a0] sm:$0xff] %vm1316_vm0, %v4044_v45 }
 0x1b9   : > { %1329 = vst.msk [vmem:[#allocation2 + $0x48] sm:$0x1] %vm1326_vm1, %v4044_v45  ;;  %1330 = vst.msk [vmem:[#allocation2 + $0x60] sm:$0x1] %vm1326_vm1, %v4044_v45 }
 0x1ba   : > { %862 = vperm.xlu1 %3991, %v4179_v51   ;;  %1331 = vst.msk [vmem:[#allocation2 + $0x78] sm:$0x1] %vm1326_vm1, %v4044_v45  ;;  %1332 = vst.msk [vmem:[#allocation2 + $0x90] sm:$0x1] %vm1326_vm1, %v4044_v45  ;;  %v4503_v49 = vpop.permute.xlu0 %770 }
 0x1bb   : > { %v4451_v38 = vpop.permute.xlu1 %508  ;;  %1333 = vst.msk [vmem:[#allocation2 + $0xa8] sm:$0x1] %vm1326_vm1, %v4044_v45  ;;  %1334 = vst.msk [vmem:[#allocation2 + $0xc0] sm:$0x1] %vm1326_vm1, %v4044_v45 }
 0x1bc   : > { %6362 = vst [vmem:[#allocation12_spill] sm:$0xff] %v4451_v38  ;;  %1335 = vst.msk [vmem:[#allocation2 + $0xd8] sm:$0x1] %vm1326_vm1, %v4044_v45 }
 0x1bd   : > { %1336 = vst.msk [vmem:[#allocation2 + $0xf0] sm:$0x1] %vm1326_vm1, %v4044_v45  ;;  %1337 = vst.msk [vmem:[#allocation2 + $0x108] sm:$0x1] %vm1326_vm1, %v4044_v45 }
 0x1be   : > { %3992 = vset.pattern.permute.xlu1 %v6363_v62  ;;  %1338 = vst.msk [vmem:[#allocation2 + $0x120] sm:$0x1] %vm1326_vm1, %v4044_v45  ;;  %1339 = vst.msk [vmem:[#allocation2 + $0x138] sm:$0x1] %vm1326_vm1, %v4044_v45 }
 0x1bf   : > { %v4456_v0 = vpop.permute.xlu1 %588  ;;  %1050 = vperm.xlu1 %3992, %v4120_v9   ;;  %1340 = vst.msk [vmem:[#allocation2 + $0x150] sm:$0x1] %vm1326_vm1, %v4044_v45  ;;  %1341 = vst.msk [vmem:[#allocation2 + $0x168] sm:$0x1] %vm1326_vm1, %v4044_v45 }
 0x1c0   : > { %6364 = vst [vmem:[#allocation13_spill] sm:$0xff] %v4456_v0  ;;  %1342 = vst.msk [vmem:[#allocation2 + $0x180] sm:$0x1] %vm1326_vm1, %v4044_v45  ;;  %v4511_v0 = vpop.permute.xlu0 %778 }
 0x1c1   : > { %1343 = vst.msk [vmem:[#allocation2 + $0x29] sm:$0x1] %vm1326_vm1, %v4044_v45  ;;  %1344 = vst.msk [vmem:[#allocation2 + $0x41] sm:$0x1] %vm1326_vm1, %v4044_v45 }
 0x1c2   : > { %1345 = vst.msk [vmem:[#allocation2 + $0x59] sm:$0x1] %vm1326_vm1, %v4044_v45  ;;  %1346 = vst.msk [vmem:[#allocation2 + $0x71] sm:$0x1] %vm1326_vm1, %v4044_v45 }
 0x1c3   : > { %1347 = vst.msk [vmem:[#allocation2 + $0x89] sm:$0x1] %vm1326_vm1, %v4044_v45  ;;  %1348 = vst.msk [vmem:[#allocation2 + $0xa1] sm:$0x1] %vm1326_vm1, %v4044_v45  ;;  %v4495_v9 = vpop.permute.xlu1 %513  ;;  %1058 = vperm.xlu1 %3992, %v4179_v51  }
 0x1c4   : > { %1349 = vst.msk [vmem:[#allocation2 + $0xb9] sm:$0x1] %vm1326_vm1, %v4044_v45  ;;  %1350 = vst.msk [vmem:[#allocation2 + $0xd1] sm:$0x1] %vm1326_vm1, %v4044_v45 }
 0x1c5   : > { %1351 = vst.msk [vmem:[#allocation2 + $0xe9] sm:$0x1] %vm1326_vm1, %v4044_v45  ;;  %1352 = vst.msk [vmem:[#allocation2 + $0x101] sm:$0x1] %vm1326_vm1, %v4044_v45 }
 0x1c6   : > { %1353 = vst.msk [vmem:[#allocation2 + $0x119] sm:$0x1] %vm1326_vm1, %v4044_v45  ;;  %1354 = vst.msk [vmem:[#allocation2 + $0x131] sm:$0x1] %vm1326_vm1, %v4044_v45 }
 0x1c7   : > { %1355 = vst.msk [vmem:[#allocation2 + $0x149] sm:$0x1] %vm1326_vm1, %v4044_v45  ;;  %1356 = vst.msk [vmem:[#allocation2 + $0x161] sm:$0x1] %vm1326_vm1, %v4044_v45  ;;  %v4500_v56 = vpop.permute.xlu1 %593  ;;  %1062 = vperm.xlu1 %3992, %v4208_v5   ;;  %v4518_v5 = vpop.permute.xlu0 %854 }
 0x1c8   : > { %1357 = vst.msk [vmem:[#allocation2 + $0x179] sm:$0x1] %vm1326_vm1, %v4044_v45  ;;  %1358 = vst.msk [vmem:[#allocation2 + $0x191] sm:$0x1] %vm1326_vm1, %v4044_v45 }
 0x1c9   : > { %6365 = vst [vmem:[#allocation14_spill] sm:$0xff] %v4495_v9  ;;  %1320 = vst.msk [vmem:[#allocation2 + $0x10] sm:$0x3] %vm1319_vm2, %v4044_v45 }
 0x1ca   : > { %1324 = vst.msk [vmem:[#allocation2 + $0x1a8] sm:$0x3] %vm1319_vm2, %v4044_v45 }
 0x1cb   : > { %v4505_v25 = vpop.permute.xlu1 %518  ;;  %3993 = vset.pattern.permute.xlu1 %v6366_v52 }
 0x1cc   : > { %874 = vperm.xlu1 %3993, %v4250_v44  }
 0x1cf   : > { %v4509_v30 = vpop.permute.xlu1 %598 }
 0x1d0   : > { %6367 = vst [vmem:[#allocation15_spill] sm:$0xff] %v4509_v30  ;;  %3994 = vset.pattern.permute.xlu1 %v6363_v62  ;;  %v4526_v30 = vpop.permute.xlu0 %866 }
 0x1d1   : > { %1066 = vperm.xlu1 %3994, %v4231_v29  }
 0x1d3   : > { %v4515_v51 = vpop.permute.xlu1 %523 }
 0x1d4   : > { %6368 = vst [vmem:[#allocation16_spill] sm:$0xff] %v4515_v51  ;;  %v4531_v51 = vpop.permute.xlu0 %870 }
 0x1d5   : > { %3995 = vset.pattern.permute.xlu1 %v6366_v52 }
 0x1d6   : > { %950 = vperm.xlu1 %3995, %v4211_v7  }
 0x1d7   : > { %v4521_v9 = vpop.permute.xlu1 %603 }
 0x1d8   : > { %6369 = vst [vmem:[#allocation17_spill] sm:$0xff] %v4521_v9 }
 0x1da   : > { %954 = vperm.xlu1 %3995, %v4327_v37  }
 0x1db   : > { %v4524_v44 = vpop.permute.xlu1 %528 }
 0x1dc   : > { %6370 = vst [vmem:[#allocation18_spill] sm:$0xff] %v4524_v44  ;;  %v4539_v44 = vpop.permute.xlu0 %942 }
 0x1de   : > { %946 = vperm.xlu1 %3995, %v4293_v6  }
 0x1df   : > { %v4529_v29 = vpop.permute.xlu1 %608 }
 0x1e0   : > { %6371 = vst [vmem:[#allocation19_spill] sm:$0xff] %v4529_v29  ;;  %v4545_v45 = vpop.permute.xlu0 %882 }
 0x1e2   : > { %878 = vperm.xlu1 %3995, %v4273_v55  }
 0x1e3   : > { %v4534_v38 = vpop.permute.xlu1 %533 }
 0x1e4   : > { %6372 = vst [vmem:[#allocation20_spill] sm:$0xff] %v4534_v38  ;;  %v4551_v55 = vpop.permute.xlu0 %962 }
 0x1e6   : > { %958 = vperm.xlu1 %3995, %v4224_v26  }
 0x1e7   : > { %v4537_v37 = vpop.permute.xlu1 %613 }
 0x1e8   : > { %6373 = vst [vmem:[#allocation21_spill] sm:$0xff] %v4537_v37  ;;  %v4558_v38 = vpop.permute.xlu0 %886 }
 0x1ea   : > { %3996 = vset.pattern.permute.xlu1 %v6363_v62 }
 0x1eb   : > { %v4542_v9 = vpop.permute.xlu1 %538  ;;  %1146 = vperm.xlu1 %3996, %v4211_v7  }
 0x1ec   : > { %6374 = vst [vmem:[#allocation22_spill] sm:$0xff] %v4542_v9 }
 0x1ef   : > { %1138 = vperm.xlu1 %3996, %v4197_v60   ;;  %v4548_v29 = vpop.permute.xlu1 %618  ;;  %v4564_v60 = vpop.permute.xlu0 %970 }
 0x1f0   : > { %6375 = vst [vmem:[#allocation23_spill] sm:$0xff] %v4548_v29 }
 0x1f3   : > { %1142 = vperm.xlu1 %3996, %v4293_v6  }
 0x1f4   : > { %v4553_v26 = vpop.permute.xlu1 %682 }
 0x1f5   : > { %6376 = vst [vmem:[#allocation24_spill] sm:$0xff] %v4553_v26 }
 0x1f7   : > { %1078 = vperm.xlu1 %3996, %v4280_v59   ;;  %v4572_v59 = vpop.permute.xlu0 %894 }
 0x1f8   : > { %v4556_v37 = vpop.permute.xlu1 %686 }
 0x1f9   : > { %6377 = vst [vmem:[#allocation25_spill] sm:$0xff] %v4556_v37 }
 0x1fb   : > { %1158 = vperm.xlu1 %3996, %v4284_v61   ;;  %v4578_v61 = vpop.permute.xlu0 %978 }
 0x1fc   : > { %v4561_v7 = vpop.permute.xlu1 %690 }
 0x1fd   : > { %6378 = vst [vmem:[#allocation26_spill] sm:$0xff] %v4561_v7 }
 0x1ff   : > { %3997 = vset.pattern.permute.xlu1 %v6366_v52 }
 0x200   : > { %890 = vperm.xlu1 %3997, %v4324_v1   ;;  %v4567_v6 = vpop.permute.xlu1 %694 }
 0x201   : > { %6379 = vst [vmem:[#allocation27_spill] sm:$0xff] %v4567_v6  ;;  %v4586_v6 = vpop.permute.xlu0 %902 }
 0x204   : > { %966 = vperm.xlu1 %3997, %v4234_v33   ;;  %v4570_v29 = vpop.permute.xlu1 %698 }
 0x205   : > { %6380 = vst [vmem:[#allocation28_spill] sm:$0xff] %v4570_v29 }
 0x208   : > { %3998 = vset.pattern.permute.xlu1 %v6363_v62  ;;  %v4575_v9 = vpop.permute.xlu1 %706 }
 0x209   : > { %6381 = vst [vmem:[#allocation29_spill] sm:$0xff] %v4575_v9  ;;  %1082 = vperm.xlu1 %3998, %v4296_v8   ;;  %v4592_v9 = vpop.permute.xlu0 %918 }
 0x20c   : > { %v4580_v7 = vpop.permute.xlu1 %710 }
 0x20d   : > { %6382 = vst [vmem:[#allocation30_spill] sm:$0xff] %v4580_v7  ;;  %1162 = vperm.xlu1 %3998, %v4234_v33   ;;  %v4599_v33 = vpop.permute.xlu0 %934 }
 0x20e   : > { %6387 = vst [vmem:[#allocation35_spill] sm:$0xff] %v4599_v33 }
 0x210   : > { %v4583_v1 = vpop.permute.xlu1 %718 }
 0x211   : > { %6383 = vst [vmem:[#allocation31_spill] sm:$0xff] %v4583_v1  ;;  %1166 = vperm.xlu1 %3998, %v4300_v11   ;;  %v621_v1 = vlaneseq }
 0x213   : > { %v622_v37 = vshrl.u32 %v621_v1, 7 }
 0x214   : > { %v4588_v29 = vpop.permute.xlu1 %726 }
 0x215   : > { %6384 = vst [vmem:[#allocation32_spill] sm:$0xff] %v4588_v29  ;;  %3999 = vset.pattern.permute.xlu1 %v6366_v52  ;;  %v1055_v29 = vpop.permute.xlu0 %1054  ;;  %v787_v33 = vsub.s32 1, %v622_v37  ;;  %v1179_v26 = vsub.s32 3, %v622_v37 }
 0x216   : > { %898 = vperm.xlu1 %3999, %v4161_v40  }
 0x218   : > { %v4594_v8 = vpop.permute.xlu1 %734 }
 0x219   : > { %6385 = vst [vmem:[#allocation33_spill] sm:$0xff] %v4594_v8 }
 0x21a   : > { %974 = vperm.xlu1 %3999, %v4245_v42  }
 0x21c   : > { %v4597_v7 = vpop.permute.xlu1 %742 }
 0x21d   : > { %6386 = vst [vmem:[#allocation34_spill] sm:$0xff] %v4597_v7  ;;  %v4611_v7 = vpop.permute.xlu0 %1070 }
 0x21e   : > { %4000 = vset.pattern.permute.xlu1 %v6363_v62  ;;  %6391 = vst [vmem:[#allocation39_spill] sm:$0xff] %v4611_v7 }
 0x21f   : > { %1090 = vperm.xlu1 %4000, %v4313_v28  }
 0x220   : > { %v4603_v11 = vpop.permute.xlu1 %750 }
 0x221   : > { %6388 = vst [vmem:[#allocation36_spill] sm:$0xff] %v4603_v11  ;;  %v623_v11 = vsub.s32 0, %v622_v37 }
 0x223   : > { %1170 = vperm.xlu1 %4000, %v4245_v42   ;;  %v460_v42 = vld [vmem:[%s6331_s3] sm:$0xf] }
 0x224   : > { %v4606_v40 = vpop.permute.xlu1 %758 }
 0x225   : > { %6389 = vst [vmem:[#allocation37_spill] sm:$0xff] %v4606_v40  ;;  %v4620_v40 = vrot.slane %v460_v42, %v787_v33 }
 0x227   : > { %1174 = vperm.xlu1 %4000, %v4318_v32   ;;  %v983_v32 = vsub.s32 2, %v622_v37  ;;  %v789_v33 = vmul.f32 %v4620_v40, %v4364_v53 }
 0x228   : > { %v4609_v8 = vpop.permute.xlu1 %766 }
 0x229   : > { %6390 = vst [vmem:[#allocation38_spill] sm:$0xff] %v4609_v8  ;;  %v4622_v8 = vpop.permute.xlu0 %1150  ;;  %v4636_v37 = vrot.slane %v460_v42, %v983_v32 }
 0x22a   : > { %6393 = vst [vmem:[#allocation41_spill] sm:$0xff] %v4622_v8  ;;  %v4638_v8 = vrot.slane %v460_v42, %v1179_v26 }
 0x22b   : > { %4001 = vset.pattern.permute.xlu1 %v6366_v52 }
 0x22c   : > { %906 = vperm.xlu1 %4001, %v4354_v48   ;;  %v4615_v28 = vpop.permute.xlu1 %774  ;;  %v4628_v48 = vrot.slane %v460_v42, %v623_v11 }
 0x22d   : > { %6392 = vst [vmem:[#allocation40_spill] sm:$0xff] %v4615_v28  ;;  %v790_v28 = vmul.f32 %v4620_v40, %v4369_v14  ;;  %v4649_v32 = vpop.permute.xlu0 %1074 }
 0x22e   : > { %v626_v7 = vmul.f32 %v4628_v48, %v4358_v21  ;;  %v625_v14 = vmul.f32 %v4628_v48, %v4347_v41  ;;  %v641_v21 = vmul.f32 %v4628_v48, %v4352_v47  ;;  %v643_v41 = vmul.f32 %v4628_v48, %v4385_v4 }
 0x22f   : > { %v807_v47 = vmul.f32 %v4620_v40, %v4435_v17  ;;  %v792_v4 = vmul.f32 %v4620_v40, %v4393_v2  ;;  %v4679_v17 = vld [vmem:[%s6332_s4] ss:$0 sm:$0xff] }
 0x230   : > { %4002 = vset.pattern.permute.xlu1 %v6363_v62  ;;  %v4625_v1 = vpop.permute.xlu1 %782  ;;  %v822_v53 = vadd.f32 %v790_v28, %v626_v7  ;;  %v821_v7 = vadd.f32 %v789_v33, %v625_v14  ;;  %v4665_v28 = vmul.f32 %v4620_v40, %v4417_v19  ;;  %v793_v14 = vmul.f32 %v4620_v40, %v4402_v63 }
 0x231   : > { %6394 = vst [vmem:[#allocation42_spill] sm:$0xff] %v4625_v1  ;;  %1098 = vperm.xlu1 %4002, %v4330_v20   ;;  %v805_v1 = vmul.f32 %v4620_v40, %v4430_v12  ;;  %v791_v20 = vmul.f32 %v4620_v40, %v4379_v3  ;;  %v4655_v12 = vmul.f32 %v4628_v48, %v4411_v16 }
 0x232   : > { %v627_v3 = vmul.f32 %v4628_v48, %v4375_v15  ;;  %v4670_v16 = vmul.f32 %v4620_v40, %v4424_v27  ;;  %v811_v27 = vmul.f32 %v4620_v40, %v4448_v54  ;;  %v4690_v2 = vadd.f32 %v807_v47, %v643_v41 }
 0x233   : > { %6395 = vst [vmem:[#allocation43_spill] sm:$0xff] %v4655_v12  ;;  %v813_v54 = vmul.f32 %v4620_v40, %v4453_v22  ;;  %v629_v63 = vmul.f32 %v4628_v48, %v4399_v43  ;;  %v989_v22 = vmul.f32 %v4636_v37, %v4531_v51 }
 0x234   : > { %v823_v15 = vadd.f32 %v791_v20, %v627_v3  ;;  %6397 = vst [vmem:[#allocation45_spill] sm:$0xff] %v4690_v2  ;;  %v628_v20 = vmul.f32 %v4628_v48, %v4389_v23 }
 0x235   : > { %4003 = vset.pattern.permute.xlu1 %v6366_v52  ;;  %v859_v11 = vpop.permute.xlu1 %858 }
 0x236   : > { %v986_v26 = vmul.f32 %v4636_v37, %v859_v11  ;;  %910 = vperm.xlu1 %4003, %v4170_v46   ;;  %v1182_v46 = vmul.f32 %v4638_v8, %v1055_v29  ;;  %v4672_v11 = vadd.f32 %v805_v1, %v641_v21  ;;  %v4683_v29 = vmul.f32 %v4620_v40, %v4440_v39 }
 0x237   : > { %v647_v1 = vmul.f32 %v4628_v48, %v4427_v18  ;;  %v985_v39 = vmul.f32 %v4636_v37, %v4518_v5  ;;  %v794_v18 = vmul.f32 %v4620_v40, %v4414_v10  ;;  %v988_v21 = vmul.f32 %v4636_v37, %v4526_v30 }
 0x238   : > { %v1018_v42 = vadd.f32 %v986_v26, %v822_v53  ;;  %6396 = vst [vmem:[#allocation44_spill] sm:$0xff] %v4683_v29  ;;  %v4704_v53 = vpop.permute.xlu0 %1154  ;;  %v824_v23 = vadd.f32 %v792_v4, %v628_v20  ;;  %v815_v5 = vmul.f32 %v4620_v40, %v4498_v35  ;;  %v4715_v10 = vmul.f32 %v4620_v40, %v4503_v49 }
 0x239   : > { %v863_v19 = vpop.permute.xlu1 %862  ;;  %v630_v30 = vmul.f32 %v4628_v48, %v4408_v58  ;;  %v843_v3 = vadd.f32 %v811_v27, %v647_v1  ;;  %v1017_v43 = vadd.f32 %v985_v39, %v821_v7  ;;  %v4725_v49 = vmul.f32 %v4620_v40, %v4511_v0 }
 0x23a   : > { %v1214_v33 = vadd.f32 %v1182_v46, %v1018_v42  ;;  %914 = vperm.xlu1 %4003, %v4373_v57   ;;  %v825_v46 = vadd.f32 %v793_v14, %v629_v63  ;;  %v987_v42 = vmul.f32 %v4636_v37, %v863_v19  ;;  %v1020_v58 = vadd.f32 %v988_v21, %v824_v23  ;;  %v6405_v63 = vld [vmem:[#allocation13_spill] sm:$0xff] }
 0x23b   : > { %v4727_v51 = vadd.f32 %v794_v18, %v630_v30  ;;  %v1007_v4 = vmul.f32 %v4636_v37, %v4539_v44  ;;  %v4736_v7 = vmul.f32 %v4628_v48, %v4422_v24  ;;  %v4744_v19 = vmul.f32 %v4636_v37, %v4551_v55  ;;  %v6407_v30 = vld [vmem:[#allocation14_spill] sm:$0xff] }
 0x23c   : > { %v1253_v26 = vadd.f32 %v4679_v17, %v1214_v33  ;;  %v4732_v27 = vadd.f32 %v989_v22, %v825_v46  ;;  %v4748_v44 = vmul.f32 %v4628_v48, %v4432_v31  ;;  %v649_v1 = vmul.f32 %v4628_v48, %v4446_v50  ;;  %v4752_v33 = vpop.permute.xlu0 %1086 }
 0x23d   : > { %6398 = vst [vmem:[#allocation46_spill] sm:$0xff] %v4744_v19  ;;  %v4754_v20 = vadd.f32 %v1007_v4, %v843_v3  ;;  %v1019_v14 = vadd.f32 %v987_v42, %v823_v15  ;;  %v4765_v31 = vmul.f32 %v4628_v48, %v4437_v34  ;;  %v4769_v50 = vmul.f32 %v4636_v37, %v4564_v60  ;;  %v4821_v42 = vld [vmem:[#allocation2 + $0x8] sm:$0xff] }
 0x23e   : > { %v1285_v41 = vmax.f32 %v1253_v26, 0.0  ;;  %4004 = vset.pattern.permute.xlu1 %v6363_v62  ;;  %v1051_v47 = vpop.permute.xlu1 %1050  ;;  %v1001_v18 = vmul.f32 %v4636_v37, %v4592_v9  ;;  %v4778_v15 = vmul.f32 %v4628_v48, %v4442_v13  ;;  %v636_v34 = vmul.f32 %v4628_v48, %v4505_v25  ;;  %v6410_v4 = vld [vmem:[#allocation15_spill] sm:$0xff] }
 0x23f   : > { %v1181_v35 = vmul.f32 %v4638_v8, %v1051_v47  ;;  %1110 = vperm.xlu1 %4004, %v4373_v57   ;;  %v4740_v57 = vmul.f32 %v4636_v37, %v4545_v45  ;;  %v4758_v45 = vmul.f32 %v4636_v37, %v4558_v38  ;;  %6399 = vst [vmem:[#allocation47_spill] sm:$0xff] %v4769_v50 }
 0x240   : > { %1360 = vst.msk [vmem:[#allocation2 + $0x21] sm:$0xff] %vm1316_vm0, %v1285_v41  ;;  %v651_v38 = vmul.f32 %v4628_v48, %v4500_v56  ;;  %v4784_v60 = vmul.f32 %v4636_v37, %v4572_v59  ;;  %v4786_v23 = vadd.f32 %v813_v54, %v649_v1  ;;  %v4790_v56 = vmul.f32 %v4636_v37, %v4578_v61  ;;  %v1095_v46 = vpop.permute.xlu0 %1094 }
 0x241   : > { %v1213_v0 = vadd.f32 %v1181_v35, %v1017_v43  ;;  %v4798_v25 = vmul.f32 %v4636_v37, %v4586_v6  ;;  %v4802_v22 = vmul.f32 %v4628_v48, %v6405_v63  ;;  %v4808_v54 = vadd.f32 %v1001_v18, %v4672_v11  ;;  %v6408_v6 = vld [vmem:[#allocation17_spill] sm:$0xff]  ;;  %v4819_v43 = vld [vmem:[#allocation2] sm:$0xff]  ;;  %v1393_v35 = vld [vmem:[#allocation2 + $0x10] sm:$0x3] }
 0x242   : > { %v1059_v24 = vpop.permute.xlu1 %1058  ;;  %6400 = vst [vmem:[#allocation48_spill] sm:$0xff] %v4784_v60  ;;  %6401 = vst [vmem:[#allocation49_spill] sm:$0xff] %v4790_v56  ;;  %v4812_v3 = vmul.f32 %v4628_v48, %v6407_v30  ;;  %v4814_v41 = vadd.f32 %v815_v5, %v651_v38  ;;  %v653_v47 = vmul.f32 %v4628_v48, %v6408_v6 }
 0x243   : > { %v1252_v55 = vadd.f32 %v4679_v17, %v1213_v0  ;;  %v1183_v39 = vmul.f32 %v4638_v8, %v1059_v24  ;;  %4005 = vset.pattern.permute.xlu1 %v6366_v52  ;;  %6404 = vst [vmem:[#allocation50_spill] sm:$0xff] %v4798_v25  ;;  %6406 = vst [vmem:[#allocation13_spill] sm:$0xff] %v4808_v54  ;;  %v4824_v11 = vadd.f32 %v4665_v28, %v636_v34  ;;  %v6411_v24 = vld [vmem:[#allocation4_spill] sm:$0xff] }
 0x244   : > { %922 = vperm.xlu1 %4005, %v4155_v36   ;;  %v6402_v36 = vld [vmem:[#allocation12_spill] sm:$0xff]  ;;  %v4828_v0 = vmul.f32 %v4628_v48, %v6410_v4  ;;  %v1520_v34 = vrot.slane %v4819_v43, 1  ;;  %v4850_v63 = vmul.f32 %v4638_v8, %v4649_v32  ;;  %v4859_v6 = vmul.f32 %v4638_v8, %v4704_v53 }
 0x245   : > { %v1284_v21 = vmax.f32 %v1252_v55, 0.0  ;;  %v1215_v26 = vadd.f32 %v1183_v39, %v1019_v14  ;;  %v4794_v9 = vmul.f32 %v4628_v48, %v6402_v36  ;;  %6409 = vst [vmem:[#allocation14_spill] sm:$0xff] %v4824_v11  ;;  %v6412_v14 = vld [vmem:[#allocation39_spill] sm:$0xff]  ;;  %v6413_v39 = vld [vmem:[#allocation16_spill] sm:$0xff]  ;;  %v1730_v53 = vrot.slane %v4819_v43, 2 }
 0x246   : > { %v1063_v13 = vpop.permute.xlu1 %1062  ;;  %v1186_v55 = vmul.f32 %v4638_v8, %v6412_v14  ;;  %v4835_v18 = vmul.f32 %v4628_v48, %v6413_v39  ;;  %v6418_v4 = vld [vmem:[#allocation20_spill] sm:$0xff]  ;;  %v6421_v14 = vld [vmem:[#allocation5_spill] sm:$0xff] }
 0x247   : > { %6403 = vst [vmem:[#allocation12_spill] sm:$0xff] %v4794_v9  ;;  %1359 = vst.msk [vmem:[#allocation2 + $0x19] sm:$0xff] %vm1316_vm0, %v1284_v21  ;;  %v1254_v59 = vadd.f32 %v4679_v17, %v1215_v26  ;;  %v1184_v61 = vmul.f32 %v4638_v8, %v1063_v13  ;;  %v1523_v21 = vrot.slane %v1393_v35, 1  ;;  %v6414_v26 = vld [vmem:[#allocation41_spill] sm:$0xff]  ;;  %v4846_v13 = vadd.f32 %v4715_v10, %v653_v47  ;;  %v6419_v10 = vld [vmem:[#allocation19_spill] sm:$0xff]  ;;  %v1103_v47 = vpop.permute.xlu0 %1102 }
 0x248   : > { %4006 = vset.pattern.permute.xlu1 %v6363_v62  ;;  %v4843_v36 = vmul.f32 %v4638_v8, %v6414_v26  ;;  %v4866_v32 = vmul.f32 %v4628_v48, %v6419_v10  ;;  %v1731_v26 = vrot.slane %v4821_v42, 2  ;;  %v4888_v29 = vld [vmem:[#allocation2 + $0x28] sm:$0x3] }
 0x249   : > { %v1286_v5 = vmax.f32 %v1254_v59, 0.0  ;;  %v1216_v1 = vadd.f32 %v1184_v61, %v1020_v58  ;;  %1114 = vperm.xlu1 %4006, %v6411_v24   ;;  %v1521_v58 = vrot.slane %v4821_v42, 1  ;;  %6415 = vst [vmem:[#allocation17_spill] sm:$0xff] %v4846_v13  ;;  %v6416_v61 = vld [vmem:[#allocation18_spill] sm:$0xff] }
 0x24a   : > { %v4855_v30 = vmul.f32 %v4628_v48, %v6416_v61  ;;  %6420 = vst [vmem:[#allocation4_spill] sm:$0xff] %v4866_v32 }
 0x24b   : > { %1361 = vst.msk [vmem:[#allocation2 + $0x31] sm:$0xff] %vm1316_vm0, %v1286_v5  ;;  %v1255_v28 = vadd.f32 %v4679_v17, %v1216_v1  ;;  %v875_v38 = vpop.permute.xlu1 %874  ;;  %v639_v5 = vmul.f32 %v4628_v48, %v6418_v4  ;;  %v4880_v61 = vsel %vm1519_vm4, %v1520_v34, %v1521_v58  ;;  %v4886_v4 = vmul.f32 %v4638_v8, %v1095_v46  ;;  %v6425_v34 = vld [vmem:[#allocation21_spill] sm:$0xff] }
 0x24c   : > { %v990_v59 = vmul.f32 %v4636_v37, %v875_v38  ;;  %6417 = vst [vmem:[#allocation15_spill] sm:$0xff] %v4855_v30  ;;  %v4898_v54 = vmul.f32 %v4628_v48, %v6425_v34  ;;  %v6429_v34 = vld [vmem:[#allocation37_spill] sm:$0xff]  ;;  %v6434_v30 = vld [vmem:[#allocation8_spill] sm:$0xff] }
 0x24d   : > { %v1287_v1 = vmax.f32 %v1255_v28, 0.0  ;;  %4007 = vset.pattern.permute.xlu1 %v6366_v52  ;;  %v4876_v28 = vmul.f32 %v4638_v8, %v4752_v33  ;;  %6423 = vst [vmem:[#allocation16_spill] sm:$0xff] %v4886_v4 }
 0x24e   : > { %v1022_v24 = vadd.f32 %v990_v59, %v4727_v51  ;;  %926 = vperm.xlu1 %4007, %v6421_v14   ;;  %v4870_v39 = vld [vmem:[#allocation2 + $0x18] sm:$0xff]  ;;  %v1940_v38 = vld [vmem:[#allocation2 + $0x20] sm:$0xff]  ;;  %v4883_v51 = vsel %vm1519_vm4, %v1521_v58, %v1523_v21  ;;  %v1733_v59 = vrot.slane %v1393_v35, 2  ;;  %v4901_v35 = vmul.f32 %v4638_v8, %v1103_v47 }
 0x24f   : > { %6422 = vst [vmem:[#allocation39_spill] sm:$0xff] %v4876_v28  ;;  %1362 = vst.msk [vmem:[#allocation2 + $0x39] sm:$0xff] %vm1316_vm0, %v1287_v1  ;;  %v2132_v2 = vrot.slane %v4870_v39, 1  ;;  %v4891_v33 = vrot.slane %v1940_v38, 1  ;;  %v4894_v1 = vadd.f32 %v4670_v16, %v639_v5  ;;  %v4911_v5 = vsel %vm1729_vm3, %v1730_v53, %v1731_v26 }
 0x250   : > { %v1218_v10 = vadd.f32 %v1186_v55, %v1022_v24  ;;  %v1067_v14 = vpop.permute.xlu1 %1066  ;;  %6426 = vst [vmem:[#allocation18_spill] sm:$0xff] %v4901_v35  ;;  %v6427_v55 = vld [vmem:[#allocation24_spill] sm:$0xff]  ;;  %v6428_v24 = vld [vmem:[#allocation7_spill] sm:$0xff]  ;;  %v814_v47 = vmul.f32 %v4620_v40, %v6429_v34  ;;  %v2276_v35 = vrot.slane %v4870_v39, 2  ;;  %v4921_v11 = vrot.slane %v1940_v38, 2 }
 0x251   : > { %6424 = vst [vmem:[#allocation41_spill] sm:$0xff] %v4894_v1  ;;  %v1185_v46 = vmul.f32 %v4638_v8, %v1067_v14  ;;  %v795_v58 = vmul.f32 %v4620_v40, %v6427_v55  ;;  %v4917_v14 = vsel %vm1729_vm3, %v1731_v26, %v1733_v59  ;;  %v2135_v55 = vrot.slane %v4888_v29, 1 }
 0x252   : > { %v1257_v21 = vadd.f32 %v4679_v17, %v1218_v10  ;;  %930 = vperm.xlu1 %4007, %v6428_v24   ;;  %v2485_v4 = vld [vmem:[#allocation2 + $0x30] sm:$0xff]  ;;  %v4925_v16 = vsel %vm1519_vm4, %v2132_v2, %v4891_v33  ;;  %v4931_v26 = vpack.c.bf16 %v1940_v38, %v4870_v39 }
 0x253   : > { %v1217_v1 = vadd.f32 %v1185_v46, %v4732_v27  ;;  %v2677_v34 = vrot.slane %v2485_v4, 1  ;;  %v2136_v27 = vsel %vm1519_vm4, %v4891_v33, %v2135_v55  ;;  %v4934_v59 = vadd.f32 %v795_v58, %v4736_v7 }
 0x254   : > { %v1289_v10 = vmax.f32 %v1257_v21, 0.0  ;;  %v2885_v2 = vrot.slane %v2485_v4, 2  ;;  %v2244_v55 = vpack.c.bf16 %v2136_v27, %v4925_v16  ;;  %1456 = vst.msk [vmem:[#allocation3 + $0x18] sm:$0xff] %vm1316_vm0, %v4931_v26  ;;  %v846_v58 = vadd.f32 %v814_v47, %v4802_v22 }
 0x255   : > { %v1256_v53 = vadd.f32 %v4679_v17, %v1217_v1  ;;  %v951_v56 = vpop.permute.xlu1 %950  ;;  %v2279_v47 = vrot.slane %v4888_v29, 2 }
 0x256   : > { %1364 = vst.msk [vmem:[#allocation2 + $0x51] sm:$0xff] %vm1316_vm0, %v1289_v10  ;;  %4008 = vset.pattern.permute.xlu1 %v6363_v62  ;;  %v2486_v46 = vld [vmem:[#allocation2 + $0x38] sm:$0xff]  ;;  %v2487_v21 = vld [vmem:[#allocation2 + $0x40] sm:$0x3]  ;;  %2260 = vst.msk [vmem:[#allocation3 + $0x8] sm:$0xff] %vm1316_vm0, %v2244_v55  ;;  %v4983_v55 = vsel %vm1729_vm3, %v2276_v35, %v4921_v11 }
 0x257   : > { %v4938_v13 = vld [vmem:[#allocation2 + $0x40] sm:$0x3]  ;;  %v1288_v28 = vmax.f32 %v1256_v53, 0.0  ;;  %1126 = vperm.xlu1 %4008, %v6428_v24   ;;  %v4944_v39 = vpack.c.bf16 %v2486_v46, %v2485_v4  ;;  %v4946_v7 = vrot.slane %v2486_v46, 1  ;;  %v4948_v38 = vrot.slane %v2486_v46, 2 }
 0x258   : > { %v2680_v10 = vrot.slane %v2487_v21, 1  ;;  %v2888_v50 = vrot.slane %v2487_v21, 2  ;;  %v2284_v1 = vrot.slane %v4938_v13, 2  ;;  %v4967_v53 = vld [vmem:[#allocation2 + $0x28] sm:$0x3]  ;;  %v4976_v21 = vld [vmem:[#allocation2 + $0x1a0] sm:$0xff] }
 0x259   : > { %6430 = vst [vmem:[#allocation20_spill] sm:$0xff] %v4944_v39  ;;  %6431 = vst [vmem:[#allocation19_spill] sm:$0xff] %v4948_v38  ;;  %v955_v24 = vpop.permute.xlu1 %954  ;;  %v4958_v4 = vsel %vm1729_vm3, %v2885_v2, %v4948_v38  ;;  %2565 = vrot.lane.b32.xlu0 %v4944_v39, %s4045_s19  ;;  %v4964_v22 = vsel %vm1519_vm4, %v2677_v34, %v4946_v7  ;;  %v4974_v2 = vld [vmem:[#allocation2 + $0x198] sm:$0xff] }
 0x25a   : > { %1363 = vst.msk [vmem:[#allocation2 + $0x49] sm:$0xff] %vm1316_vm0, %v1288_v28  ;;  %6432 = vst [vmem:[#allocation5_spill] sm:$0xff] %v4958_v4  ;;  %v1010_v27 = vmul.f32 %v4636_v37, %v955_v24  ;;  %v2681_v28 = vsel %vm1519_vm4, %v4946_v7, %v2680_v10  ;;  %v2889_v46 = vsel %vm1729_vm3, %v4948_v38, %v2888_v50  ;;  %v6433_v24 = vld [vmem:[#allocation25_spill] sm:$0xff] }
 0x25b   : > { %4010 = vset.pattern.permute.xlu1 %v6366_v52  ;;  %v2789_v34 = vpack.c.bf16 %v2681_v28, %v4964_v22  ;;  %v2997_v29 = vpack.c.bf16 %v2889_v46, %v4958_v4  ;;  %v2280_v10 = vsel %vm1729_vm3, %v4921_v11, %v2279_v47  ;;  %v4989_v50 = vmul.f32 %v4620_v40, %v6433_v24  ;;  %v6435_v46 = vld [vmem:[#allocation36_spill] sm:$0xff] }
 0x25c   : > { %v1042_v12 = vadd.f32 %v1010_v27, %v846_v58  ;;  %938 = vperm.xlu1 %4010, %v6434_v30   ;;  %v2285_v52 = vsel %vm1729_vm3, %v4948_v38, %v2284_v1  ;;  %v1528_v28 = vrot.slane %v4967_v53, 1  ;;  %v4997_v25 = vmul.f32 %v4620_v40, %v6435_v46  ;;  %v5003_v58 = vld [vmem:[#allocation2 + $0x40] sm:$0x3]  ;;  %1457 = vst.msk [vmem:[#allocation3 + $0x30] sm:$0xff] %vm1316_vm0, %v4944_v39 }
 0x25d   : > { %v4999_v35 = vpop.permute.xlu1 %946  ;;  %3013 = vst.msk [vmem:[#allocation3 + $0x10] sm:$0xff] %vm1316_vm0, %v2997_v29  ;;  %2821 = vrot.lane.b32.xlu0 %v2789_v34, %s4046_s20  ;;  %v2490_v47 = vld [vmem:[#allocation2 + $0x58] sm:$0x3]  ;;  %6436 = vst [vmem:[#allocation21_spill] sm:$0xff] %v5003_v58  ;;  %v2388_v27 = vpack.c.bf16 %v2280_v10, %v4983_v55  ;;  %v1009_v46 = vmul.f32 %v4636_v37, %v951_v56  ;;  %v2389_v29 = vpack.c.bf16 %v2285_v52, %v4958_v4  ;;  %v4013_v34 = vld [vmem:[%s6333_s5 + $0x40] sm:$0xff]  }
 0x25e   : > { %v1238_v1 = vadd.f32 %v4843_v36, %v1042_v12  ;;  %v5011_v24 = vsel %vm1519_vm4, %v4891_v33, %v1528_v28  ;;  %v5015_v38 = vld [vmem:[#allocation2 + $0x58] sm:$0x3]  ;;  %v4014_v12 = vld [vmem:[%s6333_s5] sm:$0xff]   ;;  %v2685_v10 = vrot.slane %v2490_v47, 1  ;;  %v1533_v52 = vrot.slane %v5003_v58, 1  ;;  %3778 = vmatprep.subr.bf16.mxu0 %v4013_v34  ;;  %3944 = vmatprep.subr.bf16.mxu1 %v4013_v34 }
 0x25f   : > { %v2140_v28 = vrot.slane %v4938_v13, 1  ;;  %v6437_v30 = vld [vmem:[#allocation6_spill] sm:$0xff]  ;;  %v2289_v58 = vrot.slane %v5015_v38, 2  ;;  %3779 = vmatpush3.bf16.msra.mxu0 %v4014_v12  ;;  %3952 = vmatpush3.bf16.msra.mxu1 %v4014_v12 }
 0x260   : > { %v1277_v36 = vadd.f32 %v4679_v17, %v1238_v1  ;;  %4011 = vset.pattern.permute.xlu1 %v6363_v62  ;;  %v2893_v1 = vrot.slane %v2490_v47, 2 }
 0x261   : > { %v2488_v56 = vld [vmem:[#allocation2 + $0x48] sm:$0xff]  ;;  %v2489_v33 = vld [vmem:[#allocation2 + $0x50] sm:$0xff]  ;;  %1130 = vperm.xlu1 %4011, %v6437_v30   ;;  %v879_v4 = vpop.permute.xlu1 %878  ;;  %2422 = vrot.lane.b32.xlu0 %v2389_v29, %s4047_s26 }
 0x262   : > { %v2682_v60 = vrot.slane %v2488_v56, 1  ;;  %v5031_v32 = vrot.slane %v2489_v33, 1  ;;  %v2890_v39 = vrot.slane %v2488_v56, 2  ;;  %v1309_v19 = vmax.f32 %v1277_v36, 0.0 }
 0x263   : > { %v991_v62 = vmul.f32 %v4636_v37, %v879_v4  ;;  %v5034_v9 = vrot.slane %v2489_v33, 2  ;;  %v5037_v13 = vpack.c.bf16 %v2489_v33, %v2488_v56  ;;  %v2141_v36 = vsel %vm1519_vm4, %v4946_v7, %v2140_v28  ;;  %v4015_v28 = vld [vmem:[%s6333_s5 + $0x48] sm:$0xff]  }
 0x264   : > { %v5041_v30 = vsel %vm1519_vm4, %v2682_v60, %v5031_v32  ;;  %v2686_v29 = vsel %vm1519_vm4, %v5031_v32, %v2685_v10  ;;  %1384 = vst.msk [vmem:[#allocation2 + $0x141] sm:$0xff] %vm1316_vm0, %v1309_v19  ;;  %v2753_v56 = vrot.slane %v4976_v21, 1  ;;  %v1041_v33 = vadd.f32 %v1009_v46, %v4786_v23  ;;  %3780 = vmatprep.subr.bf16.mxu0 %v4015_v28 }
 0x265   : > { %v1023_v4 = vadd.f32 %v991_v62, %v4934_v59  ;;  %v5049_v47 = vsel %vm1729_vm3, %v2890_v39, %v5034_v9  ;;  %v2894_v34 = vsel %vm1729_vm3, %v5034_v9, %v2893_v1  ;;  %v959_v60 = vpop.permute.xlu1 %958  ;;  %2420 = vrot.lane.b32.xlu1 %v2388_v27, %s4047_s26  ;;  %2567 = vrot.lane.b32.xlu0 %v5037_v13, %s4045_s19  ;;  %v2752_v39 = vrot.slane %v4974_v2, 1  ;;  %v2532_v1 = vld [vmem:[#allocation2 + $0x1a8] sm:$0x3] }
 0x266   : > { %v2998_v19 = vpack.c.bf16 %v2894_v34, %v5049_v47  ;;  %v2290_v59 = vsel %vm1729_vm3, %v5034_v9, %v2289_v58  ;;  %v1011_v12 = vmul.f32 %v4636_v37, %v959_v60  ;;  %v5068_v27 = vsel %vm1519_vm4, %v4946_v7, %v1533_v52  ;;  %v4016_v58 = vld [vmem:[%s6333_s5 + $0x8] sm:$0xff]   ;;  %3945 = vmatprep.subr.bf16.mxu1 %v4015_v28 }
 0x267   : > { %v1219_v10 = vadd.f32 %v4850_v63, %v1023_v4  ;;  %v2790_v62 = vpack.c.bf16 %v2686_v29, %v5041_v30  ;;  %v2245_v23 = vpack.c.bf16 %v2141_v36, %v4964_v22  ;;  %v2960_v63 = vrot.slane %v4974_v2, 2  ;;  %3781 = vmatpush3.bf16.msra.mxu0 %v4016_v58  ;;  %3953 = vmatpush3.bf16.msra.mxu1 %v4016_v58 }
 0x268   : > { %3014 = vst.msk [vmem:[#allocation3 + $0x28] sm:$0xff] %vm1316_vm0, %v2998_v19  ;;  %v2961_v7 = vrot.slane %v4976_v21, 2  ;;  %v1043_v52 = vadd.f32 %v1011_v12, %v4814_v41  ;;  %v2390_v4 = vpack.c.bf16 %v2290_v59, %v5049_v47  ;;  %v6438_v29 = vpack.c.bf16 %v4883_v51, %v4880_v61  ;;  %v4017_v19 = vld [vmem:[%s6333_s5 + $0x50] sm:$0xff]   ;;  %1458 = vst.msk [vmem:[#allocation3 + $0x48] sm:$0xff] %vm1316_vm0, %v5037_v13 }
 0x269   : > { %v1258_v46 = vadd.f32 %v4679_v17, %v1219_v10  ;;  %2823 = vrot.lane.b32.xlu0 %v2790_v62, %s4046_s20  ;;  %2261 = vst.msk [vmem:[#allocation3 + $0x20] sm:$0xff] %vm1316_vm0, %v2245_v23  ;;  %v5092_v36 = vsel %vm1519_vm4, %v2752_v39, %v2753_v56  ;;  %v2755_v60 = vrot.slane %v2532_v1, 1  ;;  %v2963_v41 = vrot.slane %v2532_v1, 2  ;;  %v4018_v51 = vld [vmem:[%s6333_s5 + $0x10] sm:$0xff]   ;;  %3782 = vmatprep.subr.bf16.mxu0 %v4017_v19  ;;  %v4019_v1 = vld [vmem:[%s6333_s5 + $0x58] sm:$0xff]   ;;  %v1107_v23 = vpop.permute.xlu0 %1106 }
 0x26a   : > { %1664 = vrot.lane.b32.xlu1 %v6438_v29, %s4047_s26  ;;  %v2962_v34 = vsel %vm1729_vm3, %v2960_v63, %v2961_v7  ;;  %6439 = vst [vmem:[#allocation24_spill] sm:$0xff] %v5092_v36  ;;  %v1239_v10 = vadd.f32 %v4859_v6, %v1043_v52  ;;  %v1147_v61 = vpop.permute.xlu1 %1146  ;;  %3946 = vmatprep.subr.bf16.mxu1 %v4017_v19 }
 0x26b   : > { %v1290_v59 = vmax.f32 %v1258_v46, 0.0  ;;  %v1205_v12 = vmul.f32 %v4638_v8, %v1147_v61  ;;  %v5103_v39 = vsel %vm1519_vm4, %v2753_v56, %v2755_v60  ;;  %v2964_v28 = vsel %vm1729_vm3, %v2961_v7, %v2963_v41  ;;  %3783 = vmatpush3.bf16.msra.mxu0 %v4018_v51  ;;  %3954 = vmatpush3.bf16.msra.mxu1 %v4018_v51  ;;  %v6442_v60 = vld [vmem:[#allocation26_spill] sm:$0xff] }
 0x26c   : > { %v1008_v6 = vmul.f32 %v4636_v37, %v4999_v35  ;;  %v1278_v58 = vadd.f32 %v4679_v17, %v1239_v10  ;;  %v1634_v62 = vpack.c.bf16 %v5068_v27, %v4964_v22  ;;  %v2145_v56 = vrot.slane %v5015_v38, 1  ;;  %v4020_v38 = vld [vmem:[%s6333_s5 + $0x18] sm:$0xff]   ;;  %3784 = vmatprep.subr.bf16.mxu0 %v4019_v1  ;;  %3947 = vmatprep.subr.bf16.mxu1 %v4019_v1  ;;  %v6443_v61 = vld [vmem:[#allocation38_spill] sm:$0xff] }
 0x26d   : > { %1365 = vst.msk [vmem:[#allocation2 + $0x61] sm:$0xff] %vm1316_vm0, %v1290_v59  ;;  %v1237_v63 = vadd.f32 %v1205_v12, %v1041_v33  ;;  %v6440_v7 = vpack.c.bf16 %v4917_v14, %v4911_v5  ;;  %2424 = vrot.lane.b32.xlu0 %v2390_v4, %s4047_s26  ;;  %v3012_v46 = vpack.c.bf16 %v2964_v28, %v2962_v34  ;;  %v4021_v4 = vld [vmem:[%s6333_s5 + $0x60] sm:$0xff]  }
 0x26e   : > { %v1310_v52 = vmax.f32 %v1278_v58, 0.0  ;;  %v1139_v29 = vpop.permute.xlu1 %1138  ;;  %v2146_v22 = vsel %vm1519_vm4, %v5031_v32, %v2145_v56  ;;  %v1439_v5 = vpack.c.bf16 %v4821_v42, %v4819_v43  ;;  %v5139_v34 = vadd.f32 %v4725_v49, %v4898_v54  ;;  %v6441_v43 = vld [vmem:[#allocation22_spill] sm:$0xff]  ;;  %v6445_v58 = vld [vmem:[#allocation29_spill] sm:$0xff]  ;;  %v6446_v56 = vld [vmem:[#allocation23_spill] sm:$0xff] }
 0x26f   : > { %1874 = vrot.lane.b32.xlu1 %v6440_v7, %s4045_s19  ;;  %v1276_v14 = vadd.f32 %v4679_v17, %v1237_v63  ;;  %v1203_v33 = vmul.f32 %v4638_v8, %v1139_v29  ;;  %3028 = vst.msk [vmem:[#allocation3 + $0x178] sm:$0xff] %vm1316_vm0, %v3012_v46  ;;  %v2246_v27 = vpack.c.bf16 %v2146_v22, %v5041_v30  ;;  %v6447_v63 = vld [vmem:[#allocation27_spill] sm:$0xff] }
 0x270   : > { %v5143_v42 = vmul.f32 %v4628_v48, %v6441_v43  ;;  %v797_v41 = vmul.f32 %v4620_v40, %v6442_v60  ;;  %1385 = vst.msk [vmem:[#allocation2 + $0x151] sm:$0xff] %vm1316_vm0, %v1310_v52  ;;  %1455 = vst.msk [vmem:[#allocation3] sm:$0xff] %vm1316_vm0, %v1439_v5  ;;  %v5150_v19 = vmul.f32 %v4638_v8, %v1107_v23  ;;  %3785 = vmatpush3.bf16.msra.mxu0 %v4020_v38  ;;  %v6448_v43 = vld [vmem:[#allocation40_spill] sm:$0xff] }
 0x271   : > { %v844_v59 = vadd.f32 %v4997_v25, %v4765_v31  ;;  %v1308_v10 = vmax.f32 %v1276_v14, 0.0  ;;  %v1235_v49 = vadd.f32 %v1203_v33, %v4754_v20  ;;  %1668 = vrot.lane.b32.xlu0 %v1634_v62, %s4047_s26  ;;  %2262 = vst.msk [vmem:[#allocation3 + $0x38] sm:$0xff] %vm1316_vm0, %v2246_v27  ;;  %v828_v54 = vadd.f32 %v4989_v50, %v4748_v44  ;;  %v4022_v20 = vld [vmem:[%s6333_s5 + $0x20] sm:$0xff]   ;;  %v5203_v27 = vld [vmem:[#allocation2 + $0x148] sm:$0x3] }
 0x272   : > { %v816_v51 = vmul.f32 %v4620_v40, %v6443_v61  ;;  %v1143_v12 = vpop.permute.xlu1 %1142  ;;  %v1633_v31 = vpack.c.bf16 %v5011_v24, %v4925_v16  ;;  %v1738_v25 = vrot.slane %v4967_v53, 2  ;;  %3955 = vmatpush3.bf16.msra.mxu1 %v4020_v38  ;;  %3786 = vmatprep.subr.bf16.mxu0 %v4021_v4  ;;  %v4023_v16 = vld [vmem:[%s6333_s5 + $0x68] sm:$0xff]   ;;  %v829_v53 = vadd.f32 %v797_v41, %v4778_v15  ;;  %v6444_v24 = vld [vmem:[#allocation28_spill] sm:$0xff] }
 0x273   : > { %2019 = vrot.lane.b32.xlu1 %v4931_v26, %s4046_s20  ;;  %v1119_v26 = vpop.permute.xlu0 %1118  ;;  %v1040_v44 = vadd.f32 %v1008_v6, %v844_v59  ;;  %1383 = vst.msk [vmem:[#allocation2 + $0x139] sm:$0xff] %vm1316_vm0, %v1308_v10  ;;  %v1274_v50 = vadd.f32 %v4679_v17, %v1235_v49  ;;  %v1204_v28 = vmul.f32 %v4638_v8, %v1143_v12  ;;  %v6449_v59 = vld [vmem:[#allocation12_spill] sm:$0xff]  ;;  %v6450_v10 = vld [vmem:[#allocation30_spill] sm:$0xff] }
 0x274   : > { %3948 = vmatprep.subr.bf16.mxu1 %v4021_v4  ;;  %v799_v1 = vmul.f32 %v4620_v40, %v6444_v24  ;;  %v801_v6 = vmul.f32 %v4620_v40, %v6445_v58  ;;  %v1739_v62 = vsel %vm1729_vm3, %v4921_v11, %v1738_v25  ;;  %v5186_v23 = vmul.f32 %v4628_v48, %v6446_v56  ;;  %v4024_v11 = vld [vmem:[%s6333_s5 + $0x28] sm:$0xff]   ;;  %v6452_v12 = vld [vmem:[#allocation32_spill] sm:$0xff]  ;;  %v6453_v25 = vld [vmem:[#allocation46_spill] sm:$0xff] }
 0x275   : > { %v798_v7 = vmul.f32 %v4620_v40, %v6447_v63  ;;  %v1306_v46 = vmax.f32 %v1274_v50, 0.0  ;;  %v1236_v52 = vadd.f32 %v1204_v28, %v1040_v44  ;;  %v5192_v15 = vmul.f32 %v4638_v8, %v1119_v26  ;;  %3787 = vmatpush3.bf16.msra.mxu0 %v4022_v20  ;;  %v4026_v50 = vld [vmem:[%s6333_s5 + $0x30] sm:$0xff]  }
 0x276   : > { %v848_v29 = vadd.f32 %v816_v51, %v4828_v0  ;;  %v1079_v22 = vpop.permute.xlu1 %1078  ;;  %v1024_v38 = vadd.f32 %v4740_v57, %v828_v54  ;;  %3956 = vmatpush3.bf16.msra.mxu1 %v4022_v20  ;;  %v1843_v33 = vpack.c.bf16 %v1739_v62, %v4983_v55  ;;  %3788 = vmatprep.subr.bf16.mxu0 %v4023_v16  ;;  %v4025_v57 = vld [vmem:[%s6333_s5 + $0x70] sm:$0xff]   ;;  %v6451_v51 = vld [vmem:[#allocation31_spill] sm:$0xff]  ;;  %v2339_v44 = vrot.slane %v5203_v27, 2  ;;  %v6455_v62 = vld [vmem:[#allocation21_spill] sm:$0xff] }
 0x277   : > { %1666 = vrot.lane.b32.xlu1 %v1633_v31, %s4047_s26  ;;  %1381 = vst.msk [vmem:[#allocation2 + $0x121] sm:$0xff] %vm1316_vm0, %v1306_v46  ;;  %v1275_v5 = vadd.f32 %v4679_v17, %v1236_v52  ;;  %v1188_v14 = vmul.f32 %v4638_v8, %v1079_v22  ;;  %3949 = vmatprep.subr.bf16.mxu1 %v4023_v16  ;;  %v6454_v58 = vld [vmem:[#allocation4_spill] sm:$0xff]  ;;  %v1743_v56 = vrot.slane %v6455_v62, 2  ;;  %v6457_v46 = vld [vmem:[#allocation50_spill] sm:$0xff] }
 0x278   : > { %v831_v0 = vadd.f32 %v799_v1, %v4812_v3  ;;  %v833_v4 = vadd.f32 %v801_v6, %v4835_v18  ;;  %v818_v60 = vmul.f32 %v4620_v40, %v6448_v43  ;;  %v5213_v41 = vadd.f32 %v4758_v45, %v829_v53  ;;  %v4027_v1 = vld [vmem:[%s6333_s5 + $0x78] sm:$0xff]   ;;  %v6456_v63 = vld [vmem:[#allocation48_spill] sm:$0xff] }
 0x279   : > { %v830_v55 = vadd.f32 %v798_v7, %v6449_v59  ;;  %v802_v49 = vmul.f32 %v4620_v40, %v6450_v10  ;;  %v1307_v54 = vmax.f32 %v1275_v5, 0.0  ;;  %v1220_v61 = vadd.f32 %v1188_v14, %v1024_v38  ;;  %3789 = vmatpush3.bf16.msra.mxu0 %v4024_v11  ;;  %v6458_v38 = vld [vmem:[#allocation20_spill] sm:$0xff]  ;;  %v6459_v14 = vld [vmem:[#allocation15_spill] sm:$0xff]  ;;  %v4028_v43 = vld [vmem:[%s6333_s5 + $0x38] sm:$0xff]  }
 0x27a   : > { %v804_v3 = vmul.f32 %v4620_v40, %v6451_v51  ;;  %v806_v18 = vmul.f32 %v4620_v40, %v6452_v12  ;;  %v1159_v31 = vpop.permute.xlu1 %1158  ;;  %v1044_v20 = vadd.f32 %v6453_v25, %v848_v29  ;;  %v1975_v45 = vld [vmem:[#allocation2 + $0x138] sm:$0xff]  ;;  %v1976_v26 = vld [vmem:[#allocation2 + $0x140] sm:$0xff]  ;;  %3957 = vmatpush3.bf16.msra.mxu1 %v4024_v11  ;;  %3790 = vmatprep.subr.bf16.mxu0 %v4025_v57 }
 0x27b   : > { %1876 = vrot.lane.b32.xlu1 %v1843_v33, %s4045_s19  ;;  %1382 = vst.msk [vmem:[#allocation2 + $0x129] sm:$0xff] %vm1316_vm0, %v1307_v54  ;;  %v1259_v28 = vadd.f32 %v4679_v17, %v1220_v61  ;;  %v1208_v16 = vmul.f32 %v4638_v8, %v1159_v31  ;;  %v2336_v53 = vrot.slane %v1975_v45, 2  ;;  %v5231_v24 = vrot.slane %v1976_v26, 2  ;;  %3950 = vmatprep.subr.bf16.mxu1 %v4025_v57  ;;  %v6460_v57 = vld [vmem:[#allocation42_spill] sm:$0xff]  ;;  %v5261_v59 = vld [vmem:[#allocation2 + $0x138] sm:$0xff] }
 0x27c   : > { %v850_v6 = vadd.f32 %v818_v60, %v6454_v58  ;;  %v5239_v7 = vadd.f32 %v6456_v63, %v831_v0  ;;  %v5242_v52 = vadd.f32 %v6457_v46, %v833_v4  ;;  %v5253_v33 = vadd.f32 %v802_v49, %v6459_v14  ;;  %v5263_v10 = vld [vmem:[#allocation2 + $0x140] sm:$0xff]  ;;  %v6461_v49 = vld [vmem:[#allocation43_spill] sm:$0xff] }
 0x27d   : > { %v1291_v29 = vmax.f32 %v1259_v28, 0.0  ;;  %v1240_v22 = vadd.f32 %v1208_v16, %v1044_v20  ;;  %v5248_v11 = vsel %vm1729_vm3, %v2336_v53, %v5231_v24  ;;  %v2340_v5 = vsel %vm1729_vm3, %v5231_v24, %v2339_v44  ;;  %3791 = vmatpush3.bf16.msra.mxu0 %v4026_v50  ;;  %v6462_v20 = vld [vmem:[#allocation19_spill] sm:$0xff]  ;;  %v2491_v28 = vld [vmem:[#allocation2 + $0x60] sm:$0xff] }
 0x27e   : > { %v820_v0 = vmul.f32 %v4620_v40, %v6460_v57  ;;  %v2400_v4 = vpack.c.bf16 %v2340_v5, %v5248_v11  ;;  %v2192_v60 = vrot.slane %v1975_v45, 1  ;;  %v5266_v54 = vadd.f32 %v804_v3, %v5143_v42  ;;  %3792 = vmatprep.subr.bf16.mxu0 %v4027_v1  ;;  %3958 = vmatpush3.bf16.msra.mxu1 %v4026_v50  ;;  %v1427_v25 = vld [vmem:[#allocation2 + $0x120] sm:$0xff]  ;;  %v6463_v16 = vld [vmem:[#allocation47_spill] sm:$0xff] }
 0x27f   : > { %2021 = vrot.lane.b32.xlu1 %v6458_v38, %s4046_s20  ;;  %v5269_v61 = vadd.f32 %v806_v18, %v6461_v49  ;;  %1366 = vst.msk [vmem:[#allocation2 + $0x69] sm:$0xff] %vm1316_vm0, %v1291_v29  ;;  %v1279_v51 = vadd.f32 %v4679_v17, %v1240_v22  ;;  %v891_v12 = vpop.permute.xlu1 %890  ;;  %v5276_v44 = vsel %vm1729_vm3, %v6462_v20, %v1743_v56  ;;  %v2195_v42 = vrot.slane %v5203_v27, 1  ;;  %v6464_v22 = vld [vmem:[#allocation5_spill] sm:$0xff] }
 0x280   : > { %v994_v31 = vmul.f32 %v4636_v37, %v891_v12  ;;  %v5279_v3 = vrot.slane %v1976_v26, 1  ;;  %3951 = vmatprep.subr.bf16.mxu1 %v4027_v1  ;;  %v5283_v53 = vadd.f32 %v6463_v16, %v850_v6  ;;  %v5285_v50 = vpack.c.bf16 %v1976_v26, %v1975_v45 }
 0x281   : > { %v1311_v18 = vmax.f32 %v1279_v51, 0.0  ;;  %v5290_v62 = vadd.f32 %v820_v0, %v5186_v23  ;;  %3793 = vmatpush3.bf16.msra.mxu0 %v4028_v43  ;;  %v1580_v26 = vrot.slane %v1427_v25, 1  ;;  %v1844_v23 = vpack.c.bf16 %v5276_v44, %v6464_v22  ;;  %v5307_v51 = vld [vmem:[#allocation2 + $0x58] sm:$0x3]  ;;  %v2521_v44 = vld [vmem:[#allocation2 + $0x150] sm:$0xff] }
 0x282   : > { %v1026_v56 = vadd.f32 %v994_v31, %v830_v55  ;;  %v1428_v27 = vld [vmem:[#allocation2 + $0x128] sm:$0xff]  ;;  %v1429_v63 = vld [vmem:[#allocation2 + $0x130] sm:$0x3]  ;;  %v5294_v1 = vsel %vm1519_vm4, %v2192_v60, %v5279_v3  ;;  %v2196_v6 = vsel %vm1519_vm4, %v5279_v3, %v2195_v42  ;;  %3959 = vmatpush3.bf16.msra.mxu1 %v4028_v43  ;;  %1468 = vst.msk [vmem:[#allocation3 + $0x138] sm:$0xff] %vm1316_vm0, %v5285_v50  ;;  %v2895_v5 = vrot.slane %v2491_v28, 2 }
 0x283   : > { %2444 = vrot.lane.b32.xlu1 %v2400_v4, %s4047_s26  ;;  %1386 = vst.msk [vmem:[#allocation2 + $0x159] sm:$0xff] %vm1316_vm0, %v1311_v18  ;;  %v967_v45 = vpop.permute.xlu1 %966  ;;  %v1581_v46 = vrot.slane %v1428_v27, 1  ;;  %v1583_v29 = vrot.slane %v1429_v63, 1  ;;  %v6465_v55 = vld [vmem:[#allocation39_spill] sm:$0xff]  ;;  %v2256_v14 = vpack.c.bf16 %v2196_v6, %v5294_v1  ;;  %v1451_v57 = vpack.c.bf16 %v1428_v27, %v1427_v25 }
 0x284   : > { %v1222_v38 = vadd.f32 %v6465_v55, %v1026_v56  ;;  %v1790_v60 = vrot.slane %v1427_v25, 2  ;;  %v1791_v49 = vrot.slane %v1428_v27, 2  ;;  %v1013_v43 = vmul.f32 %v4636_v37, %v967_v45 }
 0x285   : > { %v1582_v0 = vsel %vm1519_vm4, %v1580_v26, %v1581_v46  ;;  %v1584_v4 = vsel %vm1519_vm4, %v1581_v46, %v1583_v29  ;;  %v1793_v18 = vrot.slane %v1429_v63, 2  ;;  %2272 = vst.msk [vmem:[#allocation3 + $0x128] sm:$0xff] %vm1316_vm0, %v2256_v14  ;;  %1467 = vst.msk [vmem:[#allocation3 + $0x120] sm:$0xff] %vm1316_vm0, %v1451_v57  ;;  %v2687_v45 = vrot.slane %v2491_v28, 1  ;;  %v6466_v14 = vld [vmem:[#allocation17_spill] sm:$0xff] }
 0x286   : > { %v1261_v12 = vadd.f32 %v4679_v17, %v1222_v38  ;;  %v1644_v31 = vpack.c.bf16 %v1584_v4, %v1582_v0  ;;  %v2492_v20 = vld [vmem:[#allocation2 + $0x68] sm:$0xff]  ;;  %v2493_v42 = vld [vmem:[#allocation2 + $0x70] sm:$0x3]  ;;  %v1538_v29 = vrot.slane %v5307_v51, 1  ;;  %v2945_v55 = vrot.slane %v2521_v44, 2 }
 0x287   : > { %v5313_v16 = vpack.c.bf16 %v2492_v20, %v2491_v28  ;;  %v5315_v56 = vrot.slane %v2492_v20, 1  ;;  %v5317_v25 = vrot.slane %v2492_v20, 2  ;;  %v2690_v27 = vrot.slane %v2493_v42, 1 }
 0x288   : > { %v1293_v6 = vmax.f32 %v1261_v12, 0.0  ;;  %v1083_v26 = vpop.permute.xlu1 %1082  ;;  %1688 = vrot.lane.b32.xlu1 %v1644_v31, %s4047_s26  ;;  %v2898_v46 = vrot.slane %v2493_v42, 2  ;;  %v1792_v38 = vsel %vm1729_vm3, %v1790_v60, %v1791_v49  ;;  %v1045_v57 = vadd.f32 %v1013_v43, %v6466_v14  ;;  %v1950_v42 = vld [vmem:[#allocation2 + $0x70] sm:$0x3] }
 0x289   : > { %v1189_v63 = vmul.f32 %v4638_v8, %v1083_v26  ;;  %v5324_v22 = vsel %vm1729_vm3, %v2895_v5, %v5317_v25  ;;  %2569 = vrot.lane.b32.xlu0 %v5313_v16, %s4045_s19  ;;  %v5333_v0 = vsel %vm1519_vm4, %v2687_v45, %v5315_v56  ;;  %v1794_v5 = vsel %vm1729_vm3, %v1791_v49, %v1793_v18 }
 0x28a   : > { %1368 = vst.msk [vmem:[#allocation2 + $0x81] sm:$0xff] %vm1316_vm0, %v1293_v6  ;;  %v2522_v28 = vld [vmem:[#allocation2 + $0x158] sm:$0xff]  ;;  %v2899_v4 = vsel %vm1729_vm3, %v5317_v25, %v2898_v46  ;;  %v2523_v12 = vld [vmem:[#allocation2 + $0x160] sm:$0x3]  ;;  %v2691_v43 = vsel %vm1519_vm4, %v5315_v56, %v2690_v27  ;;  %v1748_v27 = vrot.slane %v5307_v51, 2  ;;  %1459 = vst.msk [vmem:[#allocation3 + $0x60] sm:$0xff] %vm1316_vm0, %v5313_v16 }
 0x28b   : > { %v1221_v31 = vadd.f32 %v1189_v63, %v5213_v41  ;;  %v5339_v20 = vpack.c.bf16 %v2522_v28, %v2521_v44  ;;  %v5341_v60 = vrot.slane %v2522_v28, 2  ;;  %v5345_v26 = vrot.slane %v2522_v28, 1 }
 0x28c   : > { %v1163_v6 = vpop.permute.xlu1 %1162  ;;  %v2999_v45 = vpack.c.bf16 %v2899_v4, %v5324_v22  ;;  %v2740_v14 = vrot.slane %v2523_v12, 1  ;;  %v2948_v46 = vrot.slane %v2523_v12, 2  ;;  %v2737_v63 = vrot.slane %v2521_v44, 1  ;;  %v1980_v44 = vld [vmem:[#allocation2 + $0x160] sm:$0x3] }
 0x28d   : > { %v1260_v49 = vadd.f32 %v4679_v17, %v1221_v31  ;;  %v1209_v18 = vmul.f32 %v4638_v8, %v1163_v6  ;;  %1878 = vrot.lane.b32.xlu0 %v1844_v23, %s4045_s19  ;;  %v5353_v41 = vsel %vm1729_vm3, %v2945_v55, %v5341_v60  ;;  %2589 = vrot.lane.b32.xlu1 %v5339_v20, %s4045_s19  ;;  %v2294_v4 = vrot.slane %v1950_v42, 2  ;;  %v1432_v6 = vld [vmem:[#allocation2 + $0x148] sm:$0x3] }
 0x28e   : > { %3015 = vst.msk [vmem:[#allocation3 + $0x40] sm:$0xff] %vm1316_vm0, %v2999_v45  ;;  %v1854_v28 = vpack.c.bf16 %v1794_v5, %v1792_v38  ;;  %v2949_v17 = vsel %vm1729_vm3, %v5341_v60, %v2948_v46  ;;  %v2791_v23 = vpack.c.bf16 %v2691_v43, %v5333_v0  ;;  %v5365_v35 = vsel %vm1519_vm4, %v2737_v63, %v5345_v26  ;;  %v5373_v38 = vld [vmem:[%s6332_s4] ss:$0 sm:$0xff]  ;;  %v6467_v43 = vld [vmem:[#allocation49_spill] sm:$0xff] }
 0x28f   : > { %v1292_v12 = vmax.f32 %v1260_v49, 0.0  ;;  %v1241_v31 = vadd.f32 %v1209_v18, %v1045_v57  ;;  %v3009_v55 = vpack.c.bf16 %v2949_v17, %v5353_v41  ;;  %v2741_v51 = vsel %vm1519_vm4, %v5345_v26, %v2740_v14  ;;  %1469 = vst.msk [vmem:[#allocation3 + $0x150] sm:$0xff] %vm1316_vm0, %v5339_v20 }
 0x290   : > { %v1167_v58 = vpop.permute.xlu1 %1166  ;;  %v5382_v45 = vadd.f32 %v6467_v43, %v5290_v62  ;;  %v2295_v14 = vsel %vm1729_vm3, %v5317_v25, %v2294_v4  ;;  %v1539_v46 = vsel %vm1519_vm4, %v5031_v32, %v1538_v29  ;;  %v1588_v49 = vrot.slane %v1432_v6, 1 }
 0x291   : > { %1367 = vst.msk [vmem:[#allocation2 + $0x79] sm:$0xff] %vm1316_vm0, %v1292_v12  ;;  %v1280_v57 = vadd.f32 %v5373_v38, %v1241_v31  ;;  %v1210_v5 = vmul.f32 %v4638_v8, %v1167_v58  ;;  %2825 = vrot.lane.b32.xlu0 %v2791_v23, %s4046_s20  ;;  %1898 = vrot.lane.b32.xlu1 %v1854_v28, %s4045_s19  ;;  %3025 = vst.msk [vmem:[#allocation3 + $0x130] sm:$0xff] %vm1316_vm0, %v3009_v55  ;;  %v2344_v17 = vrot.slane %v1980_v44, 2  ;;  %v5394_v12 = vld [vmem:[#allocation2 + $0x128] sm:$0xff] }
 0x292   : > { %v5390_v58 = vsel %vm1729_vm3, %v5034_v9, %v1748_v27  ;;  %v2801_v28 = vpack.c.bf16 %v2741_v51, %v5365_v35  ;;  %v1798_v62 = vrot.slane %v1432_v6, 2  ;;  %v1589_v9 = vsel %vm1519_vm4, %v5279_v3, %v1588_v49  ;;  %v6469_v51 = vld [vmem:[#allocation14_spill] sm:$0xff]  ;;  %v5515_v36 = vld [vmem:[#allocation2 + $0x88] sm:$0x3] }
 0x293   : > { %v1312_v18 = vmax.f32 %v1280_v57, 0.0  ;;  %v1242_v63 = vadd.f32 %v1210_v5, %v5283_v53  ;;  %v2150_v32 = vrot.slane %v1950_v42, 1  ;;  %v5403_v53 = vld [vmem:[#allocation2 + $0x120] sm:$0xff]  ;;  %v2391_v27 = vpack.c.bf16 %v2295_v14, %v5324_v22  ;;  %v2496_v14 = vld [vmem:[#allocation2 + $0x88] sm:$0x3] }
 0x294   : > { %v5409_v23 = vsel %vm1729_vm3, %v5231_v24, %v1798_v62  ;;  %v5413_v55 = vpack.c.bf16 %v5394_v12, %v5403_v53  ;;  %v2345_v3 = vsel %vm1729_vm3, %v5341_v60, %v2344_v17  ;;  %v2200_v49 = vrot.slane %v1980_v44, 1 }
 0x295   : > { %1387 = vst.msk [vmem:[#allocation2 + $0x169] sm:$0xff] %vm1316_vm0, %v1312_v18  ;;  %v1281_v4 = vadd.f32 %v5373_v38, %v1242_v63  ;;  %v899_v31 = vpop.permute.xlu1 %898  ;;  %2023 = vrot.lane.b32.xlu0 %v5037_v13, %s4046_s20  ;;  %2845 = vrot.lane.b32.xlu1 %v2801_v28, %s4046_s20  ;;  %v5415_v13 = vld [vmem:[#allocation2 + $0x148] sm:$0x3]  ;;  %v2151_v42 = vsel %vm1519_vm4, %v5315_v56, %v2150_v32 }
 0x296   : > { %v996_v29 = vmul.f32 %v4636_v37, %v899_v31  ;;  %6468 = vst [vmem:[#allocation7_spill] sm:$0xff] %v5413_v55  ;;  %v2247_v24 = vpack.c.bf16 %v2151_v42, %v5333_v0  ;;  %v1635_v63 = vpack.c.bf16 %v1539_v46, %v5041_v30  ;;  %v1845_v17 = vpack.c.bf16 %v5390_v58, %v5049_v47 }
 0x297   : > { %v1313_v6 = vmax.f32 %v1281_v4, 0.0  ;;  %v6470_v4 = vld [vmem:[#allocation16_spill] sm:$0xff]  ;;  %v2903_v46 = vrot.slane %v2496_v14, 2  ;;  %v2727_v42 = vrot.slane %v5403_v53, 1 }
 0x298   : > { %v1028_v57 = vadd.f32 %v996_v29, %v6469_v51  ;;  %v2494_v5 = vld [vmem:[#allocation2 + $0x78] sm:$0xff]  ;;  %v2495_v43 = vld [vmem:[#allocation2 + $0x80] sm:$0xff]  ;;  %2263 = vst.msk [vmem:[#allocation3 + $0x50] sm:$0xff] %vm1316_vm0, %v2247_v24  ;;  %v2401_v29 = vpack.c.bf16 %v2345_v3, %v5353_v41 }
 0x299   : > { %1388 = vst.msk [vmem:[#allocation2 + $0x171] sm:$0xff] %vm1316_vm0, %v1313_v6  ;;  %v975_v18 = vpop.permute.xlu1 %974  ;;  %2426 = vrot.lane.b32.xlu0 %v2391_v27, %s4047_s26  ;;  %2043 = vrot.lane.b32.xlu1 %v5285_v50, %s4046_s20  ;;  %v2900_v28 = vrot.slane %v2494_v5, 2  ;;  %v5432_v32 = vrot.slane %v2495_v43, 2  ;;  %v1645_v50 = vpack.c.bf16 %v1589_v9, %v5294_v1  ;;  %v5445_v27 = vld [vmem:[#allocation2 + $0x70] sm:$0x3]  ;;  %v2201_v6 = vsel %vm1519_vm4, %v5345_v26, %v2200_v49 }
 0x29a   : > { %v1224_v31 = vadd.f32 %v6470_v4, %v1028_v57  ;;  %v2692_v1 = vrot.slane %v2494_v5, 1  ;;  %v5451_v9 = vrot.slane %v2495_v43, 1  ;;  %v1015_v57 = vmul.f32 %v4636_v37, %v975_v18 }
 0x29b   : > { %v5443_v58 = vsel %vm1729_vm3, %v2900_v28, %v5432_v32  ;;  %v2904_v3 = vsel %vm1729_vm3, %v5432_v32, %v2903_v46  ;;  %v2257_v44 = vpack.c.bf16 %v2201_v6, %v5365_v35  ;;  %v5464_v46 = vld [vmem:[#allocation2 + $0x130] sm:$0x3]  ;;  %v2695_v18 = vrot.slane %v2496_v14, 1 }
 0x29c   : > { %v1263_v47 = vadd.f32 %v5373_v38, %v1224_v31  ;;  %v2524_v28 = vld [vmem:[#allocation2 + $0x168] sm:$0xff]  ;;  %v3000_v4 = vpack.c.bf16 %v2904_v3, %v5443_v58  ;;  %v5460_v31 = vpack.c.bf16 %v2495_v43, %v2494_v5  ;;  %v5469_v3 = vrot.slane %v5394_v12, 1 }
 0x29d   : > { %1670 = vrot.lane.b32.xlu0 %v1635_v63, %s4047_s26  ;;  %2446 = vrot.lane.b32.xlu1 %v2401_v29, %s4047_s26  ;;  %v1543_v29 = vrot.slane %v5445_v27, 1  ;;  %v2950_v5 = vrot.slane %v2524_v28, 2  ;;  %v5479_v6 = vsel %vm1519_vm4, %v2692_v1, %v5451_v9  ;;  %2273 = vst.msk [vmem:[#allocation3 + $0x140] sm:$0xff] %vm1316_vm0, %v2257_v44  ;;  %v1047_v14 = vadd.f32 %v1015_v57, %v5139_v34 }
 0x29e   : > { %v1295_v51 = vmax.f32 %v1263_v47, 0.0  ;;  %v1091_v24 = vpop.permute.xlu1 %1090  ;;  %3016 = vst.msk [vmem:[#allocation3 + $0x58] sm:$0xff] %vm1316_vm0, %v3000_v4  ;;  %v5504_v30 = vsel %vm1519_vm4, %v2727_v42, %v5469_v3  ;;  %v5517_v42 = vld [vmem:[#allocation2 + $0x160] sm:$0x3]  ;;  %1460 = vst.msk [vmem:[#allocation3 + $0x78] sm:$0xff] %vm1316_vm0, %v5460_v31 }
 0x29f   : > { %v1191_v63 = vmul.f32 %v4638_v8, %v1091_v24 }
 0x2a0   : > { %1370 = vst.msk [vmem:[#allocation2 + $0x99] sm:$0xff] %vm1316_vm0, %v1295_v51  ;;  %v2525_v47 = vld [vmem:[#allocation2 + $0x170] sm:$0xff]  ;;  %v2526_v62 = vld [vmem:[#allocation2 + $0x178] sm:$0x3] }
 0x2a1   : > { %v1223_v24 = vadd.f32 %v1191_v63, %v5239_v7  ;;  %1690 = vrot.lane.b32.xlu1 %v1645_v50, %s4047_s26  ;;  %2571 = vrot.lane.b32.xlu0 %v5460_v31, %s4045_s19  ;;  %v5475_v43 = vrot.slane %v2525_v47, 2  ;;  %v2696_v7 = vsel %vm1519_vm4, %v5451_v9, %v2695_v18  ;;  %v2953_v4 = vrot.slane %v2526_v62, 2 }
 0x2a2   : > { %v1171_v51 = vpop.permute.xlu1 %1170  ;;  %v2730_v50 = vrot.slane %v5464_v46, 1  ;;  %v5492_v44 = vpack.c.bf16 %v2525_v47, %v2524_v28  ;;  %v5498_v57 = vrot.slane %v2525_v47, 1  ;;  %v2745_v18 = vrot.slane %v2526_v62, 1 }
 0x2a3   : > { %v1262_v1 = vadd.f32 %v5373_v38, %v1223_v24  ;;  %v1211_v63 = vmul.f32 %v4638_v8, %v1171_v51  ;;  %v5496_v34 = vsel %vm1729_vm3, %v2950_v5, %v5475_v43  ;;  %v2954_v49 = vsel %vm1729_vm3, %v5475_v43, %v2953_v4 }
 0x2a4   : > { %v3010_v5 = vpack.c.bf16 %v2954_v49, %v5496_v34  ;;  %v5512_v47 = vsel %vm1519_vm4, %v5315_v56, %v1543_v29  ;;  %v2742_v62 = vrot.slane %v2524_v28, 1  ;;  %v2792_v4 = vpack.c.bf16 %v2696_v7, %v5479_v6  ;;  %v5530_v49 = vld [vmem:[#allocation2 + $0x130] sm:$0x3]  ;;  %v5538_v7 = vld [vmem:[#allocation2 + $0x178] sm:$0x3]  ;;  %1470 = vst.msk [vmem:[#allocation3 + $0x168] sm:$0xff] %vm1316_vm0, %v5492_v44 }
 0x2a5   : > { %v1294_v55 = vmax.f32 %v1262_v1, 0.0  ;;  %v1243_v24 = vadd.f32 %v1211_v63, %v1047_v14  ;;  %2591 = vrot.lane.b32.xlu1 %v5492_v44, %s4045_s19  ;;  %1880 = vrot.lane.b32.xlu0 %v1845_v17, %s4045_s19  ;;  %v2936_v14 = vrot.slane %v5394_v12, 2  ;;  %v5522_v1 = vsel %vm1519_vm4, %v5469_v3, %v2730_v50 }
 0x2a6   : > { %v1175_v51 = vpop.permute.xlu1 %1174  ;;  %6471 = vst [vmem:[#allocation37_spill] sm:$0xff] %v5522_v1  ;;  %3026 = vst.msk [vmem:[#allocation3 + $0x148] sm:$0xff] %vm1316_vm0, %v3010_v5  ;;  %v5534_v12 = vsel %vm1519_vm4, %v2742_v62, %v5498_v57  ;;  %v2746_v29 = vsel %vm1519_vm4, %v5498_v57, %v2745_v18  ;;  %v2732_v50 = vrot.slane %v5261_v59, 1  ;;  %v6472_v5 = vpack.c.bf16 %v5409_v23, %v5248_v11 }
 0x2a7   : > { %1369 = vst.msk [vmem:[#allocation2 + $0x91] sm:$0xff] %vm1316_vm0, %v1294_v55  ;;  %v1282_v17 = vadd.f32 %v5373_v38, %v1243_v24  ;;  %v1212_v56 = vmul.f32 %v4638_v8, %v1175_v51  ;;  %v2299_v62 = vrot.slane %v5515_v36, 2  ;;  %v1593_v18 = vrot.slane %v5517_v42, 1 }
 0x2a8   : > { %v6473_v51 = vrot.slane %v5403_v53, 2  ;;  %v2733_v11 = vrot.slane %v5263_v10, 1  ;;  %v2349_v53 = vrot.slane %v5538_v7, 2 }
 0x2a9   : > { %v1314_v63 = vmax.f32 %v1282_v17, 0.0  ;;  %v1244_v24 = vadd.f32 %v1212_v56, %v5382_v45  ;;  %1900 = vrot.lane.b32.xlu1 %v6472_v5, %s4045_s19  ;;  %2827 = vrot.lane.b32.xlu0 %v2792_v4, %s4046_s20  ;;  %v2938_v45 = vrot.slane %v5464_v46, 2  ;;  %v2334_v56 = vrot.slane %v5530_v49, 2 }
 0x2aa   : > { %v5556_v17 = vsel %vm1729_vm3, %v6473_v51, %v2936_v14  ;;  %v2802_v5 = vpack.c.bf16 %v2746_v29, %v5534_v12  ;;  %v2300_v28 = vsel %vm1729_vm3, %v5432_v32, %v2299_v62  ;;  %v1753_v46 = vrot.slane %v5445_v27, 2 }
 0x2ab   : > { %1389 = vst.msk [vmem:[#allocation2 + $0x181] sm:$0xff] %vm1316_vm0, %v1314_v63  ;;  %v1283_v23 = vadd.f32 %v5373_v38, %v1244_v24  ;;  %v907_v4 = vpop.permute.xlu1 %906  ;;  %v2939_v55 = vsel %vm1729_vm3, %v2936_v14, %v2938_v45  ;;  %v5571_v1 = vsel %vm1729_vm3, %v2936_v14, %v2334_v56  ;;  %v1803_v29 = vrot.slane %v5517_v42, 2  ;;  %v5577_v24 = vld [vmem:[#allocation2 + $0xa0] sm:$0x3] }
 0x2ac   : > { %v998_v51 = vmul.f32 %v4636_v37, %v907_v4  ;;  %v3007_v62 = vpack.c.bf16 %v2939_v55, %v5556_v17  ;;  %v2392_v14 = vpack.c.bf16 %v2300_v28, %v5443_v58  ;;  %v1594_v56 = vsel %vm1519_vm4, %v5345_v26, %v1593_v18 }
 0x2ad   : > { %v1315_v63 = vmax.f32 %v1283_v23, 0.0  ;;  %2847 = vrot.lane.b32.xlu1 %v2802_v5, %s4046_s20  ;;  %2025 = vrot.lane.b32.xlu0 %v5313_v16, %s4046_s20  ;;  %v5587_v16 = vsel %vm1519_vm4, %v2732_v50, %v2733_v11  ;;  %v2350_v42 = vsel %vm1729_vm3, %v5475_v43, %v2349_v53  ;;  %v6475_v5 = vld [vmem:[#allocation18_spill] sm:$0xff]  ;;  %v2908_v26 = vrot.slane %v5577_v24, 2 }
 0x2ae   : > { %v1030_v45 = vadd.f32 %v998_v51, %v5253_v33  ;;  %v2497_v23 = vld [vmem:[#allocation2 + $0x90] sm:$0xff]  ;;  %v2498_v4 = vld [vmem:[#allocation2 + $0x98] sm:$0xff]  ;;  %6474 = vst [vmem:[#allocation25_spill] sm:$0xff] %v5587_v16  ;;  %3023 = vst.msk [vmem:[#allocation3 + $0x100] sm:$0xff] %vm1316_vm0, %v3007_v62  ;;  %v6476_v18 = vrot.slane %v5415_v13, 1  ;;  %v1646_v53 = vpack.c.bf16 %v1594_v56, %v5365_v35  ;;  %v1754_v62 = vsel %vm1729_vm3, %v5317_v25, %v1753_v46 }
 0x2af   : > { %1390 = vst.msk [vmem:[#allocation2 + $0x189] sm:$0xff] %vm1316_vm0, %v1315_v63  ;;  %v2905_v55 = vrot.slane %v2497_v23, 2  ;;  %v5594_v28 = vrot.slane %v2498_v4, 2  ;;  %v2402_v27 = vpack.c.bf16 %v2350_v42, %v5496_v34  ;;  %v1846_v56 = vpack.c.bf16 %v1754_v62, %v5324_v22 }
 0x2b0   : > { %v1226_v33 = vadd.f32 %v6475_v5, %v1030_v45  ;;  %v1099_v51 = vpop.permute.xlu1 %1098  ;;  %v5600_v50 = vsel %vm1519_vm4, %v2733_v11, %v6476_v18  ;;  %v2155_v45 = vrot.slane %v5515_v36, 1  ;;  %v2940_v42 = vrot.slane %v5261_v59, 2 }
 0x2b1   : > { %v1193_v63 = vmul.f32 %v4638_v8, %v1099_v51  ;;  %2045 = vrot.lane.b32.xlu1 %v5339_v20, %s4046_s20  ;;  %2428 = vrot.lane.b32.xlu0 %v2392_v14, %s4047_s26  ;;  %v5614_v11 = vsel %vm1729_vm3, %v2905_v55, %v5594_v28  ;;  %v2909_v20 = vsel %vm1729_vm3, %v5594_v28, %v2908_v26  ;;  %v2941_v55 = vrot.slane %v5263_v10, 2 }
 0x2b2   : > { %v1265_v5 = vadd.f32 %v5373_v38, %v1226_v33  ;;  %v3001_v35 = vpack.c.bf16 %v2909_v20, %v5614_v11  ;;  %v2156_v25 = vsel %vm1519_vm4, %v5451_v9, %v2155_v45  ;;  %v5622_v36 = vld [vmem:[#allocation2 + $0x180] sm:$0xff]  ;;  %v2697_v26 = vrot.slane %v2497_v23, 1 }
 0x2b3   : > { %v1225_v14 = vadd.f32 %v1193_v63, %v5242_v52  ;;  %v6477_v52 = vpack.c.bf16 %v5512_v47, %v5333_v0  ;;  %v5633_v18 = vrot.slane %v2498_v4, 1  ;;  %v1804_v22 = vsel %vm1729_vm3, %v5341_v60, %v1803_v29 }
 0x2b4   : > { %v1297_v46 = vmax.f32 %v1265_v5, 0.0  ;;  %3017 = vst.msk [vmem:[#allocation3 + $0x70] sm:$0xff] %vm1316_vm0, %v3001_v35  ;;  %v2248_v5 = vpack.c.bf16 %v2156_v25, %v5479_v6  ;;  %v5644_v20 = vpack.c.bf16 %v2498_v4, %v2497_v23  ;;  %v2955_v60 = vrot.slane %v5622_v36, 2 }
 0x2b5   : > { %v1264_v33 = vadd.f32 %v5373_v38, %v1225_v14  ;;  %v911_v51 = vpop.permute.xlu1 %910  ;;  %2448 = vrot.lane.b32.xlu1 %v2402_v27, %s4047_s26  ;;  %1672 = vrot.lane.b32.xlu0 %v6477_v52, %s4047_s26  ;;  %v2700_v27 = vrot.slane %v5577_v24, 1  ;;  %v6478_v14 = vld [vmem:[#allocation41_spill] sm:$0xff]  ;;  %v5662_v4 = vsel %vm1519_vm4, %v2697_v26, %v5633_v18  ;;  %v6479_v25 = vrot.slane %v5415_v13, 2  ;;  %v1956_v13 = vld [vmem:[#allocation2 + $0xa0] sm:$0x3] }
 0x2b6   : > { %1372 = vst.msk [vmem:[#allocation2 + $0xb1] sm:$0xff] %vm1316_vm0, %v1297_v46  ;;  %v999_v63 = vmul.f32 %v4636_v37, %v911_v51  ;;  %v2528_v62 = vld [vmem:[#allocation2 + $0x188] sm:$0xff]  ;;  %v2529_v45 = vld [vmem:[#allocation2 + $0x190] sm:$0x3]  ;;  %v2942_v51 = vsel %vm1729_vm3, %v2940_v42, %v2941_v55  ;;  %2264 = vst.msk [vmem:[#allocation3 + $0x68] sm:$0xff] %vm1316_vm0, %v2248_v5 }
 0x2b7   : > { %v1296_v47 = vmax.f32 %v1264_v33, 0.0  ;;  %v5647_v29 = vrot.slane %v2528_v62, 2  ;;  %v2958_v46 = vrot.slane %v2529_v45, 2  ;;  %v2944_v42 = vsel %vm1729_vm3, %v2941_v55, %v6479_v25  ;;  %1461 = vst.msk [vmem:[#allocation3 + $0x90] sm:$0xff] %vm1316_vm0, %v5644_v20 }
 0x2b8   : > { %v1031_v35 = vadd.f32 %v999_v63, %v6478_v14  ;;  %v2205_v33 = vrot.slane %v5538_v7, 1  ;;  %v5679_v7 = vrot.slane %v2528_v62, 1 }
 0x2b9   : > { %1371 = vst.msk [vmem:[#allocation2 + $0xa9] sm:$0xff] %vm1316_vm0, %v1296_v47  ;;  %v915_v24 = vpop.permute.xlu1 %914  ;;  %1692 = vrot.lane.b32.xlu1 %v1646_v53, %s4047_s26  ;;  %2573 = vrot.lane.b32.xlu0 %v5644_v20, %s4045_s19  ;;  %v5658_v23 = vsel %vm1729_vm3, %v2955_v60, %v5647_v29  ;;  %v2701_v53 = vsel %vm1519_vm4, %v5633_v18, %v2700_v27 }
 0x2ba   : > { %v1227_v52 = vadd.f32 %v5150_v19, %v1031_v35  ;;  %v2959_v63 = vsel %vm1729_vm3, %v5647_v29, %v2958_v46  ;;  %v1000_v5 = vmul.f32 %v4636_v37, %v915_v24  ;;  %v5675_v47 = vpack.c.bf16 %v2528_v62, %v5622_v36 }
 0x2bb   : > { %v3011_v26 = vpack.c.bf16 %v2959_v63, %v5658_v23  ;;  %v3008_v60 = vpack.c.bf16 %v2944_v42, %v2942_v51  ;;  %v2750_v19 = vrot.slane %v2529_v45, 1  ;;  %v2206_v27 = vsel %vm1519_vm4, %v5498_v57, %v2205_v33  ;;  %v5690_v45 = vld [vmem:[#allocation2 + $0x88] sm:$0x3]  ;;  %v1986_v42 = vld [vmem:[#allocation2 + $0x190] sm:$0x3] }
 0x2bc   : > { %v1266_v55 = vadd.f32 %v5373_v38, %v1227_v52  ;;  %v2747_v35 = vrot.slane %v5622_v36, 1  ;;  %v1856_v62 = vpack.c.bf16 %v1804_v22, %v5353_v41  ;;  %v2304_v51 = vrot.slane %v1956_v13, 2 }
 0x2bd   : > { %2593 = vrot.lane.b32.xlu1 %v5675_v47, %s4045_s19  ;;  %1882 = vrot.lane.b32.xlu0 %v1846_v56, %s4045_s19  ;;  %3027 = vst.msk [vmem:[#allocation3 + $0x160] sm:$0xff] %vm1316_vm0, %v3011_v26  ;;  %3024 = vst.msk [vmem:[#allocation3 + $0x118] sm:$0xff] %vm1316_vm0, %v3008_v60  ;;  %v1032_v24 = vadd.f32 %v1000_v5, %v5266_v54  ;;  %v2793_v25 = vpack.c.bf16 %v2701_v53, %v5662_v4  ;;  %v5695_v52 = vld [vmem:[#allocation2 + $0xb8] sm:$0x3]  ;;  %v1123_v53 = vpop.permute.xlu0 %1122  ;;  %v1548_v26 = vrot.slane %v5690_v45, 1 }
 0x2be   : > { %v1298_v14 = vmax.f32 %v1266_v55, 0.0  ;;  %v1111_v46 = vpop.permute.xlu1 %1110  ;;  %v2258_v33 = vpack.c.bf16 %v2206_v27, %v5534_v12  ;;  %v5705_v54 = vsel %vm1519_vm4, %v2747_v35, %v5679_v7  ;;  %v2751_v41 = vsel %vm1519_vm4, %v5679_v7, %v2750_v19  ;;  %v5714_v60 = vld [vmem:[#allocation2 + $0x178] sm:$0x3] }
 0x2bf   : > { %v1196_v56 = vmul.f32 %v4638_v8, %v1111_v46  ;;  %v2305_v5 = vsel %vm1729_vm3, %v5594_v28, %v2304_v51  ;;  %v2160_v55 = vrot.slane %v1956_v13, 1  ;;  %v2354_v27 = vrot.slane %v1986_v42, 2 }
 0x2c0   : > { %1373 = vst.msk [vmem:[#allocation2 + $0xc1] sm:$0xff] %vm1316_vm0, %v1298_v14  ;;  %v2500_v36 = vld [vmem:[#allocation2 + $0xa8] sm:$0xff]  ;;  %v2501_v22 = vld [vmem:[#allocation2 + $0xb0] sm:$0xff]  ;;  %2274 = vst.msk [vmem:[#allocation3 + $0x158] sm:$0xff] %vm1316_vm0, %v2258_v33  ;;  %v2913_v35 = vrot.slane %v5695_v52, 2 }
 0x2c1   : > { %v1228_v63 = vadd.f32 %v1196_v56, %v1032_v24  ;;  %1902 = vrot.lane.b32.xlu1 %v1856_v62, %s4045_s19  ;;  %2829 = vrot.lane.b32.xlu0 %v2793_v25, %s4046_s20  ;;  %v2910_v19 = vrot.slane %v2500_v36, 2  ;;  %v5717_v14 = vrot.slane %v2501_v22, 2  ;;  %v2803_v24 = vpack.c.bf16 %v2751_v41, %v5705_v54  ;;  %v5746_v16 = vpop.permute.xlu0 %1134 }
 0x2c2   : > { %v2161_v51 = vsel %vm1519_vm4, %v5633_v18, %v2160_v55  ;;  %v1598_v25 = vrot.slane %v5714_v60, 1  ;;  %v1549_v41 = vsel %vm1519_vm4, %v5451_v9, %v1548_v26  ;;  %v2210_v9 = vrot.slane %v1986_v42, 1 }
 0x2c3   : > { %v1267_v46 = vadd.f32 %v5373_v38, %v1228_v63  ;;  %v923_v62 = vpop.permute.xlu1 %922  ;;  %v5728_v13 = vsel %vm1729_vm3, %v2910_v19, %v5717_v14  ;;  %v2914_v33 = vsel %vm1729_vm3, %v5717_v14, %v2913_v35  ;;  %v1758_v63 = vrot.slane %v5690_v45, 2 }
 0x2c4   : > { %v1002_v56 = vmul.f32 %v4636_v37, %v923_v62  ;;  %v3002_v55 = vpack.c.bf16 %v2914_v33, %v5728_v13  ;;  %v2393_v19 = vpack.c.bf16 %v2305_v5, %v5614_v11  ;;  %v2355_v35 = vsel %vm1729_vm3, %v5647_v29, %v2354_v27 }
 0x2c5   : > { %v1299_v0 = vmax.f32 %v1267_v46, 0.0  ;;  %2849 = vrot.lane.b32.xlu1 %v2803_v24, %s4046_s20  ;;  %2027 = vrot.lane.b32.xlu0 %v5460_v31, %s4046_s20  ;;  %v5743_v46 = vld [vmem:[#allocation2 + $0xb8] sm:$0x3]  ;;  %v2249_v24 = vpack.c.bf16 %v2161_v51, %v5662_v4  ;;  %v2162_v31 = vrot.slane %v2500_v36, 1  ;;  %v1637_v5 = vpack.c.bf16 %v1549_v41, %v5479_v6 }
 0x2c6   : > { %v1034_v62 = vadd.f32 %v1002_v56, %v5269_v61  ;;  %3018 = vst.msk [vmem:[#allocation3 + $0x88] sm:$0xff] %vm1316_vm0, %v3002_v55  ;;  %v1599_v29 = vsel %vm1519_vm4, %v5498_v57, %v1598_v25  ;;  %v5755_v26 = vrot.slane %v2501_v22, 1  ;;  %v2403_v57 = vpack.c.bf16 %v2355_v35, %v5658_v23  ;;  %v6480_v56 = vld [vmem:[#allocation13_spill] sm:$0xff]  ;;  %v6481_v55 = vld [vmem:[#allocation10_spill] sm:$0xff] }
 0x2c7   : > { %1374 = vst.msk [vmem:[#allocation2 + $0xc9] sm:$0xff] %vm1316_vm0, %v1299_v0  ;;  %2265 = vst.msk [vmem:[#allocation3 + $0x80] sm:$0xff] %vm1316_vm0, %v2249_v24  ;;  %v2165_v0 = vrot.slane %v5743_v46, 1  ;;  %v2190_v41 = vrot.slane %v5530_v49, 1  ;;  %v645_v23 = vmul.f32 %v4628_v48, %v6481_v55  ;;  %v1759_v49 = vsel %vm1729_vm3, %v5432_v32, %v1758_v63  ;;  %v6485_v55 = vld [vmem:[#allocation44_spill] sm:$0xff] }
 0x2c8   : > { %v1230_v45 = vadd.f32 %v5192_v15, %v1034_v62  ;;  %v1115_v61 = vpop.permute.xlu1 %1114  ;;  %v2211_v15 = vsel %vm1519_vm4, %v5679_v7, %v2210_v9  ;;  %v5769_v51 = vsel %vm1519_vm4, %v2162_v31, %v5755_v26  ;;  %v5776_v7 = vpack.c.bf16 %v2501_v22, %v2500_v36 }
 0x2c9   : > { %v1197_v27 = vmul.f32 %v4638_v8, %v1115_v61  ;;  %2047 = vrot.lane.b32.xlu1 %v5492_v44, %s4046_s20  ;;  %2430 = vrot.lane.b32.xlu0 %v2393_v19, %s4047_s26  ;;  %v2259_v42 = vpack.c.bf16 %v2211_v15, %v5705_v54  ;;  %v2166_v33 = vsel %vm1519_vm4, %v5755_v26, %v2165_v0  ;;  %v5782_v19 = vld [vmem:[#allocation2 + $0xc0] sm:$0xff]  ;;  %v1808_v31 = vrot.slane %v5714_v60, 2  ;;  %v6482_v15 = vld [vmem:[#allocation45_spill] sm:$0xff] }
 0x2ca   : > { %v1269_v6 = vadd.f32 %v5373_v38, %v1230_v45  ;;  %v1199_v54 = vmul.f32 %v4638_v8, %v1123_v53  ;;  %v2250_v35 = vpack.c.bf16 %v2166_v33, %v5769_v51  ;;  %1462 = vst.msk [vmem:[#allocation3 + $0xa8] sm:$0xff] %vm1316_vm0, %v5776_v7  ;;  %v2191_v36 = vsel %vm1519_vm4, %v5469_v3, %v2190_v41  ;;  %v6483_v60 = vld [vmem:[#allocation33_spill] sm:$0xff] }
 0x2cb   : > { %v1229_v25 = vadd.f32 %v1197_v27, %v6480_v56  ;;  %v5772_v44 = vpop.permute.xlu0 %2565  ;;  %2275 = vst.msk [vmem:[#allocation3 + $0x170] sm:$0xff] %vm1316_vm0, %v2259_v42  ;;  %v1647_v53 = vpack.c.bf16 %v1599_v29, %v5534_v12  ;;  %v2255_v32 = vpack.c.bf16 %v2191_v36, %v5504_v30  ;;  %v2915_v3 = vrot.slane %v5782_v19, 2  ;;  %v6484_v42 = vld [vmem:[#allocation9_spill] sm:$0xff] }
 0x2cc   : > { %v1301_v62 = vmax.f32 %v1269_v6, 0.0  ;;  %2266 = vst.msk [vmem:[#allocation3 + $0x98] sm:$0xff] %vm1316_vm0, %v2250_v35  ;;  %v808_v29 = vmul.f32 %v4620_v40, %v6483_v60  ;;  %v644_v56 = vmul.f32 %v4628_v48, %v6484_v42  ;;  %v2705_v33 = vrot.slane %v5695_v52, 1 }
 0x2cd   : > { %v1268_v24 = vadd.f32 %v5373_v38, %v1229_v25  ;;  %v927_v9 = vpop.permute.xlu1 %926  ;;  %2450 = vrot.lane.b32.xlu1 %v2403_v57, %s4047_s26  ;;  %1674 = vrot.lane.b32.xlu0 %v1637_v5, %s4047_s26  ;;  %2271 = vst.msk [vmem:[#allocation3 + $0x110] sm:$0xff] %vm1316_vm0, %v2255_v32  ;;  %v1809_v52 = vsel %vm1729_vm3, %v5475_v43, %v1808_v31  ;;  %v6488_v31 = vld [vmem:[#allocation35_spill] sm:$0xff] }
 0x2ce   : > { %1376 = vst.msk [vmem:[#allocation2 + $0xe1] sm:$0xff] %vm1316_vm0, %v1301_v62  ;;  %v1003_v22 = vmul.f32 %v4636_v37, %v927_v9  ;;  %v2504_v45 = vld [vmem:[#allocation2 + $0xc8] sm:$0xff]  ;;  %v5799_v61 = vld [vmem:[#allocation2 + $0xd0] sm:$0x3]  ;;  %v5827_v62 = vadd.f32 %v6485_v55, %v645_v23  ;;  %v1847_v9 = vpack.c.bf16 %v1759_v49, %v5443_v58  ;;  %v840_v32 = vadd.f32 %v808_v29, %v644_v56 }
 0x2cf   : > { %v1300_v63 = vmax.f32 %v1268_v24, 0.0  ;;  %v5803_v5 = vpop.permute.xlu0 %2821  ;;  %v5806_v27 = vrot.slane %v2504_v45, 2  ;;  %v2918_v12 = vrot.slane %v5799_v61, 2  ;;  %v6487_v58 = vpack.c.bf16 %v4976_v21, %v4974_v2  ;;  %v5846_v49 = vld [vmem:[#allocation2 + $0xd0] sm:$0x3] }
 0x2d0   : > { %v1035_v0 = vadd.f32 %v1003_v22, %v6482_v15  ;;  %v5849_v43 = vpack.c.bf16 %v2504_v45, %v5782_v19  ;;  %v1857_v60 = vpack.c.bf16 %v1809_v52, %v5496_v34  ;;  %v1202_v42 = vmul.f32 %v4638_v8, %v5746_v16  ;;  %v5872_v34 = vld [vmem:[%s6333_s5 + $0x80] sm:$0xff]  }
 0x2d1   : > { %1375 = vst.msk [vmem:[#allocation2 + $0xd9] sm:$0xff] %vm1316_vm0, %v1300_v63  ;;  %v931_v6 = vpop.permute.xlu1 %930  ;;  %1694 = vrot.lane.b32.xlu1 %v1647_v53, %s4047_s26  ;;  %2575 = vrot.lane.b32.xlu0 %v5776_v7, %s4045_s19  ;;  %v5819_v57 = vsel %vm1729_vm3, %v2915_v3, %v5806_v27  ;;  %v2919_v41 = vsel %vm1729_vm3, %v5806_v27, %v2918_v12  ;;  %v6486_v53 = vld [vmem:[#allocation11_spill] sm:$0xff]  ;;  %v1411_v16 = vld [vmem:[#allocation2 + $0xa0] sm:$0x3] }
 0x2d2   : > { %v1231_v25 = vadd.f32 %v1199_v54, %v1035_v0  ;;  %v1004_v35 = vmul.f32 %v4636_v37, %v931_v6  ;;  %v3003_v36 = vpack.c.bf16 %v2919_v41, %v5819_v57  ;;  %v2706_v54 = vsel %vm1519_vm4, %v5755_v26, %v2705_v33  ;;  %1463 = vst.msk [vmem:[#allocation3 + $0xc0] sm:$0xff] %vm1316_vm0, %v5849_v43 }
 0x2d3   : > { %v2423_v24 = vpop.permute.xlu0 %2422  ;;  %v646_v23 = vmul.f32 %v4628_v48, %v6486_v53  ;;  %v5853_v63 = vmul.f32 %v4636_v37, %v6488_v31  ;;  %v6489_v48 = vld [vmem:[#allocation34_spill] sm:$0xff]  ;;  %v2794_v29 = vpack.c.bf16 %v2706_v54, %v5769_v51  ;;  %v5874_v33 = vrot.slane %v2504_v45, 1  ;;  %3908 = vmatprep.subr.bf16.mxu1 %v5872_v34 }
 0x2d4   : > { %v1270_v22 = vadd.f32 %v5373_v38, %v1231_v25  ;;  %2469 = vst.msk [vmem:[#allocation3 + $0x20] sm:$0xff] %vm1712_vm5, %v2423_v24  ;;  %v810_v3 = vmul.f32 %v4620_v40, %v6489_v48  ;;  %v1036_v21 = vadd.f32 %v1004_v35, %v840_v32  ;;  %v2309_v40 = vrot.slane %v5743_v46, 2 }
 0x2d5   : > { %2595 = vrot.lane.b32.xlu1 %v6487_v58, %s4045_s19  ;;  %1884 = vrot.lane.b32.xlu0 %v1847_v9, %s4045_s19  ;;  %3019 = vst.msk [vmem:[#allocation3 + $0xa0] sm:$0xff] %vm1316_vm0, %v3003_v36  ;;  %v5860_v6 = vld [vmem:[#allocation2 + $0xe8] sm:$0x3]  ;;  %v2170_v41 = vrot.slane %v5846_v49, 1  ;;  %v2167_v46 = vrot.slane %v5782_v19, 1  ;;  %v1553_v48 = vrot.slane %v1411_v16, 1 }
 0x2d6   : > { %v1302_v15 = vmax.f32 %v1270_v22, 0.0  ;;  %v1127_v2 = vpop.permute.xlu1 %1126  ;;  %v842_v9 = vadd.f32 %v810_v3, %v646_v23  ;;  %v2923_v45 = vrot.slane %v5860_v6, 2  ;;  %v5885_v52 = vld [vmem:[#allocation2 + $0xe8] sm:$0x3]  ;;  %v2310_v58 = vsel %vm1729_vm3, %v5717_v14, %v2309_v40 }
 0x2d7   : > { %v1200_v0 = vmul.f32 %v4638_v8, %v1127_v2  ;;  %v2568_v12 = vpop.permute.xlu0 %2567  ;;  %v5893_v19 = vsel %vm1519_vm4, %v2167_v46, %v5874_v33  ;;  %v2171_v23 = vsel %vm1519_vm4, %v5874_v33, %v2170_v41  ;;  %v2394_v40 = vpack.c.bf16 %v2310_v58, %v5728_v13 }
 0x2d8   : > { %1377 = vst.msk [vmem:[#allocation2 + $0xf1] sm:$0xff] %vm1316_vm0, %v1302_v15  ;;  %v2506_v56 = vld [vmem:[#allocation2 + $0xd8] sm:$0xff]  ;;  %v2507_v25 = vld [vmem:[#allocation2 + $0xe0] sm:$0xff]  ;;  %v1554_v41 = vsel %vm1519_vm4, %v5633_v18, %v1553_v48 }
 0x2d9   : > { %2614 = vst.msk [vmem:[#allocation3 + $0x20] sm:$0xff] %vm1922_vm6, %v2568_v12  ;;  %v1232_v55 = vadd.f32 %v1200_v0, %v1036_v21  ;;  %1904 = vrot.lane.b32.xlu1 %v1857_v60, %s4045_s19  ;;  %2831 = vrot.lane.b32.xlu0 %v2794_v29, %s4046_s20  ;;  %v2712_v35 = vrot.slane %v2506_v56, 1  ;;  %v5879_v24 = vrot.slane %v2507_v25, 1  ;;  %v2920_v36 = vrot.slane %v2506_v56, 2  ;;  %v6490_v21 = vld [vmem:[#allocation24_spill] sm:$0xff] }
 0x2da   : > { %v5882_v22 = vrot.slane %v2507_v25, 2  ;;  %v6491_v0 = vpack.c.bf16 %v5103_v39, %v6490_v21  ;;  %v2175_v60 = vrot.slane %v5885_v52, 1  ;;  %v2251_v39 = vpack.c.bf16 %v2171_v23, %v5893_v19  ;;  %v1414_v48 = vld [vmem:[#allocation2 + $0xb8] sm:$0x3] }
 0x2db   : > { %v1271_v54 = vadd.f32 %v5373_v38, %v1232_v55  ;;  %v939_v53 = vpop.permute.xlu1 %938  ;;  %v2824_v32 = vpop.permute.xlu0 %2823  ;;  %v5926_v46 = vpack.c.bf16 %v2507_v25, %v2506_v56  ;;  %v1638_v56 = vpack.c.bf16 %v1554_v41, %v5662_v4 }
 0x2dc   : > { %v1006_v31 = vmul.f32 %v4636_v37, %v939_v53  ;;  %2870 = vst.msk [vmem:[#allocation3 + $0x20] sm:$0xff] %vm2067_vm7, %v2824_v32  ;;  %v5901_v3 = vsel %vm1729_vm3, %v2920_v36, %v5882_v22  ;;  %v2924_v15 = vsel %vm1729_vm3, %v5882_v22, %v2923_v45  ;;  %v5913_v37 = vsel %vm1519_vm4, %v2712_v35, %v5879_v24 }
 0x2dd   : > { %v1303_v2 = vmax.f32 %v1271_v54, 0.0  ;;  %2851 = vrot.lane.b32.xlu1 %v6491_v0, %s4046_s20  ;;  %2029 = vrot.lane.b32.xlu0 %v5644_v20, %s4046_s20  ;;  %v3004_v12 = vpack.c.bf16 %v2924_v15, %v5901_v3  ;;  %v2710_v20 = vrot.slane %v5799_v61, 1  ;;  %v2176_v35 = vsel %vm1519_vm4, %v5879_v24, %v2175_v60  ;;  %2267 = vst.msk [vmem:[#allocation3 + $0xb0] sm:$0xff] %vm1316_vm0, %v2251_v39 }
 0x2de   : > { %v1038_v29 = vadd.f32 %v1006_v31, %v842_v9  ;;  %v1763_v45 = vrot.slane %v1411_v16, 2  ;;  %v2252_v18 = vpack.c.bf16 %v2176_v35, %v5913_v37  ;;  %v1037_v54 = vadd.f32 %v5853_v63, %v5827_v62  ;;  %1464 = vst.msk [vmem:[#allocation3 + $0xd8] sm:$0xff] %vm1316_vm0, %v5926_v46 }
 0x2df   : > { %1378 = vst.msk [vmem:[#allocation2 + $0xf9] sm:$0xff] %vm1316_vm0, %v1303_v2  ;;  %v2425_v55 = vpop.permute.xlu0 %2424  ;;  %3020 = vst.msk [vmem:[#allocation3 + $0xb8] sm:$0xff] %vm1316_vm0, %v3004_v12  ;;  %v2314_v53 = vrot.slane %v5846_v49, 2  ;;  %v2509_v32 = vld [vmem:[#allocation2 + $0xf0] sm:$0xff] }
 0x2e0   : > { %v1234_v9 = vadd.f32 %v1202_v42, %v1038_v29  ;;  %2470 = vst.msk [vmem:[#allocation3 + $0x38] sm:$0xff] %vm1712_vm5, %v2425_v55  ;;  %v1131_v36 = vpop.permute.xlu1 %1130  ;;  %v1764_v25 = vsel %vm1729_vm3, %v5594_v28, %v1763_v45  ;;  %v2925_v2 = vrot.slane %v2509_v32, 2  ;;  %v2717_v0 = vrot.slane %v2509_v32, 1 }
 0x2e1   : > { %v1201_v61 = vmul.f32 %v4638_v8, %v1131_v36  ;;  %2049 = vrot.lane.b32.xlu1 %v5675_v47, %s4046_s20  ;;  %2432 = vrot.lane.b32.xlu0 %v2394_v40, %s4047_s26  ;;  %2268 = vst.msk [vmem:[#allocation3 + $0xc8] sm:$0xff] %vm1316_vm0, %v2252_v18  ;;  %v2711_v8 = vsel %vm1519_vm4, %v5874_v33, %v2710_v20  ;;  %v1558_v29 = vrot.slane %v1414_v48, 1 }
 0x2e2   : > { %v1273_v42 = vadd.f32 %v5373_v38, %v1234_v9  ;;  %v1848_v28 = vpack.c.bf16 %v1764_v25, %v5614_v11  ;;  %v2795_v4 = vpack.c.bf16 %v2711_v8, %v5893_v19  ;;  %v2315_v11 = vsel %vm1729_vm3, %v5806_v27, %v2314_v53 }
 0x2e3   : > { %v1233_v62 = vadd.f32 %v1201_v61, %v1037_v54  ;;  %v1669_v63 = vpop.permute.xlu0 %1668  ;;  %v2395_v39 = vpack.c.bf16 %v2315_v11, %v5819_v57  ;;  %v1559_v35 = vsel %vm1519_vm4, %v5755_v26, %v1558_v29  ;;  %v1768_v26 = vrot.slane %v1414_v48, 2 }
 0x2e4   : > { %v1305_v47 = vmax.f32 %v1273_v42, 0.0  ;;  %1715 = vst.msk [vmem:[#allocation3 + $0x30] sm:$0xff] %vm1712_vm5, %v1669_v63  ;;  %v2421_v16 = vpop.permute.xlu1 %2420  ;;  %v2715_v61 = vrot.slane %v5860_v6, 1  ;;  %v1639_v42 = vpack.c.bf16 %v1559_v35, %v5769_v51  ;;  %v1417_v51 = vld [vmem:[#allocation2 + $0xd0] sm:$0x3] }
 0x2e5   : > { %v1272_v58 = vadd.f32 %v5373_v38, %v1233_v62  ;;  %2468 = vst.msk [vmem:[#allocation3 + $0x8] sm:$0xff] %vm1712_vm5, %v2421_v16  ;;  %1676 = vrot.lane.b32.xlu1 %v1638_v56, %s4047_s26  ;;  %2577 = vrot.lane.b32.xlu0 %v5849_v43, %s4045_s19  ;;  %v1769_v25 = vsel %vm1729_vm3, %v5717_v14, %v1768_v26  ;;  %v3033_v35 = vld [vmem:[#allocation3 + $0x20] sm:$0xff] }
 0x2e6   : > { %1380 = vst.msk [vmem:[#allocation2 + $0x111] sm:$0xff] %vm1316_vm0, %v1305_v47  ;;  %v2510_v49 = vld [vmem:[#allocation2 + $0xf8] sm:$0xff]  ;;  %v5958_v23 = vld [vmem:[#allocation2 + $0x100] sm:$0x3]  ;;  %v2716_v62 = vsel %vm1519_vm4, %v5879_v24, %v2715_v61 }
 0x2e7   : > { %2613 = vst.msk [vmem:[#allocation3 + $0x8] sm:$0xff] %vm1922_vm6, %v5772_v44  ;;  %v5960_v38 = vld [vmem:[#allocation2 + $0x100] sm:$0x3]  ;;  %v1304_v31 = vmax.f32 %v1272_v58, 0.0  ;;  %v5964_v15 = vrot.slane %v2510_v49, 1  ;;  %v5966_v21 = vrot.slane %v2510_v49, 2  ;;  %v5992_v36 = vpack.c.bf16 %v2510_v49, %v2509_v32 }
 0x2e8   : > { %2869 = vst.msk [vmem:[#allocation3 + $0x8] sm:$0xff] %vm2067_vm7, %v5803_v5  ;;  %v1665_v44 = vpop.permute.xlu1 %1664  ;;  %v2928_v12 = vrot.slane %v5958_v23, 2  ;;  %v2180_v60 = vrot.slane %v5960_v38, 1  ;;  %v2319_v32 = vrot.slane %v5885_v52, 2  ;;  %v2796_v49 = vpack.c.bf16 %v2716_v62, %v5913_v37 }
 0x2e9   : > { %1379 = vst.msk [vmem:[#allocation2 + $0x109] sm:$0xff] %vm1316_vm0, %v1304_v31  ;;  %1886 = vrot.lane.b32.xlu1 %v1848_v28, %s4045_s19  ;;  %2833 = vrot.lane.b32.xlu0 %v2795_v4, %s4046_s20  ;;  %v5977_v5 = vsel %vm1729_vm3, %v2925_v2, %v5966_v21  ;;  %v5982_v40 = vsel %vm1519_vm4, %v2717_v0, %v5964_v15  ;;  %1465 = vst.msk [vmem:[#allocation3 + $0xf0] sm:$0xff] %vm1316_vm0, %v5992_v36  ;;  %v2324_v26 = vrot.slane %v5960_v38, 2 }
 0x2ea   : > { %1713 = vst.msk [vmem:[#allocation3] sm:$0xff] %vm1712_vm5, %v1665_v44  ;;  %v2929_v41 = vsel %vm1729_vm3, %v5966_v21, %v2928_v12  ;;  %v2181_v9 = vsel %vm1519_vm4, %v5964_v15, %v2180_v60  ;;  %v1849_v4 = vpack.c.bf16 %v1769_v25, %v5728_v13  ;;  %v2320_v52 = vsel %vm1729_vm3, %v5882_v22, %v2319_v32 }
 0x2eb   : > { %v3005_v55 = vpack.c.bf16 %v2929_v41, %v5977_v5  ;;  %v2253_v18 = vpack.c.bf16 %v2181_v9, %v5982_v40  ;;  %v1563_v44 = vrot.slane %v1417_v51, 1  ;;  %v2396_v60 = vpack.c.bf16 %v2320_v52, %v5901_v3 }
 0x2ec   : > { %v1875_v20 = vpop.permute.xlu1 %1874 }
 0x2ed   : > { %1923 = vst.msk [vmem:[#allocation3] sm:$0xff] %vm1922_vm6, %v1875_v20  ;;  %2031 = vrot.lane.b32.xlu1 %v5776_v7, %s4046_s20  ;;  %2434 = vrot.lane.b32.xlu0 %v2395_v39, %s4047_s26  ;;  %v5999_v45 = vld [vmem:[#allocation2 + $0x118] sm:$0x3]  ;;  %v1564_v39 = vsel %vm1519_vm4, %v5874_v33, %v1563_v44  ;;  %v2720_v20 = vrot.slane %v5958_v23, 1 }
 0x2ee   : > { %3021 = vst.msk [vmem:[#allocation3 + $0xd0] sm:$0xff] %vm1316_vm0, %v3005_v55  ;;  %v6006_v56 = vld [vmem:[#allocation2 + $0x118] sm:$0x3]  ;;  %2269 = vst.msk [vmem:[#allocation3 + $0xe0] sm:$0xff] %vm1316_vm0, %v2253_v18  ;;  %v2185_v6 = vrot.slane %v5999_v45, 1  ;;  %v1773_v55 = vrot.slane %v1417_v51, 2  ;;  %v1640_v18 = vpack.c.bf16 %v1564_v39, %v5893_v19 }
 0x2ef   : > { %v3030_v54 = vld [vmem:[#allocation3 + $0x8] sm:$0xff]  ;;  %v2933_v28 = vrot.slane %v6006_v56, 2  ;;  %v2725_v51 = vrot.slane %v6006_v56, 1  ;;  %v2329_v56 = vrot.slane %v5999_v45, 2 }
 0x2f0   : > { %3308 = vmatprep.mubr.bf16.mxu0 %v3030_v54  ;;  %v2020_v7 = vpop.permute.xlu1 %2019  ;;  %v2512_v63 = vld [vmem:[#allocation2 + $0x108] sm:$0xff]  ;;  %v2513_v8 = vld [vmem:[#allocation2 + $0x110] sm:$0xff]  ;;  %v1774_v23 = vsel %vm1729_vm3, %v5806_v27, %v1773_v55  ;;  %v2721_v54 = vsel %vm1519_vm4, %v5964_v15, %v2720_v20  ;;  %v1426_v20 = vld [vmem:[#allocation2 + $0x118] sm:$0x3] }
 0x2f1   : > { %2068 = vst.msk [vmem:[#allocation3] sm:$0xff] %vm2067_vm7, %v2020_v7  ;;  %1678 = vrot.lane.b32.xlu1 %v1639_v42, %s4047_s26  ;;  %2579 = vrot.lane.b32.xlu0 %v5926_v46, %s4045_s19  ;;  %v6018_v47 = vpack.c.bf16 %v2513_v8, %v2512_v63  ;;  %v2722_v16 = vrot.slane %v2512_v63, 1  ;;  %v6020_v53 = vrot.slane %v2513_v8, 1  ;;  %v2930_v14 = vrot.slane %v2512_v63, 2  ;;  %v1420_v42 = vld [vmem:[#allocation2 + $0xe8] sm:$0x3] }
 0x2f2   : > { %v6023_v58 = vrot.slane %v2513_v8, 2  ;;  %v1850_v19 = vpack.c.bf16 %v1774_v23, %v5819_v57  ;;  %v2797_v61 = vpack.c.bf16 %v2721_v54, %v5982_v40  ;;  %v2325_v7 = vsel %vm1729_vm3, %v5966_v21, %v2324_v26 }
 0x2f3   : > { %v6030_v31 = vsel %vm1519_vm4, %v2722_v16, %v6020_v53  ;;  %v2186_v48 = vsel %vm1519_vm4, %v6020_v53, %v2185_v6  ;;  %1466 = vst.msk [vmem:[#allocation3 + $0x108] sm:$0xff] %vm1316_vm0, %v6018_v47  ;;  %v1568_v38 = vrot.slane %v1420_v42, 1  ;;  %v2397_v62 = vpack.c.bf16 %v2325_v7, %v5977_v5 }
 0x2f4   : > { %v1667_v2 = vpop.permute.xlu1 %1666  ;;  %v6040_v13 = vsel %vm1729_vm3, %v2930_v14, %v6023_v58  ;;  %v2934_v11 = vsel %vm1729_vm3, %v6023_v58, %v2933_v28  ;;  %v2254_v12 = vpack.c.bf16 %v2186_v48, %v6030_v31  ;;  %v1778_v6 = vrot.slane %v1420_v42, 2 }
 0x2f5   : > { %1714 = vst.msk [vmem:[#allocation3 + $0x18] sm:$0xff] %vm1712_vm5, %v1667_v2  ;;  %1888 = vrot.lane.b32.xlu1 %v1849_v4, %s4045_s19  ;;  %2835 = vrot.lane.b32.xlu0 %v2796_v49, %s4046_s20  ;;  %v3006_v0 = vpack.c.bf16 %v2934_v11, %v6040_v13  ;;  %v1569_v8 = vsel %vm1519_vm4, %v5879_v24, %v1568_v38 }
 0x2f6   : > { %2270 = vst.msk [vmem:[#allocation3 + $0xf8] sm:$0xff] %vm1316_vm0, %v2254_v12  ;;  %v1641_v14 = vpack.c.bf16 %v1569_v8, %v5913_v37  ;;  %v1779_v24 = vsel %vm1729_vm3, %v5882_v22, %v1778_v6  ;;  %v2726_v28 = vsel %vm1519_vm4, %v6020_v53, %v2725_v51  ;;  %v2330_v2 = vsel %vm1729_vm3, %v6023_v58, %v2329_v56 }
 0x2f7   : > { %3022 = vst.msk [vmem:[#allocation3 + $0xe8] sm:$0xff] %vm1316_vm0, %v3006_v0  ;;  %v1851_v49 = vpack.c.bf16 %v1779_v24, %v5901_v3  ;;  %v2798_v48 = vpack.c.bf16 %v2726_v28, %v6030_v31  ;;  %v2398_v3 = vpack.c.bf16 %v2330_v2, %v6040_v13 }
 0x2f8   : > { %v1877_v29 = vpop.permute.xlu1 %1876  ;;  %v3029_v41 = vld [vmem:[#allocation3] sm:$0xff] }
 0x2f9   : > { %1924 = vst.msk [vmem:[#allocation3 + $0x18] sm:$0xff] %vm1922_vm6, %v1877_v29  ;;  %2033 = vrot.lane.b32.xlu1 %v5849_v43, %s4046_s20  ;;  %2436 = vrot.lane.b32.xlu0 %v2396_v60, %s4047_s26 }
 0x2fa   : > { %3309 = vmatmul.mubr.bf16.vlgmr.msra.gmra.mrb[0].mxu0 %v3029_v41 }
 0x2fb   : > { %3316 = vmatprep.mubr.bf16.mxu0 %v3033_v35  ;;  %v2570_v9 = vpop.permute.xlu0 %2569 }
 0x2fc   : > { %2615 = vst.msk [vmem:[#allocation3 + $0x38] sm:$0xff] %vm1922_vm6, %v2570_v9  ;;  %v2022_v33 = vpop.permute.xlu1 %2021 }
 0x2fd   : > { %2069 = vst.msk [vmem:[#allocation3 + $0x18] sm:$0xff] %vm2067_vm7, %v2022_v33  ;;  %1680 = vrot.lane.b32.xlu1 %v1640_v18, %s4047_s26  ;;  %2581 = vrot.lane.b32.xlu0 %v5992_v36, %s4045_s19  ;;  %v1578_v18 = vrot.slane %v1426_v20, 1 }
 0x2ff   : > { %v1879_v43 = vpop.permute.xlu0 %1878  ;;  %v1579_v26 = vsel %vm1519_vm4, %v6020_v53, %v1578_v18 }
 0x300   : > { %1925 = vst.msk [vmem:[#allocation3 + $0x30] sm:$0xff] %vm1922_vm6, %v1879_v43  ;;  %v2445_v27 = vpop.permute.xlu1 %2444  ;;  %v1788_v43 = vrot.slane %v1426_v20, 2 }
 0x301   : > { %2480 = vst.msk [vmem:[#allocation3 + $0x128] sm:$0xff] %vm1712_vm5, %v2445_v27  ;;  %1890 = vrot.lane.b32.xlu1 %v1850_v19, %s4045_s19  ;;  %2837 = vrot.lane.b32.xlu0 %v2797_v61, %s4046_s20  ;;  %v1643_v61 = vpack.c.bf16 %v1579_v26, %v6030_v31  ;;  %v3037_v26 = vld [vmem:[#allocation3 + $0x40] sm:$0xff] }
 0x302   : > { %v1789_v42 = vsel %vm1729_vm3, %v6023_v58, %v1788_v43  ;;  %v6497_v58 = vld [vmem:[#allocation25_spill] sm:$0xff] }
 0x303   : > { %v2826_v25 = vpop.permute.xlu0 %2825  ;;  %v6498_v27 = vpack.c.bf16 %v5600_v50, %v6497_v58 }
 0x304   : > { %2871 = vst.msk [vmem:[#allocation3 + $0x38] sm:$0xff] %vm2067_vm7, %v2826_v25  ;;  %v1689_v57 = vpop.permute.xlu1 %1688  ;;  %v3032_v63 = vld [vmem:[#allocation3 + $0x18] sm:$0xff] }
 0x305   : > { %1725 = vst.msk [vmem:[#allocation3 + $0x120] sm:$0xff] %vm1712_vm5, %v1689_v57  ;;  %2035 = vrot.lane.b32.xlu1 %v5926_v46, %s4046_s20  ;;  %2438 = vrot.lane.b32.xlu0 %v2397_v62, %s4047_s26  ;;  %v1423_v46 = vld [vmem:[#allocation2 + $0x100] sm:$0x3] }
 0x306   : > { %3317 = vmatmul.mubr.bf16.gmra.mrb[4].mxu0 %v3032_v63  ;;  %v1573_v52 = vrot.slane %v1423_v46, 1  ;;  %v1783_v12 = vrot.slane %v1423_v46, 2 }
 0x307   : > { %v2024_v16 = vpop.permute.xlu0 %2023 }
 0x308   : > { %2070 = vst.msk [vmem:[#allocation3 + $0x30] sm:$0xff] %vm2067_vm7, %v2024_v16  ;;  %v2590_v32 = vpop.permute.xlu1 %2589  ;;  %v1574_v0 = vsel %vm1519_vm4, %v5964_v15, %v1573_v52  ;;  %v1784_v39 = vsel %vm1729_vm3, %v5966_v21, %v1783_v12  ;;  %v6492_v15 = vld [vmem:[#allocation7_spill] sm:$0xff]  ;;  %v6493_v21 = vld [vmem:[#allocation37_spill] sm:$0xff] }
 0x309   : > { %2625 = vst.msk [vmem:[#allocation3 + $0x128] sm:$0xff] %vm1922_vm6, %v2590_v32  ;;  %1682 = vrot.lane.b32.xlu1 %v1641_v14, %s4047_s26  ;;  %2583 = vrot.lane.b32.xlu0 %v6018_v47, %s4045_s19  ;;  %v1642_v29 = vpack.c.bf16 %v1574_v0, %v5982_v40  ;;  %v6494_v9 = vpack.c.bf16 %v6493_v21, %v5504_v30 }
 0x30a   : > { %v6495_v30 = vpack.c.bf16 %v5571_v1, %v5556_v17  ;;  %v6496_v1 = vpack.c.bf16 %v5263_v10, %v5261_v59 }
 0x30b   : > { %v2427_v37 = vpop.permute.xlu0 %2426  ;;  %v3036_v4 = vld [vmem:[#allocation3 + $0x38] sm:$0xff] }
 0x30c   : > { %2471 = vst.msk [vmem:[#allocation3 + $0x50] sm:$0xff] %vm1712_vm5, %v2427_v37  ;;  %v1899_v22 = vpop.permute.xlu1 %1898  ;;  %3324 = vmatprep.mubr.bf16.mxu0 %v3036_v4 }
 0x30d   : > { %1935 = vst.msk [vmem:[#allocation3 + $0x120] sm:$0xff] %vm1922_vm6, %v1899_v22  ;;  %1892 = vrot.lane.b32.xlu1 %v1851_v49, %s4045_s19  ;;  %2839 = vrot.lane.b32.xlu0 %v2798_v48, %s4046_s20 }
 0x30f   : > { %v1671_v45 = vpop.permute.xlu0 %1670  ;;  %v3035_v44 = vld [vmem:[#allocation3 + $0x30] sm:$0xff] }
 0x310   : > { %1716 = vst.msk [vmem:[#allocation3 + $0x48] sm:$0xff] %vm1712_vm5, %v1671_v45  ;;  %v2846_v11 = vpop.permute.xlu1 %2845  ;;  %3325 = vmatmul.mubr.bf16.gmra.mrb[8].mxu0 %v3035_v44 }
 0x311   : > { %2881 = vst.msk [vmem:[#allocation3 + $0x128] sm:$0xff] %vm2067_vm7, %v2846_v11  ;;  %2037 = vrot.lane.b32.xlu1 %v5992_v36, %s4046_s20  ;;  %2440 = vrot.lane.b32.xlu0 %v2398_v3, %s4047_s26  ;;  %v1852_v36 = vpack.c.bf16 %v1784_v39, %v5977_v5  ;;  %v4030_v5 = vld [vmem:[%s6333_s5 + $0x88] sm:$0xff]  }
 0x313   : > { %v2572_v60 = vpop.permute.xlu0 %2571 }
 0x314   : > { %2616 = vst.msk [vmem:[#allocation3 + $0x50] sm:$0xff] %vm1922_vm6, %v2572_v60  ;;  %v2044_v41 = vpop.permute.xlu1 %2043 }
 0x315   : > { %2080 = vst.msk [vmem:[#allocation3 + $0x120] sm:$0xff] %vm2067_vm7, %v2044_v41  ;;  %1684 = vrot.lane.b32.xlu1 %v1642_v29, %s4047_s26  ;;  %2585 = vrot.lane.b32.xlu0 %v6492_v15, %s4045_s19 }
 0x317   : > { %v1881_v55 = vpop.permute.xlu0 %1880 }
 0x318   : > { %1926 = vst.msk [vmem:[#allocation3 + $0x48] sm:$0xff] %vm1922_vm6, %v1881_v55  ;;  %v2447_v40 = vpop.permute.xlu1 %2446  ;;  %v3066_v35 = vld [vmem:[#allocation3 + $0x128] sm:$0xff] }
 0x319   : > { %2481 = vst.msk [vmem:[#allocation3 + $0x140] sm:$0xff] %vm1712_vm5, %v2447_v40  ;;  %3404 = vmatprep.mubr.bf16.mxu1 %v3066_v35  ;;  %1894 = vrot.lane.b32.xlu1 %v1852_v36, %s4045_s19 }
 0x31a   : > { %2841 = vrot.lane.b32.xlu0 %v6494_v9, %s4046_s20  ;;  %v3031_v9 = vld [vmem:[#allocation3 + $0x10] sm:$0xff] }
 0x31b   : > { %v2828_v33 = vpop.permute.xlu0 %2827 }
 0x31c   : > { %2872 = vst.msk [vmem:[#allocation3 + $0x50] sm:$0xff] %vm2067_vm7, %v2828_v33  ;;  %v1691_v23 = vpop.permute.xlu1 %1690  ;;  %v3065_v54 = vld [vmem:[#allocation3 + $0x120] sm:$0xff] }
 0x31d   : > { %1726 = vst.msk [vmem:[#allocation3 + $0x138] sm:$0xff] %vm1712_vm5, %v1691_v23  ;;  %3405 = vmatmul.mubr.bf16.vlgmr.msra.gmra.mrb[0].mxu1 %v3065_v54  ;;  %2039 = vrot.lane.b32.xlu1 %v6018_v47, %s4046_s20  ;;  %v1853_v47 = vpack.c.bf16 %v1789_v42, %v6040_v13  ;;  %v3034_v54 = vld [vmem:[#allocation3 + $0x28] sm:$0xff] }
 0x31e   : > { %2442 = vrot.lane.b32.xlu0 %v6495_v30, %s4047_s26  ;;  %3909 = vmatpush3.bf16.msra.mxu1 %v5872_v34 }
 0x31f   : > { %v2026_v19 = vpop.permute.xlu0 %2025  ;;  %3910 = vmatprep.subr.bf16.mxu1 %v4030_v5 }
 0x320   : > { %2071 = vst.msk [vmem:[#allocation3 + $0x48] sm:$0xff] %vm2067_vm7, %v2026_v19  ;;  %v2592_v53 = vpop.permute.xlu1 %2591 }
 0x321   : > { %2626 = vst.msk [vmem:[#allocation3 + $0x140] sm:$0xff] %vm1922_vm6, %v2592_v53  ;;  %1686 = vrot.lane.b32.xlu1 %v1643_v61, %s4047_s26 }
 0x322   : > { %2587 = vrot.lane.b32.xlu0 %v6496_v1, %s4045_s19  ;;  %3911 = vmatpush3.bf16.msra.mxu1 %v4030_v5  ;;  %v3040_v1 = vld [vmem:[#allocation3 + $0x58] sm:$0xff] }
 0x323   : > { %v2429_v17 = vpop.permute.xlu0 %2428  ;;  %v3039_v34 = vld [vmem:[#allocation3 + $0x50] sm:$0xff] }
 0x324   : > { %2472 = vst.msk [vmem:[#allocation3 + $0x68] sm:$0xff] %vm1712_vm5, %v2429_v17  ;;  %v1901_v31 = vpop.permute.xlu1 %1900  ;;  %3332 = vmatprep.mubr.bf16.mxu0 %v3039_v34  ;;  %v3043_v17 = vld [vmem:[#allocation3 + $0x70] sm:$0xff] }
 0x325   : > { %1936 = vst.msk [vmem:[#allocation3 + $0x138] sm:$0xff] %vm1922_vm6, %v1901_v31  ;;  %1896 = vrot.lane.b32.xlu1 %v1853_v47, %s4045_s19 }
 0x326   : > { %2843 = vrot.lane.b32.xlu0 %v6498_v27, %s4046_s20 }
 0x327   : > { %v1673_v59 = vpop.permute.xlu0 %1672  ;;  %v3038_v10 = vld [vmem:[#allocation3 + $0x48] sm:$0xff] }
 0x328   : > { %1717 = vst.msk [vmem:[#allocation3 + $0x60] sm:$0xff] %vm1712_vm5, %v1673_v59  ;;  %v2848_v7 = vpop.permute.xlu1 %2847  ;;  %3333 = vmatmul.mubr.bf16.gmra.mrb[12].mxu0 %v3038_v10  ;;  %v3046_v59 = vld [vmem:[#allocation3 + $0x88] sm:$0xff] }
 0x329   : > { %2882 = vst.msk [vmem:[#allocation3 + $0x140] sm:$0xff] %vm2067_vm7, %v2848_v7  ;;  %2041 = vrot.lane.b32.xlu1 %v6492_v15, %s4046_s20  ;;  %v3049_v7 = vld [vmem:[#allocation3 + $0xa0] sm:$0xff] }
 0x32b   : > { %v2574_v13 = vpop.permute.xlu0 %2573 }
 0x32c   : > { %2617 = vst.msk [vmem:[#allocation3 + $0x68] sm:$0xff] %vm1922_vm6, %v2574_v13  ;;  %v2046_v38 = vpop.permute.xlu1 %2045 }
 0x32d   : > { %2081 = vst.msk [vmem:[#allocation3 + $0x138] sm:$0xff] %vm2067_vm7, %v2046_v38 }
 0x32f   : > { %v1883_v25 = vpop.permute.xlu0 %1882 }
 0x330   : > { %1927 = vst.msk [vmem:[#allocation3 + $0x60] sm:$0xff] %vm1922_vm6, %v1883_v25  ;;  %v2449_v50 = vpop.permute.xlu1 %2448  ;;  %v3069_v62 = vld [vmem:[#allocation3 + $0x140] sm:$0xff] }
 0x331   : > { %2482 = vst.msk [vmem:[#allocation3 + $0x158] sm:$0xff] %vm1712_vm5, %v2449_v50  ;;  %3412 = vmatprep.mubr.bf16.mxu1 %v3069_v62  ;;  %v3052_v62 = vld [vmem:[#allocation3 + $0xb8] sm:$0xff] }
 0x333   : > { %v2830_v57 = vpop.permute.xlu0 %2829 }
 0x334   : > { %2873 = vst.msk [vmem:[#allocation3 + $0x68] sm:$0xff] %vm2067_vm7, %v2830_v57  ;;  %v1693_v63 = vpop.permute.xlu1 %1692  ;;  %v3068_v8 = vld [vmem:[#allocation3 + $0x138] sm:$0xff]  ;;  %v3055_v57 = vld [vmem:[#allocation3 + $0xd0] sm:$0xff] }
 0x335   : > { %1727 = vst.msk [vmem:[#allocation3 + $0x150] sm:$0xff] %vm1712_vm5, %v1693_v63  ;;  %3413 = vmatmul.mubr.bf16.gmra.mrb[4].mxu1 %v3068_v8 }
 0x337   : > { %v2028_v6 = vpop.permute.xlu0 %2027 }
 0x338   : > { %2072 = vst.msk [vmem:[#allocation3 + $0x60] sm:$0xff] %vm2067_vm7, %v2028_v6  ;;  %v2594_v51 = vpop.permute.xlu1 %2593 }
 0x339   : > { %2627 = vst.msk [vmem:[#allocation3 + $0x158] sm:$0xff] %vm1922_vm6, %v2594_v51 }
 0x33b   : > { %v2431_v16 = vpop.permute.xlu0 %2430  ;;  %v3042_v14 = vld [vmem:[#allocation3 + $0x68] sm:$0xff] }
 0x33c   : > { %2473 = vst.msk [vmem:[#allocation3 + $0x80] sm:$0xff] %vm1712_vm5, %v2431_v16  ;;  %v1903_v32 = vpop.permute.xlu1 %1902  ;;  %3340 = vmatprep.mubr.bf16.mxu0 %v3042_v14 }
 0x33d   : > { %1937 = vst.msk [vmem:[#allocation3 + $0x150] sm:$0xff] %vm1922_vm6, %v1903_v32  ;;  %v3058_v32 = vld [vmem:[#allocation3 + $0xe8] sm:$0xff] }
 0x33f   : > { %v1675_v24 = vpop.permute.xlu0 %1674  ;;  %v3041_v28 = vld [vmem:[#allocation3 + $0x60] sm:$0xff] }
 0x340   : > { %1718 = vst.msk [vmem:[#allocation3 + $0x78] sm:$0xff] %vm1712_vm5, %v1675_v24  ;;  %v2850_v46 = vpop.permute.xlu1 %2849  ;;  %3341 = vmatmul.mubr.bf16.gmra.mrb[16].mxu0 %v3041_v28  ;;  %v3061_v24 = vld [vmem:[#allocation3 + $0x100] sm:$0xff] }
 0x341   : > { %2883 = vst.msk [vmem:[#allocation3 + $0x158] sm:$0xff] %vm2067_vm7, %v2850_v46 }
 0x343   : > { %v2576_v56 = vpop.permute.xlu0 %2575 }
 0x344   : > { %2618 = vst.msk [vmem:[#allocation3 + $0x80] sm:$0xff] %vm1922_vm6, %v2576_v56  ;;  %v2048_v37 = vpop.permute.xlu1 %2047 }
 0x345   : > { %2082 = vst.msk [vmem:[#allocation3 + $0x150] sm:$0xff] %vm2067_vm7, %v2048_v37 }
 0x347   : > { %v1885_v4 = vpop.permute.xlu0 %1884 }
 0x348   : > { %1928 = vst.msk [vmem:[#allocation3 + $0x78] sm:$0xff] %vm1922_vm6, %v1885_v4  ;;  %v2451_v49 = vpop.permute.xlu1 %2450  ;;  %v3072_v48 = vld [vmem:[#allocation3 + $0x158] sm:$0xff] }
 0x349   : > { %2483 = vst.msk [vmem:[#allocation3 + $0x170] sm:$0xff] %vm1712_vm5, %v2451_v49  ;;  %3420 = vmatprep.mubr.bf16.mxu1 %v3072_v48  ;;  %v3064_v49 = vld [vmem:[#allocation3 + $0x118] sm:$0xff] }
 0x34b   : > { %v2832_v22 = vpop.permute.xlu0 %2831 }
 0x34c   : > { %2874 = vst.msk [vmem:[#allocation3 + $0x80] sm:$0xff] %vm2067_vm7, %v2832_v22  ;;  %v1695_v2 = vpop.permute.xlu1 %1694  ;;  %v3071_v52 = vld [vmem:[#allocation3 + $0x150] sm:$0xff] }
 0x34d   : > { %1728 = vst.msk [vmem:[#allocation3 + $0x168] sm:$0xff] %vm1712_vm5, %v1695_v2  ;;  %3421 = vmatmul.mubr.bf16.gmra.mrb[8].mxu1 %v3071_v52  ;;  %v3067_v22 = vld [vmem:[#allocation3 + $0x130] sm:$0xff] }
 0x34f   : > { %v2030_v45 = vpop.permute.xlu0 %2029 }
 0x350   : > { %2073 = vst.msk [vmem:[#allocation3 + $0x78] sm:$0xff] %vm2067_vm7, %v2030_v45  ;;  %v2596_v44 = vpop.permute.xlu1 %2595 }
 0x351   : > { %2628 = vst.msk [vmem:[#allocation3 + $0x170] sm:$0xff] %vm1922_vm6, %v2596_v44  ;;  %v3070_v44 = vld [vmem:[#allocation3 + $0x148] sm:$0xff] }
 0x353   : > { %v2433_v3 = vpop.permute.xlu0 %2432  ;;  %v3045_v11 = vld [vmem:[#allocation3 + $0x80] sm:$0xff] }
 0x354   : > { %2474 = vst.msk [vmem:[#allocation3 + $0x98] sm:$0xff] %vm1712_vm5, %v2433_v3  ;;  %v1905_v0 = vpop.permute.xlu1 %1904  ;;  %3348 = vmatprep.mubr.bf16.mxu0 %v3045_v11  ;;  %v3073_v3 = vld [vmem:[#allocation3 + $0x160] sm:$0xff] }
 0x355   : > { %1938 = vst.msk [vmem:[#allocation3 + $0x168] sm:$0xff] %vm1922_vm6, %v1905_v0 }
 0x357   : > { %v2578_v12 = vpop.permute.xlu0 %2577  ;;  %v3044_v60 = vld [vmem:[#allocation3 + $0x78] sm:$0xff] }
 0x358   : > { %2619 = vst.msk [vmem:[#allocation3 + $0x98] sm:$0xff] %vm1922_vm6, %v2578_v12  ;;  %v2852_v29 = vpop.permute.xlu1 %2851  ;;  %3349 = vmatmul.mubr.bf16.gmra.mrb[20].mxu0 %v3044_v60  ;;  %v3076_v60 = vld [vmem:[#allocation3 + $0x178] sm:$0xff] }
 0x359   : > { %2884 = vst.msk [vmem:[#allocation3 + $0x170] sm:$0xff] %vm2067_vm7, %v2852_v29 }
 0x35b   : > { %v2834_v41 = vpop.permute.xlu0 %2833 }
 0x35c   : > { %2875 = vst.msk [vmem:[#allocation3 + $0x98] sm:$0xff] %vm2067_vm7, %v2834_v41  ;;  %v2050_v39 = vpop.permute.xlu1 %2049 }
 0x35d   : > { %2083 = vst.msk [vmem:[#allocation3 + $0x168] sm:$0xff] %vm2067_vm7, %v2050_v39 }
 0x35f   : > { %v2435_v15 = vpop.permute.xlu0 %2434 }
 0x360   : > { %2475 = vst.msk [vmem:[#allocation3 + $0xb0] sm:$0xff] %vm1712_vm5, %v2435_v15  ;;  %v1677_v55 = vpop.permute.xlu1 %1676  ;;  %v3075_v36 = vld [vmem:[#allocation3 + $0x170] sm:$0xff] }
 0x361   : > { %1719 = vst.msk [vmem:[#allocation3 + $0x90] sm:$0xff] %vm1712_vm5, %v1677_v55  ;;  %3428 = vmatprep.mubr.bf16.mxu1 %v3075_v36 }
 0x363   : > { %v2580_v20 = vpop.permute.xlu0 %2579  ;;  %v3048_v40 = vld [vmem:[#allocation3 + $0x98] sm:$0xff] }
 0x364   : > { %2620 = vst.msk [vmem:[#allocation3 + $0xb0] sm:$0xff] %vm1922_vm6, %v2580_v20  ;;  %v1887_v35 = vpop.permute.xlu1 %1886  ;;  %3356 = vmatprep.mubr.bf16.mxu0 %v3048_v40  ;;  %v3074_v21 = vld [vmem:[#allocation3 + $0x168] sm:$0xff] }
 0x365   : > { %1929 = vst.msk [vmem:[#allocation3 + $0x90] sm:$0xff] %vm1922_vm6, %v1887_v35  ;;  %3429 = vmatmul.mubr.bf16.gmra.mrb[12].mxu1 %v3074_v21 }
 0x366   : > { %3912 = vmatprep.mubr.msk.bf16.mxu1 %vm1316_vm0, %v3031_v9 }
 0x367   : > { %v2836_v18 = vpop.permute.xlu0 %2835 }
 0x368   : > { %2876 = vst.msk [vmem:[#allocation3 + $0xb0] sm:$0xff] %vm2067_vm7, %v2836_v18  ;;  %v2032_v33 = vpop.permute.xlu1 %2031 }
 0x369   : > { %2074 = vst.msk [vmem:[#allocation3 + $0x90] sm:$0xff] %vm2067_vm7, %v2032_v33 }
 0x36b   : > { %v2437_v5 = vpop.permute.xlu0 %2436 }
 0x36c   : > { %2476 = vst.msk [vmem:[#allocation3 + $0xc8] sm:$0xff] %vm1712_vm5, %v2437_v5  ;;  %v1679_v23 = vpop.permute.xlu1 %1678 }
 0x36d   : > { %1720 = vst.msk [vmem:[#allocation3 + $0xa8] sm:$0xff] %vm1712_vm5, %v1679_v23  ;;  %3913 = vmatmul.mubr.msk.bf16.vlgmr.msra.gmra.mrb[16].mxu1 %vm1316_vm0, %v3034_v54 }
 0x36e   : > { %3916 = vmatprep.mubr.msk.bf16.mxu1 %vm1316_vm0, %v3037_v26 }
 0x36f   : > { %v2582_v30 = vpop.permute.xlu0 %2581  ;;  %v3051_v61 = vld [vmem:[#allocation3 + $0xb0] sm:$0xff] }
 0x370   : > { %2621 = vst.msk [vmem:[#allocation3 + $0xc8] sm:$0xff] %vm1922_vm6, %v2582_v30  ;;  %v1889_v43 = vpop.permute.xlu1 %1888  ;;  %v3047_v19 = vld [vmem:[#allocation3 + $0x90] sm:$0xff] }
 0x371   : > { %1930 = vst.msk [vmem:[#allocation3 + $0xa8] sm:$0xff] %vm1922_vm6, %v1889_v43  ;;  %3357 = vmatmul.mubr.bf16.gmra.mrb[24].mxu0 %v3047_v19 }
 0x372   : > { %3364 = vmatprep.mubr.bf16.mxu0 %v3051_v61 }
 0x373   : > { %v2838_v53 = vpop.permute.xlu0 %2837 }
 0x374   : > { %2877 = vst.msk [vmem:[#allocation3 + $0xc8] sm:$0xff] %vm2067_vm7, %v2838_v53  ;;  %v2034_v42 = vpop.permute.xlu1 %2033 }
 0x375   : > { %2075 = vst.msk [vmem:[#allocation3 + $0xa8] sm:$0xff] %vm2067_vm7, %v2034_v42  ;;  %3917 = vmatmul.mubr.msk.bf16.gmra.mrb[20].mxu1 %vm1316_vm0, %v3040_v1 }
 0x376   : > { %3920 = vmatprep.mubr.msk.bf16.mxu1 %vm1316_vm0, %v3043_v17 }
 0x377   : > { %v2439_v34 = vpop.permute.xlu0 %2438 }
 0x378   : > { %2477 = vst.msk [vmem:[#allocation3 + $0xe0] sm:$0xff] %vm1712_vm5, %v2439_v34  ;;  %v1681_v47 = vpop.permute.xlu1 %1680 }
 0x379   : > { %1721 = vst.msk [vmem:[#allocation3 + $0xc0] sm:$0xff] %vm1712_vm5, %v1681_v47 }
 0x37b   : > { %v2584_v31 = vpop.permute.xlu0 %2583  ;;  %v3054_v10 = vld [vmem:[#allocation3 + $0xc8] sm:$0xff] }
 0x37c   : > { %2622 = vst.msk [vmem:[#allocation3 + $0xe0] sm:$0xff] %vm1922_vm6, %v2584_v31  ;;  %v1891_v58 = vpop.permute.xlu1 %1890  ;;  %v3050_v27 = vld [vmem:[#allocation3 + $0xa8] sm:$0xff] }
 0x37d   : > { %1931 = vst.msk [vmem:[#allocation3 + $0xc0] sm:$0xff] %vm1922_vm6, %v1891_v58  ;;  %3365 = vmatmul.mubr.bf16.gmra.mrb[28].mxu0 %v3050_v27  ;;  %3921 = vmatmul.mubr.msk.bf16.gmra.mrb[24].mxu1 %vm1316_vm0, %v3046_v59 }
 0x37e   : > { %3372 = vmatprep.mubr.bf16.mxu0 %v3054_v10  ;;  %3924 = vmatprep.mubr.msk.bf16.mxu1 %vm1316_vm0, %v3049_v7 }
 0x37f   : > { %v2840_v13 = vpop.permute.xlu0 %2839 }
 0x380   : > { %2878 = vst.msk [vmem:[#allocation3 + $0xe0] sm:$0xff] %vm2067_vm7, %v2840_v13  ;;  %v2036_v38 = vpop.permute.xlu1 %2035 }
 0x381   : > { %2076 = vst.msk [vmem:[#allocation3 + $0xc0] sm:$0xff] %vm2067_vm7, %v2036_v38 }
 0x383   : > { %v2441_v25 = vpop.permute.xlu0 %2440 }
 0x384   : > { %2478 = vst.msk [vmem:[#allocation3 + $0xf8] sm:$0xff] %vm1712_vm5, %v2441_v25  ;;  %v1683_v50 = vpop.permute.xlu1 %1682 }
 0x385   : > { %1722 = vst.msk [vmem:[#allocation3 + $0xd8] sm:$0xff] %vm1712_vm5, %v1683_v50  ;;  %3925 = vmatmul.mubr.msk.bf16.gmra.mrb[28].mxu1 %vm1316_vm0, %v3052_v62 }
 0x386   : > { %3928 = vmatprep.mubr.msk.bf16.mxu1 %vm1316_vm0, %v3055_v57 }
 0x387   : > { %v2586_v63 = vpop.permute.xlu0 %2585  ;;  %v3057_v51 = vld [vmem:[#allocation3 + $0xe0] sm:$0xff] }
 0x388   : > { %2623 = vst.msk [vmem:[#allocation3 + $0xf8] sm:$0xff] %vm1922_vm6, %v2586_v63  ;;  %v1893_v8 = vpop.permute.xlu1 %1892  ;;  %v3053_v6 = vld [vmem:[#allocation3 + $0xc0] sm:$0xff] }
 0x389   : > { %1932 = vst.msk [vmem:[#allocation3 + $0xd8] sm:$0xff] %vm1922_vm6, %v1893_v8  ;;  %3373 = vmatmul.mubr.bf16.gmra.mrb[32].mxu0 %v3053_v6 }
 0x38a   : > { %3380 = vmatprep.mubr.bf16.mxu0 %v3057_v51 }
 0x38c   : > { %v2842_v16 = vpop.permute.xlu0 %2841  ;;  %v2038_v14 = vpop.permute.xlu1 %2037 }
 0x38d   : > { %2879 = vst.msk [vmem:[#allocation3 + $0xf8] sm:$0xff] %vm2067_vm7, %v2842_v16  ;;  %2077 = vst.msk [vmem:[#allocation3 + $0xd8] sm:$0xff] %vm2067_vm7, %v2038_v14  ;;  %3929 = vmatmul.mubr.msk.bf16.gmra.mrb[32].mxu1 %vm1316_vm0, %v3058_v32 }
 0x38e   : > { %3932 = vmatprep.mubr.msk.bf16.mxu1 %vm1316_vm0, %v3061_v24 }
 0x390   : > { %v2443_v28 = vpop.permute.xlu0 %2442  ;;  %v1685_v46 = vpop.permute.xlu1 %1684 }
 0x391   : > { %2479 = vst.msk [vmem:[#allocation3 + $0x110] sm:$0xff] %vm1712_vm5, %v2443_v28  ;;  %1723 = vst.msk [vmem:[#allocation3 + $0xf0] sm:$0xff] %vm1712_vm5, %v1685_v46 }
 0x394   : > { %v2588_v56 = vpop.permute.xlu0 %2587  ;;  %v1895_v37 = vpop.permute.xlu1 %1894  ;;  %v3056_v4 = vld [vmem:[#allocation3 + $0xd8] sm:$0xff] }
 0x395   : > { %2624 = vst.msk [vmem:[#allocation3 + $0x110] sm:$0xff] %vm1922_vm6, %v2588_v56  ;;  %1933 = vst.msk [vmem:[#allocation3 + $0xf0] sm:$0xff] %vm1922_vm6, %v1895_v37  ;;  %3381 = vmatmul.mubr.bf16.gmra.mrb[36].mxu0 %v3056_v4  ;;  %3933 = vmatmul.mubr.msk.bf16.gmra.mrb[36].mxu1 %vm1316_vm0, %v3064_v49  ;;  %v3060_v48 = vld [vmem:[#allocation3 + $0xf8] sm:$0xff] }
 0x396   : > { %3388 = vmatprep.mubr.bf16.mxu0 %v3060_v48  ;;  %3936 = vmatprep.mubr.msk.bf16.mxu1 %vm1316_vm0, %v3067_v22 }
 0x398   : > { %v2844_v2 = vpop.permute.xlu0 %2843  ;;  %v2040_v52 = vpop.permute.xlu1 %2039 }
 0x399   : > { %2880 = vst.msk [vmem:[#allocation3 + $0x110] sm:$0xff] %vm2067_vm7, %v2844_v2  ;;  %2078 = vst.msk [vmem:[#allocation3 + $0xf0] sm:$0xff] %vm2067_vm7, %v2040_v52 }
 0x39c   : > { %v1687_v45 = vpop.permute.xlu1 %1686 }
 0x39d   : > { %1724 = vst.msk [vmem:[#allocation3 + $0x108] sm:$0xff] %vm1712_vm5, %v1687_v45  ;;  %3937 = vmatmul.mubr.msk.bf16.gmra.mrb[40].mxu1 %vm1316_vm0, %v3070_v44 }
 0x39e   : > { %3940 = vmatprep.mubr.msk.bf16.mxu1 %vm1316_vm0, %v3073_v3 }
 0x3a0   : > { %v1897_v11 = vpop.permute.xlu1 %1896  ;;  %v3059_v0 = vld [vmem:[#allocation3 + $0xf0] sm:$0xff] }
 0x3a1   : > { %1934 = vst.msk [vmem:[#allocation3 + $0x108] sm:$0xff] %vm1922_vm6, %v1897_v11  ;;  %3389 = vmatmul.mubr.bf16.gmra.mrb[40].mxu0 %v3059_v0  ;;  %v3063_v12 = vld [vmem:[#allocation3 + $0x110] sm:$0xff] }
 0x3a2   : > { %3396 = vmatprep.mubr.bf16.mxu0 %v3063_v12  ;;  %v6268_v12 = vld [vmem:[%s6334_s6] ss:$0 sm:$0xff] }
 0x3a4   : > { %v2042_v29 = vpop.permute.xlu1 %2041 }
 0x3a5   : > { %2079 = vst.msk [vmem:[#allocation3 + $0x108] sm:$0xff] %vm2067_vm7, %v2042_v29  ;;  %3941 = vmatmul.mubr.msk.bf16.gmra.mrb[44].mxu1 %vm1316_vm0, %v3076_v60 }
 0x3ac   : > { %v3062_v41 = vld [vmem:[#allocation3 + $0x108] sm:$0xff] }
 0x3ad   : > { %3397 = vmatmul.mubr.bf16.gmra.mrb[44].mxu0 %v3062_v41 }
 0x3cd   : > { %v3794_v39 = vpop.f32.mrb[0].mxu0 }
 0x3ce   : > { %v3795_v15 = vpop.f32.mrb[1].mxu0 }
 0x3cf   : > { %v3796_v55 = vadd.f32 %v3795_v15, %v3794_v39  ;;  %v3797_v36 = vpop.f32.mrb[2].mxu0 }
 0x3d0   : > { %v3798_v20 = vpop.f32.mrb[3].mxu0 }
 0x3d1   : > { %v6241_v40 = vadd.f32 %v3798_v20, %v3797_v36  ;;  %v3311_v41 = vadd.f32 %v3796_v55, %v6268_v12 }
 0x3d9   : > { %v3800_v35 = vpop.f32.mrb[4].mxu0 }
 0x3da   : > { %v3801_v21 = vpop.f32.mrb[5].mxu0 }
 0x3db   : > { %v3802_v9 = vadd.f32 %v3801_v21, %v3800_v35  ;;  %v3803_v18 = vpop.f32.mrb[6].mxu0  ;;  %v3314_v21 = vadd.f32 %v6241_v40, %v6268_v12 }
 0x3dc   : > { %v3804_v33 = vpop.f32.mrb[7].mxu0 }
 0x3dd   : > { %v3805_v5 = vadd.f32 %v3804_v33, %v3803_v18  ;;  %v3319_v60 = vadd.f32 %v3802_v9, %v6268_v12 }
 0x3df   : > { %v3322_v36 = vadd.f32 %v3805_v5, %v6268_v12 }
 0x3e3   : > { %v3806_v23 = vpop.f32.mrb[8].mxu0 }
 0x3e4   : > { %v3807_v54 = vpop.f32.mrb[9].mxu0 }
 0x3e5   : > { %v6243_v26 = vadd.f32 %v3807_v54, %v3806_v23  ;;  %v3809_v30 = vpop.f32.mrb[10].mxu0 }
 0x3e6   : > { %v3810_v43 = vpop.f32.mrb[11].mxu0 }
 0x3e7   : > { %v6245_v19 = vadd.f32 %v3810_v43, %v3809_v30  ;;  %v3327_v5 = vadd.f32 %v6243_v26, %v6268_v12 }
 0x3f0   : > { %v3866_v61 = vpop.f32.mrb[0].mxu1 }
 0x3f1   : > { %v3867_v53 = vpop.f32.mrb[1].mxu1 }
 0x3f2   : > { %v6247_v42 = vadd.f32 %v3867_v53, %v3866_v61  ;;  %v3869_v1 = vpop.f32.mrb[2].mxu1 }
 0x3f3   : > { %v3870_v17 = vpop.f32.mrb[3].mxu1 }
 0x3f4   : > { %v6249_v34 = vadd.f32 %v3870_v17, %v3869_v1 }
 0x3fb   : > { %v3812_v47 = vpop.f32.mrb[12].mxu0 }
 0x3fc   : > { %v3813_v31 = vpop.f32.mrb[13].mxu0 }
 0x3fd   : > { %v3814_v58 = vadd.f32 %v3813_v31, %v3812_v47  ;;  %v3815_v27 = vpop.f32.mrb[14].mxu0 }
 0x3fe   : > { %v3816_v59 = vpop.f32.mrb[15].mxu0 }
 0x3ff   : > { %v3817_v10 = vadd.f32 %v3816_v59, %v3815_v27  ;;  %v3335_v55 = vadd.f32 %v3814_v58, %v6268_v12  ;;  %v3330_v59 = vadd.f32 %v6245_v19, %v6268_v12 }
 0x401   : > { %v3338_v40 = vadd.f32 %v3817_v10, %v6268_v12 }
 0x408   : > { %v3872_v7 = vpop.f32.mrb[4].mxu1 }
 0x409   : > { %v3873_v13 = vpop.f32.mrb[5].mxu1 }
 0x40a   : > { %v6251_v38 = vadd.f32 %v3873_v13, %v3872_v7  ;;  %v3875_v25 = vpop.f32.mrb[6].mxu1 }
 0x40b   : > { %v3876_v50 = vpop.f32.mrb[7].mxu1 }
 0x40c   : > { %v6253_v62 = vadd.f32 %v3876_v50, %v3875_v25 }
 0x413   : > { %v3818_v57 = vpop.f32.mrb[16].mxu0 }
 0x414   : > { %v3819_v63 = vpop.f32.mrb[17].mxu0 }
 0x415   : > { %v3820_v8 = vadd.f32 %v3819_v63, %v3818_v57  ;;  %v3821_v6 = vpop.f32.mrb[18].mxu0 }
 0x416   : > { %v3822_v51 = vpop.f32.mrb[19].mxu0 }
 0x417   : > { %v6255_v16 = vadd.f32 %v3822_v51, %v3821_v6  ;;  %v3343_v26 = vadd.f32 %v3820_v8, %v6268_v12 }
 0x420   : > { %v3878_v14 = vpop.f32.mrb[8].mxu1 }
 0x421   : > { %v3879_v32 = vpop.f32.mrb[9].mxu1 }
 0x422   : > { %v6257_v24 = vadd.f32 %v3879_v32, %v3878_v14  ;;  %v3881_v28 = vpop.f32.mrb[10].mxu1 }
 0x423   : > { %v3882_v46 = vpop.f32.mrb[11].mxu1 }
 0x424   : > { %v6259_v56 = vadd.f32 %v3882_v46, %v3881_v28  ;;  %v3346_v46 = vadd.f32 %v6255_v16, %v6268_v12 }
 0x42b   : > { %v3824_v37 = vpop.f32.mrb[20].mxu0 }
 0x42c   : > { %v3825_v4 = vpop.f32.mrb[21].mxu0 }
 0x42d   : > { %v3826_v49 = vadd.f32 %v3825_v4, %v3824_v37  ;;  %v3827_v48 = vpop.f32.mrb[22].mxu0 }
 0x42e   : > { %v3828_v22 = vpop.f32.mrb[23].mxu0 }
 0x42f   : > { %v3829_v2 = vadd.f32 %v3828_v22, %v3827_v48  ;;  %v3351_v58 = vadd.f32 %v3826_v49, %v6268_v12 }
 0x431   : > { %v3354_v10 = vadd.f32 %v3829_v2, %v6268_v12 }
 0x438   : > { %v3884_v52 = vpop.f32.mrb[12].mxu1 }
 0x439   : > { %v3885_v45 = vpop.f32.mrb[13].mxu1 }
 0x43a   : > { %v6261_v44 = vadd.f32 %v3885_v45, %v3884_v52  ;;  %v3887_v3 = vpop.f32.mrb[14].mxu1 }
 0x43b   : > { %v3888_v11 = vpop.f32.mrb[15].mxu1 }
 0x43c   : > { %v6263_v0 = vadd.f32 %v3888_v11, %v3887_v3 }
 0x440   : > { %v3914_v29 = vpop.f32.mrb[16].mxu1 }
 0x441   : > { %v3480_v39 = vadd.f32 %v3914_v29, %v3319_v60  ;;  %v3471_v15 = vpop.f32.mrb[17].mxu1 }
 0x442   : > { %v3472_v20 = vadd.f32 %v3471_v15, %v3311_v41  ;;  %v3915_v35 = vpop.f32.mrb[18].mxu1 }
 0x443   : > { %v3483_v18 = vadd.f32 %v3915_v35, %v3322_v36  ;;  %v3474_v33 = vpop.f32.mrb[19].mxu1 }
 0x444   : > { %v3475_v23 = vadd.f32 %v3474_v33, %v3314_v21  ;;  %3598 = vxpose.xlu0.b32.start [1/16] (narrow) %v3472_v20, 8  ;;  %v3830_v54 = vpop.f32.mrb[24].mxu0 }
 0x445   : > { %v3831_v30 = vpop.f32.mrb[25].mxu0 }
 0x446   : > { %v3832_v43 = vadd.f32 %v3831_v30, %v3830_v54  ;;  %v3833_v9 = vpop.f32.mrb[26].mxu0 }
 0x447   : > { %v3834_v61 = vpop.f32.mrb[27].mxu0 }
 0x448   : > { %v3835_v53 = vadd.f32 %v3834_v61, %v3833_v9  ;;  %v3918_v1 = vpop.f32.mrb[20].mxu1  ;;  %3599 = vxpose.xlu0.b32.cont [2/16] (narrow) %v3475_v23, 8  ;;  %v3359_v45 = vadd.f32 %v3832_v43, %v6268_v12 }
 0x449   : > { %v3496_v17 = vadd.f32 %v3918_v1, %v3335_v55  ;;  %v3487_v47 = vpop.f32.mrb[21].mxu1 }
 0x44a   : > { %v3488_v31 = vadd.f32 %v3487_v47, %v3327_v5  ;;  %v3919_v27 = vpop.f32.mrb[22].mxu1  ;;  %v3362_v16 = vadd.f32 %v3835_v53, %v6268_v12 }
 0x44b   : > { %v3499_v7 = vadd.f32 %v3919_v27, %v3338_v40  ;;  %v3490_v13 = vpop.f32.mrb[23].mxu1 }
 0x44c   : > { %v3491_v25 = vadd.f32 %v3490_v13, %v3330_v59  ;;  %3600 = vxpose.xlu0.b32.cont [3/16] (narrow) %v3480_v39, 8 }
 0x450   : > { %v3922_v50 = vpop.f32.mrb[24].mxu1  ;;  %3601 = vxpose.xlu0.b32.cont [4/16] (narrow) %v3483_v18, 8  ;;  %v3836_v57 = vpop.f32.mrb[28].mxu0 }
 0x451   : > { %v3512_v63 = vadd.f32 %v3922_v50, %v3351_v58  ;;  %v3837_v6 = vpop.f32.mrb[29].mxu0  ;;  %v3503_v51 = vpop.f32.mrb[25].mxu1 }
 0x452   : > { %v3838_v14 = vadd.f32 %v3837_v6, %v3836_v57  ;;  %v3504_v32 = vadd.f32 %v3503_v51, %v3343_v26  ;;  %v3839_v28 = vpop.f32.mrb[30].mxu0  ;;  %v3923_v19 = vpop.f32.mrb[26].mxu1  ;;  %v3415_v57 = vadd.f32 %v6251_v38, %v6268_v12  ;;  %v3407_v51 = vadd.f32 %v6247_v42, %v6268_v12 }
 0x453   : > { %v3515_v37 = vadd.f32 %v3923_v19, %v3354_v10  ;;  %v3840_v4 = vpop.f32.mrb[31].mxu0  ;;  %v3506_v49 = vpop.f32.mrb[27].mxu1  ;;  %v3410_v19 = vadd.f32 %v6249_v34, %v6268_v12  ;;  %v3423_v34 = vadd.f32 %v6257_v24, %v6268_v12 }
 0x454   : > { %v3841_v48 = vadd.f32 %v3840_v4, %v3839_v28  ;;  %v3507_v22 = vadd.f32 %v3506_v49, %v3346_v46  ;;  %3602 = vxpose.xlu0.b32.cont [5/16] (narrow) %v3488_v31, 8  ;;  %v3367_v8 = vadd.f32 %v3838_v14, %v6268_v12 }
 0x456   : > { %v3370_v11 = vadd.f32 %v3841_v48, %v6268_v12 }
 0x458   : > { %v3926_v52 = vpop.f32.mrb[28].mxu1  ;;  %3603 = vxpose.xlu0.b32.cont [6/16] (narrow) %v3491_v25, 8 }
 0x459   : > { %v6288_v2 = vadd.f32 %v3926_v52, %v3367_v8  ;;  %v3519_v3 = vpop.f32.mrb[29].mxu1  ;;  %v3431_v8 = vadd.f32 %v6261_v44, %v6268_v12  ;;  %v3426_v44 = vadd.f32 %v6259_v56, %v6268_v12 }
 0x45a   : > { %v3520_v60 = vadd.f32 %v3519_v3, %v3359_v45  ;;  %v3927_v29 = vpop.f32.mrb[30].mxu1 }
 0x45b   : > { %v6292_v41 = vadd.f32 %v3927_v29, %v3370_v11  ;;  %v3522_v39 = vpop.f32.mrb[31].mxu1 }
 0x45c   : > { %v3523_v15 = vadd.f32 %v3522_v39, %v3362_v16  ;;  %3604 = vxpose.xlu0.b32.cont [7/16] (narrow) %v3496_v17, 8  ;;  %v3842_v36 = vpop.f32.mrb[32].mxu0 }
 0x45d   : > { %v3843_v20 = vpop.f32.mrb[33].mxu0 }
 0x45e   : > { %v3844_v35 = vadd.f32 %v3843_v20, %v3842_v36  ;;  %v3845_v21 = vpop.f32.mrb[34].mxu0 }
 0x45f   : > { %v3846_v18 = vpop.f32.mrb[35].mxu0 }
 0x460   : > { %v3847_v33 = vadd.f32 %v3846_v18, %v3845_v21  ;;  %v3930_v23 = vpop.f32.mrb[32].mxu1  ;;  %3605 = vxpose.xlu0.b32.cont [8/16] (narrow) %v3499_v7, 8  ;;  %v3375_v54 = vadd.f32 %v3844_v35, %v6268_v12 }
 0x461   : > { %v3535_v30 = vpop.f32.mrb[33].mxu1 }
 0x462   : > { %v3536_v43 = vadd.f32 %v3535_v30, %v3375_v54  ;;  %v3931_v9 = vpop.f32.mrb[34].mxu1  ;;  %v3378_v61 = vadd.f32 %v3847_v33, %v6268_v12 }
 0x463   : > { %v3538_v55 = vpop.f32.mrb[35].mxu1 }
 0x464   : > { %v3539_v53 = vadd.f32 %v3538_v55, %v3378_v61  ;;  %3606 = vxpose.xlu0.b32.cont [9/16] (narrow) %v3504_v32, 8  ;;  %3630 = vxpose.xlu1.b32.start [1/16] (narrow) %v3536_v43, 8  ;;  %v3418_v32 = vadd.f32 %v6253_v62, %v6268_v12 }
 0x468   : > { %v6296_v1 = vpop.f32.mrb[36].mxu1  ;;  %3607 = vxpose.xlu0.b32.cont [10/16] (narrow) %v3507_v22, 8  ;;  %3631 = vxpose.xlu1.b32.cont [2/16] (narrow) %v3539_v53, 8  ;;  %v3848_v5 = vpop.f32.mrb[36].mxu0 }
 0x469   : > { %v3849_v17 = vpop.f32.mrb[37].mxu0  ;;  %v3551_v47 = vpop.f32.mrb[37].mxu1 }
 0x46a   : > { %v3850_v40 = vadd.f32 %v3849_v17, %v3848_v5  ;;  %v3851_v31 = vpop.f32.mrb[38].mxu0  ;;  %v3935_v27 = vpop.f32.mrb[38].mxu1 }
 0x46b   : > { %v3852_v59 = vpop.f32.mrb[39].mxu0  ;;  %v3554_v7 = vpop.f32.mrb[39].mxu1 }
 0x46c   : > { %v3383_v13 = vadd.f32 %v3850_v40, %v6268_v12  ;;  %v3853_v25 = vadd.f32 %v3852_v59, %v3851_v31  ;;  %3608 = vxpose.xlu0.b32.cont [11/16] (narrow) %v3512_v63, 8 }
 0x46e   : > { %v3544_v58 = vadd.f32 %v3930_v23, %v3383_v13  ;;  %v3386_v50 = vadd.f32 %v3853_v25, %v6268_v12 }
 0x470   : > { %v3547_v26 = vadd.f32 %v3931_v9, %v3386_v50  ;;  %v3938_v6 = vpop.f32.mrb[40].mxu1  ;;  %3609 = vxpose.xlu0.b32.cont [12/16] (narrow) %v3515_v37, 8  ;;  %3632 = vxpose.xlu1.b32.cont [3/16] (narrow) %v3544_v58, 8 }
 0x471   : > { %v3576_v10 = vadd.f32 %v3938_v6, %v3415_v57  ;;  %v3567_v14 = vpop.f32.mrb[41].mxu1 }
 0x472   : > { %v3568_v28 = vadd.f32 %v3567_v14, %v3407_v51  ;;  %v3939_v63 = vpop.f32.mrb[42].mxu1 }
 0x473   : > { %v3579_v46 = vadd.f32 %v3939_v63, %v3418_v32  ;;  %v3570_v4 = vpop.f32.mrb[43].mxu1 }
 0x474   : > { %v3571_v38 = vadd.f32 %v3570_v4, %v3410_v19  ;;  %3610 = vxpose.xlu0.b32.cont [13/16] (narrow) %v3520_v60, 8  ;;  %3633 = vxpose.xlu1.b32.cont [4/16] (narrow) %v3547_v26, 8  ;;  %v3854_v37 = vpop.f32.mrb[40].mxu0  ;;  %v3434_v60 = vadd.f32 %v6263_v0, %v6268_v12 }
 0x475   : > { %v3855_v49 = vpop.f32.mrb[41].mxu0 }
 0x476   : > { %v3856_v48 = vadd.f32 %v3855_v49, %v3854_v37  ;;  %v3857_v22 = vpop.f32.mrb[42].mxu0 }
 0x477   : > { %v3858_v42 = vpop.f32.mrb[43].mxu0 }
 0x478   : > { %v3391_v62 = vadd.f32 %v3856_v48, %v6268_v12  ;;  %v3859_v52 = vadd.f32 %v3858_v42, %v3857_v22  ;;  %v3942_v45 = vpop.f32.mrb[44].mxu1  ;;  %3611 = vxpose.xlu0.b32.cont [14/16] (narrow) %v3523_v15, 8 }
 0x479   : > { %v3592_v3 = vadd.f32 %v3942_v45, %v3431_v8  ;;  %v3583_v11 = vpop.f32.mrb[45].mxu1 }
 0x47a   : > { %v3552_v29 = vadd.f32 %v3551_v47, %v3391_v62  ;;  %v3394_v16 = vadd.f32 %v3859_v52, %v6268_v12  ;;  %v3584_v39 = vadd.f32 %v3583_v11, %v3423_v34  ;;  %v3943_v36 = vpop.f32.mrb[46].mxu1 }
 0x47b   : > { %v3595_v20 = vadd.f32 %v3943_v36, %v3434_v60  ;;  %v3586_v35 = vpop.f32.mrb[47].mxu1 }
 0x47c   : > { %v3555_v21 = vadd.f32 %v3554_v7, %v3394_v16  ;;  %v3587_v15 = vadd.f32 %v3586_v35, %v3426_v44  ;;  %3612 = vxpose.xlu0.b32.cont [15/16] (narrow) %v6288_v2, 8  ;;  %3634 = vxpose.xlu1.b32.cont [5/16] (narrow) %v3552_v29, 8 }
 0x480   : > { %3613 = vxpose.xlu0.b32.end [16/16] (narrow) %v6292_v41, 8  ;;  %3635 = vxpose.xlu1.b32.cont [6/16] (narrow) %v3555_v21, 8  ;;  %v3860_v24 = vpop.f32.mrb[44].mxu0 }
 0x481   : > { %v3861_v0 = vpop.f32.mrb[45].mxu0 }
 0x482   : > { %v3862_v18 = vadd.f32 %v3861_v0, %v3860_v24  ;;  %v3863_v33 = vpop.f32.mrb[46].mxu0 }
 0x483   : > { %v3864_v23 = vpop.f32.mrb[47].mxu0 }
 0x484   : > { %v3399_v54 = vadd.f32 %v3862_v18, %v6268_v12  ;;  %v3865_v30 = vadd.f32 %v3864_v23, %v3863_v33 }
 0x486   : > { %v3560_v56 = vadd.f32 %v6296_v1, %v3399_v54  ;;  %v3402_v43 = vadd.f32 %v3865_v30, %v6268_v12 }
 0x488   : > { %v3563_v9 = vadd.f32 %v3935_v27, %v3402_v43  ;;  %3636 = vxpose.xlu1.b32.cont [7/16] (narrow) %v3560_v56, 8 }
 0x48c   : > { %3637 = vxpose.xlu1.b32.cont [8/16] (narrow) %v3563_v9, 8 }
 0x490   : > { %3638 = vxpose.xlu1.b32.cont [9/16] (narrow) %v3568_v28, 8 }
 0x494   : > { %3639 = vxpose.xlu1.b32.cont [10/16] (narrow) %v3571_v38, 8 }
 0x498   : > { %3640 = vxpose.xlu1.b32.cont [11/16] (narrow) %v3576_v10, 8 }
 0x49c   : > { %3641 = vxpose.xlu1.b32.cont [12/16] (narrow) %v3579_v46, 8 }
 0x4a0   : > { %3642 = vxpose.xlu1.b32.cont [13/16] (narrow) %v3584_v39, 8 }
 0x4a4   : > { %3643 = vxpose.xlu1.b32.cont [14/16] (narrow) %v3587_v15, 8 }
 0x4a8   : > { %3644 = vxpose.xlu1.b32.cont [15/16] (narrow) %v3592_v3, 8 }
 0x4ac   : > { %3645 = vxpose.xlu1.b32.end [16/16] (narrow) %v3595_v20, 8 }
 0x4c4   : > { %v3614_v2 = vpop.trf.xlu0 }
 0x4c5   : > { %v3664_v41 = vrot.slane %v3614_v2, 4 }
 0x4c7   : > { %3668 = vst [vmem:[%s4102_s10 + $0x10] ss:$-12 sps:$4 sm:$0xff] %v3664_v41  }
 0x4f0   : > { %v3646_v61 = vpop.trf.xlu1 }
 0x4f1   : > { %v3665_v55 = vrot.slane %v3646_v61, 4 }
 0x4f3   : > { %3669 = vst [vmem:[%s4102_s10 + $0x18] ss:$-12 sps:$4 sm:$0xff] %v3665_v55  }
 0x4f4 PF: > { %s17_s24 = sadd.s32 1, %s4038_s24  }
 0x4f5   : > { %p14_p4 = scmp.ge.s32.totalorder %s17_s24, 4  }
 0x4f7   :  { %16 = sbr.rel (!%p14_p4) target bundleno = 1 (0x1), region = 81 }

</bundles_post_ra>
